<compile_context>
chip_gen: v6e
topology: v6e:2x2x1
jax: 0.10.0
libtpu: 0.0.40
codegen_flags: <defaults>
</compile_context>

<pallas_src>
import functools

import jax
import jax.numpy as jnp
from jax.experimental import pallas as pl
from jax.experimental.pallas import tpu as pltpu


def _vq_kernel(z_ref, emb_t_ref, emb_ref, esq_ref,
               zq_ref, idx1_ref, idx2_ref, loss_ref, cnt_ref,
               *, n_e, tile_n, n_valid):
    # z_ref:     (tile_n, D) f32       tile of flattened inputs
    # emb_t_ref: (D, n_e)    f32/bf16  pre-transposed codebook (distance matmul)
    # emb_ref:   (n_e, D)    f32       codebook (one-hot gather matmul)
    # esq_ref:   (1, n_e)    f32       precomputed ||e||^2 row
    z = z_ref[...]

    # ||z||^2 + ||e||^2 - 2 z.e  -> (tile_n, n_e); MXU matmul, no in-kernel transpose
    ze = jnp.dot(z.astype(emb_t_ref.dtype), emb_t_ref[...],
                 preferred_element_type=jnp.float32)
    z_sq = jnp.sum(z * z, axis=1, keepdims=True)                       # (tile_n, 1)
    dists = z_sq + esq_ref[...] - 2.0 * ze                             # (tile_n, n_e)

    col = jax.lax.broadcasted_iota(jnp.int32, dists.shape, 1)
    big = jnp.int32(n_e)

    # closest code (lowest index on ties, matching torch argmin/topk behavior)
    min1 = jnp.min(dists, axis=1, keepdims=True)
    idx1 = jnp.min(jnp.where(dists == min1, col, big), axis=1, keepdims=True)

    # second closest code: mask out the argmin column, argmin again
    masked = jnp.where(col == idx1, jnp.float32(jnp.inf), dists)
    min2 = jnp.min(masked, axis=1, keepdims=True)
    idx2 = jnp.min(jnp.where(masked == min2, col, big), axis=1, keepdims=True)

    one_hot = (col == idx1).astype(jnp.float32)                        # (tile_n, n_e)
    zq = jnp.dot(one_hot, emb_ref[...], preferred_element_type=jnp.float32)

    zq_ref[...] = zq
    idx1_ref[...] = idx1
    idx2_ref[...] = idx2

    # per-tile partial reductions (no resident accumulators -> grid axis is parallel)
    row = (pl.program_id(0) * tile_n
           + jax.lax.broadcasted_iota(jnp.int32, (tile_n, 1), 0))
    valid = (row < n_valid).astype(jnp.float32)                        # mask padded rows
    loss_ref[...] = jnp.sum(((zq - z) ** 2) * valid).reshape(1, 1, 1)
    cnt_ref[...] = jnp.sum(one_hot * valid, axis=0,
                           keepdims=True).reshape(1, 1, n_e)


def vector_quantizer_forward(z, embedding, beta, *, tile_n=256,
                             dist_matmul_dtype=None, vmem_limit_bytes=None):
    """z: (B, C, H, W) f32 NCHW (like the PyTorch module). embedding: (n_e, e_dim)."""
    B, C, H, W = z.shape
    n_e, e_dim = embedding.shape
    assert C == e_dim

    # glue: NCHW -> NHWC -> (N, e_dim); pad N up to a multiple of tile_n
    z_nhwc = jnp.transpose(z, (0, 2, 3, 1))
    z_flat = z_nhwc.reshape(-1, e_dim).astype(jnp.float32)
    N = z_flat.shape[0]
    grid_n = pl.cdiv(N, tile_n)
    n_pad = grid_n * tile_n
    if n_pad != N:
        z_flat = jnp.pad(z_flat, ((0, n_pad - N), (0, 0)))

    emb = embedding.astype(jnp.float32)
    emb_t = emb.T                                   # one-time transpose in the wrapper
    if dist_matmul_dtype is not None:
        emb_t = emb_t.astype(dist_matmul_dtype)     # bf16 MXU path for v6e/v7x
    e_sq = jnp.sum(emb * emb, axis=1)[None, :]      # (1, n_e)

    kernel = functools.partial(_vq_kernel, n_e=n_e, tile_n=tile_n, n_valid=N)

    out_shapes = (
        jax.ShapeDtypeStruct((n_pad, e_dim), jnp.float32),    # z_q flat
        jax.ShapeDtypeStruct((n_pad, 1), jnp.int32),          # nearest-code index
        jax.ShapeDtypeStruct((n_pad, 1), jnp.int32),          # 2nd-nearest-code index
        jax.ShapeDtypeStruct((grid_n, 1, 1), jnp.float32),    # per-tile sum((zq-z)^2)
        jax.ShapeDtypeStruct((grid_n, 1, n_e), jnp.float32),  # per-tile code counts
    )

    grid_spec = pltpu.PrefetchScalarGridSpec(
        num_scalar_prefetch=0,
        grid=(grid_n,),
        in_specs=[
            pl.BlockSpec((tile_n, e_dim), lambda i: (i, 0)),
            pl.BlockSpec((e_dim, n_e), lambda i: (0, 0)),
            pl.BlockSpec((n_e, e_dim), lambda i: (0, 0)),
            pl.BlockSpec((1, n_e), lambda i: (0, 0)),
        ],
        out_specs=[
            pl.BlockSpec((tile_n, e_dim), lambda i: (i, 0)),
            pl.BlockSpec((tile_n, 1), lambda i: (i, 0)),
            pl.BlockSpec((tile_n, 1), lambda i: (i, 0)),
            pl.BlockSpec((1, 1, 1), lambda i: (i, 0, 0)),
            pl.BlockSpec((1, 1, n_e), lambda i: (i, 0, 0)),
        ],
    )

    in_bytes = (z_flat.size * 4 + emb_t.size * emb_t.dtype.itemsize
                + emb.size * 4 + e_sq.size * 4)
    out_bytes = n_pad * e_dim * 4 + 2 * n_pad * 4 + grid_n * (1 + n_e) * 4
    cost = pl.CostEstimate(
        flops=int(4 * n_pad * n_e * e_dim + 8 * n_pad * n_e),
        transcendentals=0,
        bytes_accessed=int(in_bytes + out_bytes))

    zq_flat, idx1, idx2, loss_part, cnt_part = pl.pallas_call(
        kernel,
        out_shape=out_shapes,
        grid_spec=grid_spec,
        cost_estimate=cost,
        compiler_params=pltpu.CompilerParams(
            dimension_semantics=("parallel",),
            vmem_limit_bytes=vmem_limit_bytes),
    )(z_flat, emb_t, emb, e_sq)

    # drop padding rows
    zq_flat = zq_flat[:N]
    idx1 = idx1[:N]
    idx2 = idx2[:N]

    # glue: losses / perplexity from per-tile partial sums
    mse = jnp.sum(loss_part) / jnp.float32(N * e_dim)
    # loss = mean((sg[z_q]-z)^2) + beta*mean((z_q-sg[z])^2); forward value (1+beta)*mse
    loss = (1.0 + beta) * mse
    # TODO(synk): straight-through estimator (z_q = z + sg(z_q - z)) and the
    # stop_gradient split of the two loss terms are autograd semantics; this kernel
    # implements the forward values only.

    z_q = jnp.transpose(zq_flat.reshape(B, H, W, e_dim), (0, 3, 1, 2))

    counts = jnp.sum(cnt_part[:, 0, :], axis=0)                        # (n_e,)
    avg_probs = counts / jnp.float32(N)
    perplexity = jnp.exp(-jnp.sum(avg_probs * jnp.log(avg_probs + 1e-10)))

    # min_encodings rebuilt outside the kernel (removes the (N, n_e) f32 store --
    # the dominant HBM stream -- from the hot path)
    min_encodings = jax.nn.one_hot(idx1[:, 0], n_e, dtype=jnp.float32)

    return loss, z_q, perplexity, min_encodings, idx1, idx2


def _reference(z, embedding, beta):
    B, C, H, W = z.shape
    e_dim = embedding.shape[1]
    zf = jnp.transpose(z, (0, 2, 3, 1)).reshape(-1, e_dim)
    d = (jnp.sum(zf ** 2, 1, keepdims=True) + jnp.sum(embedding ** 2, 1)
         - 2.0 * zf @ embedding.T)
    i1 = jnp.argmin(d, axis=1)
    d2 = d.at[jnp.arange(zf.shape[0]), i1].set(jnp.inf)
    i2 = jnp.argmin(d2, axis=1)
    zq_rows = embedding[i1]
    loss_ref = (1.0 + beta) * jnp.mean((zq_rows - zf) ** 2)
    zq = jnp.transpose(zq_rows.reshape(B, H, W, e_dim), (0, 3, 1, 2))
    return loss_ref, zq, i1, i2


if __name__ == "__main__":
    # small, deterministic config consistent with the module
    n_e, e_dim, beta = 64, 32, 0.25
    B, C, H, W = 2, e_dim, 16, 16          # N = B*H*W = 512 -> two 256-row tiles

    key = jax.random.PRNGKey(0)
    kz, ke, kz2 = jax.random.split(key, 3)
    z = jax.random.normal(kz, (B, C, H, W), dtype=jnp.float32)
    # deterministic "nn.Embedding" init: uniform(-1/n_e, 1/n_e)
    embedding = jax.random.uniform(
        ke, (n_e, e_dim), dtype=jnp.float32, minval=-1.0 / n_e, maxval=1.0 / n_e)

    outs = jax.block_until_ready(vector_quantizer_forward(z, embedding, beta))
    loss, z_q, perplexity, min_enc, idx1, idx2 = outs

    loss_r, zq_r, i1_r, i2_r = _reference(z, embedding, beta)
    N = B * H * W
    assert z_q.shape == (B, C, H, W)
    assert min_enc.shape == (N, n_e)
    assert bool(jnp.all(idx1[:, 0] == i1_r))
    assert bool(jnp.all(idx2[:, 0] == i2_r))
    assert bool(jnp.allclose(z_q, zq_r, atol=1e-5))
    assert bool(jnp.allclose(loss, loss_r, rtol=1e-4, atol=1e-6))
    assert bool(jnp.all(jnp.argmax(min_enc, axis=1) == i1_r))

    # second config: N (=81) not a multiple of tile_n, exercises the padded-tail mask
    z2 = jax.random.normal(kz2, (1, e_dim, 9, 9), dtype=jnp.float32)
    outs2 = jax.block_until_ready(vector_quantizer_forward(z2, embedding, beta))
    loss2, z_q2, perp2, enc2, i1b, i2b = outs2
    loss2_r, zq2_r, i1b_r, i2b_r = _reference(z2, embedding, beta)
    assert z_q2.shape == z2.shape
    assert enc2.shape == (81, n_e)
    assert bool(jnp.all(i1b[:, 0] == i1b_r))
    assert bool(jnp.allclose(z_q2, zq2_r, atol=1e-5))
    assert bool(jnp.allclose(loss2, loss2_r, rtol=1e-4, atol=1e-6))

    print("KERNEL_OK")
</pallas_src>

<mosaic_0001>
module attributes {stable_mosaic.version = 11 : i64} {
  func.func @_vq_kernel(%arg0: i32, %arg1: memref<256x32xf32, #tpu.memory_space<vmem>>, %arg2: memref<32x64xf32, #tpu.memory_space<vmem>>, %arg3: memref<64x32xf32, #tpu.memory_space<vmem>>, %arg4: memref<1x64xf32, #tpu.memory_space<vmem>>, %arg5: memref<256x32xf32, #tpu.memory_space<vmem>>, %arg6: memref<256x1xi32, #tpu.memory_space<vmem>>, %arg7: memref<256x1xi32, #tpu.memory_space<vmem>>, %arg8: memref<1x1x1xf32, #tpu.memory_space<vmem>>, %arg9: memref<1x1x64xf32, #tpu.memory_space<vmem>>) attributes {dimension_semantics = [#tpu.dimension_semantics<parallel>], iteration_bounds = array<i64: 2>, scalar_prefetch = 0 : i64, scratch_operands = 0 : i64, tpu.core_type = #tpu.core_type<tc>, window_params = [{transform_indices = @transform_0, window_bounds = array<i64: 256, 32>}, {pipeline_mode = #tpu.pipeline_mode<synchronous>, transform_indices = @transform_1, window_bounds = array<i64: 32, 64>}, {pipeline_mode = #tpu.pipeline_mode<synchronous>, transform_indices = @transform_2, window_bounds = array<i64: 64, 32>}, {pipeline_mode = #tpu.pipeline_mode<synchronous>, transform_indices = @transform_3, window_bounds = array<i64: 1, 64>}, {transform_indices = @transform_4, window_bounds = array<i64: 256, 32>}, {transform_indices = @transform_5, window_bounds = array<i64: 256, 1>}, {transform_indices = @transform_6, window_bounds = array<i64: 256, 1>}, {transform_indices = @transform_7, window_bounds = array<i64: 1, 1, 1>}, {transform_indices = @transform_8, window_bounds = array<i64: 1, 1, 64>}]} {
    %c0 = arith.constant 0 : index
    %c0_0 = arith.constant 0 : index
    %0 = vector.load %arg1[%c0, %c0_0] : memref<256x32xf32, #tpu.memory_space<vmem>>, vector<256x32xf32>
    %c0_1 = arith.constant 0 : index
    %c0_2 = arith.constant 0 : index
    %1 = vector.load %arg2[%c0_1, %c0_2] : memref<32x64xf32, #tpu.memory_space<vmem>>, vector<32x64xf32>
    %cst = arith.constant dense<0.000000e+00> : vector<256x64xf32>
    %2 = tpu.matmul %0, %1, %cst {dimension_numbers = #tpu.dot_dimension_numbers<[1], [0], [0], [1], [0, 0, 1, 1], [], []>} : vector<256x32xf32>, vector<32x64xf32>, vector<256x64xf32> -> vector<256x64xf32>
    %3 = arith.mulf %0, %0 : vector<256x32xf32>
    %cst_3 = arith.constant dense<0.000000e+00> : vector<256xf32>
    %4 = vector.multi_reduction <add>, %3, %cst_3 [1] : vector<256x32xf32> to vector<256xf32>
    %5 = vector.shape_cast %4 : vector<256xf32> to vector<256x1xf32>
    %c0_4 = arith.constant 0 : index
    %c0_5 = arith.constant 0 : index
    %6 = vector.load %arg4[%c0_4, %c0_5] : memref<1x64xf32, #tpu.memory_space<vmem>>, vector<1x64xf32>
    %7 = vector.broadcast %5 : vector<256x1xf32> to vector<256x64xf32>
    %8 = vector.broadcast %6 : vector<1x64xf32> to vector<256x64xf32>
    %9 = arith.addf %7, %8 : vector<256x64xf32>
    %cst_6 = arith.constant 2.000000e+00 : f32
    %10 = vector.broadcast %cst_6 : f32 to vector<256x64xf32>
    %11 = arith.mulf %10, %2 : vector<256x64xf32>
    %12 = arith.subf %9, %11 : vector<256x64xf32>
    %13 = tpu.iota {dimensions = array<i32: 1>} : vector<256x64xi32>
    %cst_7 = arith.constant dense<0x7F800000> : vector<256xf32>
    %14 = vector.multi_reduction <minimumf>, %12, %cst_7 [1] : vector<256x64xf32> to vector<256xf32>
    %15 = vector.shape_cast %14 : vector<256xf32> to vector<256x1xf32>
    %16 = vector.broadcast %15 : vector<256x1xf32> to vector<256x64xf32>
    %17 = arith.cmpf oeq, %12, %16 : vector<256x64xf32>
    %c64_i32 = arith.constant 64 : i32
    %18 = vector.broadcast %c64_i32 : i32 to vector<256x64xi32>
    %19 = arith.select %17, %13, %18 : vector<256x64xi1>, vector<256x64xi32>
    %cst_8 = arith.constant dense<2147483647> : vector<256xi32>
    %20 = vector.multi_reduction <minsi>, %19, %cst_8 [1] : vector<256x64xi32> to vector<256xi32>
    %21 = vector.shape_cast %20 : vector<256xi32> to vector<256x1xi32>
    %22 = vector.broadcast %21 : vector<256x1xi32> to vector<256x64xi32>
    %23 = arith.cmpi eq, %13, %22 : vector<256x64xi32>
    %cst_9 = arith.constant 0x7F800000 : f32
    %24 = vector.broadcast %cst_9 : f32 to vector<256x64xf32>
    %25 = arith.select %23, %24, %12 : vector<256x64xi1>, vector<256x64xf32>
    %cst_10 = arith.constant dense<0x7F800000> : vector<256xf32>
    %26 = vector.multi_reduction <minimumf>, %25, %cst_10 [1] : vector<256x64xf32> to vector<256xf32>
    %27 = vector.shape_cast %26 : vector<256xf32> to vector<256x1xf32>
    %28 = vector.broadcast %27 : vector<256x1xf32> to vector<256x64xf32>
    %29 = arith.cmpf oeq, %25, %28 : vector<256x64xf32>
    %c64_i32_11 = arith.constant 64 : i32
    %30 = vector.broadcast %c64_i32_11 : i32 to vector<256x64xi32>
    %31 = arith.select %29, %13, %30 : vector<256x64xi1>, vector<256x64xi32>
    %cst_12 = arith.constant dense<2147483647> : vector<256xi32>
    %32 = vector.multi_reduction <minsi>, %31, %cst_12 [1] : vector<256x64xi32> to vector<256xi32>
    %33 = vector.shape_cast %32 : vector<256xi32> to vector<256x1xi32>
    %34 = vector.broadcast %21 : vector<256x1xi32> to vector<256x64xi32>
    %35 = arith.cmpi eq, %13, %34 : vector<256x64xi32>
    %36 = arith.extui %35 : vector<256x64xi1> to vector<256x64xi32>
    %37 = arith.sitofp %36 : vector<256x64xi32> to vector<256x64xf32>
    %c0_13 = arith.constant 0 : index
    %c0_14 = arith.constant 0 : index
    %38 = vector.load %arg3[%c0_13, %c0_14] : memref<64x32xf32, #tpu.memory_space<vmem>>, vector<64x32xf32>
    %cst_15 = arith.constant dense<0.000000e+00> : vector<256x32xf32>
    %39 = tpu.matmul %37, %38, %cst_15 {dimension_numbers = #tpu.dot_dimension_numbers<[1], [0], [0], [1], [0, 0, 1, 1], [], []>} : vector<256x64xf32>, vector<64x32xf32>, vector<256x32xf32> -> vector<256x32xf32>
    %c0_16 = arith.constant 0 : index
    %c0_17 = arith.constant 0 : index
    %40 = vector.load %arg5[%c0_16, %c0_17] : memref<256x32xf32, #tpu.memory_space<vmem>>, vector<256x32xf32>
    tpu.vector_store %arg5[%c0_16, %c0_17], %39 {strides = array<i32>} : memref<256x32xf32, #tpu.memory_space<vmem>>, vector<256x32xf32>,
    %c0_18 = arith.constant 0 : index
    %c0_19 = arith.constant 0 : index
    %41 = vector.load %arg6[%c0_18, %c0_19] : memref<256x1xi32, #tpu.memory_space<vmem>>, vector<256x1xi32>
    tpu.vector_store %arg6[%c0_18, %c0_19], %21 {strides = array<i32>} : memref<256x1xi32, #tpu.memory_space<vmem>>, vector<256x1xi32>,
    %c0_20 = arith.constant 0 : index
    %c0_21 = arith.constant 0 : index
    %42 = vector.load %arg7[%c0_20, %c0_21] : memref<256x1xi32, #tpu.memory_space<vmem>>, vector<256x1xi32>
    tpu.vector_store %arg7[%c0_20, %c0_21], %33 {strides = array<i32>} : memref<256x1xi32, #tpu.memory_space<vmem>>, vector<256x1xi32>,
    %c256_i32 = arith.constant 256 : i32
    %43 = arith.muli %arg0, %c256_i32 : i32
    %44 = tpu.iota {dimensions = array<i32: 0>} : vector<256x1xi32>
    %45 = vector.broadcast %43 : i32 to vector<256x1xi32>
    %46 = arith.addi %45, %44 : vector<256x1xi32>
    %c512_i32 = arith.constant 512 : i32
    %47 = vector.broadcast %c512_i32 : i32 to vector<256x1xi32>
    %48 = arith.cmpi slt, %46, %47 : vector<256x1xi32>
    %49 = arith.extui %48 : vector<256x1xi1> to vector<256x1xi32>
    %50 = arith.sitofp %49 : vector<256x1xi32> to vector<256x1xf32>
    %51 = arith.subf %39, %0 : vector<256x32xf32>
    %52 = arith.mulf %51, %51 : vector<256x32xf32>
    %53 = vector.broadcast %50 : vector<256x1xf32> to vector<256x32xf32>
    %54 = arith.mulf %52, %53 : vector<256x32xf32>
    %55 = vector.shape_cast %54 : vector<256x32xf32> to vector<1x256x32xf32>
    %cst_22 = arith.constant dense<0.000000e+00> : vector<1xf32>
    %56 = vector.multi_reduction <add>, %55, %cst_22 [1, 2] : vector<1x256x32xf32> to vector<1xf32>
    %57 = vector.shape_cast %56 : vector<1xf32> to vector<1x1x1xf32>
    %58 = vector.extract %57[0, 0, 0] : f32 from vector<1x1x1xf32>
    %59 = vector.broadcast %58 : f32 to vector<1x1x1xf32>
    %c0_23 = arith.constant 0 : index
    %c0_24 = arith.constant 0 : index
    %c0_25 = arith.constant 0 : index
    %60 = vector.load %arg8[%c0_23, %c0_24, %c0_25] : memref<1x1x1xf32, #tpu.memory_space<vmem>>, vector<1x1x1xf32>
    tpu.vector_store %arg8[%c0_23, %c0_24, %c0_25], %59 {strides = array<i32>} : memref<1x1x1xf32, #tpu.memory_space<vmem>>, vector<1x1x1xf32>,
    %61 = vector.broadcast %50 : vector<256x1xf32> to vector<256x64xf32>
    %62 = arith.mulf %37, %61 : vector<256x64xf32>
    %cst_26 = arith.constant dense<0.000000e+00> : vector<64xf32>
    %63 = vector.multi_reduction <add>, %62, %cst_26 [0] : vector<256x64xf32> to vector<64xf32>
    %64 = vector.shape_cast %63 : vector<64xf32> to vector<1x64xf32>
    %65 = vector.shape_cast %64 : vector<1x64xf32> to vector<1x1x64xf32>
    %c0_27 = arith.constant 0 : index
    %c0_28 = arith.constant 0 : index
    %c0_29 = arith.constant 0 : index
    %66 = vector.load %arg9[%c0_27, %c0_28, %c0_29] : memref<1x1x64xf32, #tpu.memory_space<vmem>>, vector<1x1x64xf32>
    tpu.vector_store %arg9[%c0_27, %c0_28, %c0_29], %65 {strides = array<i32>} : memref<1x1x64xf32, #tpu.memory_space<vmem>>, vector<1x1x64xf32>,
    return
  }
  func.func @transform_0(%arg0: i32) -> (i32, i32) {
    %c0_i32 = arith.constant 0 : i32
    %c0_i32_0 = arith.constant 0 : i32
    return %arg0, %c0_i32 : i32, i32
  }
  func.func @transform_1(%arg0: i32) -> (i32, i32) {
    %c0_i32 = arith.constant 0 : i32
    %c0_i32_0 = arith.constant 0 : i32
    %c0_i32_1 = arith.constant 0 : i32
    return %c0_i32, %c0_i32_0 : i32, i32
  }
  func.func @transform_2(%arg0: i32) -> (i32, i32) {
    %c0_i32 = arith.constant 0 : i32
    %c0_i32_0 = arith.constant 0 : i32
    %c0_i32_1 = arith.constant 0 : i32
    return %c0_i32, %c0_i32_0 : i32, i32
  }
  func.func @transform_3(%arg0: i32) -> (i32, i32) {
    %c0_i32 = arith.constant 0 : i32
    %c0_i32_0 = arith.constant 0 : i32
    %c0_i32_1 = arith.constant 0 : i32
    return %c0_i32, %c0_i32_0 : i32, i32
  }
  func.func @transform_4(%arg0: i32) -> (i32, i32) {
    %c0_i32 = arith.constant 0 : i32
    %c0_i32_0 = arith.constant 0 : i32
    return %arg0, %c0_i32 : i32, i32
  }
  func.func @transform_5(%arg0: i32) -> (i32, i32) {
    %c0_i32 = arith.constant 0 : i32
    %c0_i32_0 = arith.constant 0 : i32
    return %arg0, %c0_i32 : i32, i32
  }
  func.func @transform_6(%arg0: i32) -> (i32, i32) {
    %c0_i32 = arith.constant 0 : i32
    %c0_i32_0 = arith.constant 0 : i32
    return %arg0, %c0_i32 : i32, i32
  }
  func.func @transform_7(%arg0: i32) -> (i32, i32, i32) {
    %c0_i32 = arith.constant 0 : i32
    %c0_i32_0 = arith.constant 0 : i32
    %c0_i32_1 = arith.constant 0 : i32
    return %arg0, %c0_i32, %c0_i32_0 : i32, i32, i32
  }
  func.func @transform_8(%arg0: i32) -> (i32, i32, i32) {
    %c0_i32 = arith.constant 0 : i32
    %c0_i32_0 = arith.constant 0 : i32
    %c0_i32_1 = arith.constant 0 : i32
    return %arg0, %c0_i32, %c0_i32_0 : i32, i32, i32
  }
}

</mosaic_0001>

<bundles_post_ra>
// kernel: tpu_custom_call.1
= control target key start
LH: loop header
LB: loop body
LE: loop exit
PB: predicated region body
PF: predicated region fallthrough
CT: control target
= control target key end

     0   :  { %s6421_s0 = inlined_call_operand.vmem [shape: f32[512,32], index: 0, kind: input, shape index: {}]   ;;  %s6422_s1 = inlined_call_operand.vmem [shape: f32[32,64], index: 1, kind: input, shape index: {}]   ;;  %s6423_s2 = inlined_call_operand.vmem [shape: f32[64,32], index: 2, kind: input, shape index: {}]   ;;  %s6424_s3 = inlined_call_operand.vmem [shape: f32[1,64], index: 3, kind: input, shape index: {}]   ;;  %s6425_s4 = inlined_call_operand.vmem [shape: f32[512,32], index: 4, kind: output, shape index: {0}]   ;;  %s6426_s5 = inlined_call_operand.vmem [shape: s32[512,1], index: 5, kind: output, shape index: {1}]   ;;  %s6427_s6 = inlined_call_operand.vmem [shape: s32[512,1], index: 6, kind: output, shape index: {2}]   ;;  %s6428_s7 = inlined_call_operand.vmem [shape: f32[2,1,1], index: 7, kind: output, shape index: {3}]   ;;  %s6429_s8 = inlined_call_operand.hbm [shape: f32[2,1,64], index: 8, kind: output, shape index: {4}]  }
   0x1   :  { %6545 = sst [smem:[#allocation52_spill]] %s6421_s0 }
   0x2   :  { %14 = vsyncpa [#allocation3], 0 }
   0x3   :  { %16 = vsyncpa [#allocation3 + $0x1], 0  ;;  %s3951_s27 = smov 0   ;;  %s3953_s28 = smov 0  }
   0x4   :  { %s3955_s29 = smov 0   ;;  %s3957_s30 = smov 0  }
   0x5 LB: > { %s3972_s9 = sadd.s32 4294967295, %s3902_s30   ;;  %s3411_s10 = sadd.s32 4294967294, %s3902_s30   ;;  %s3902_s30 = sphi %s3957_s30, %s6776_s30   ;;  %s3898_s29 = sphi %s3955_s29, %s6775_s29   ;;  %s3894_s28 = sphi %s3953_s28, %s6774_s28   ;;  %s3890_s27 = sphi %s3951_s27, %s6773_s27  }
   0x6   : > { %s3976_s11 = sadd.s32 1, %s3902_s30   ;;  %s222_s12 = sadd.s32 1, %s3898_s29 }
   0x7   : > { %s219_s13 = ssub.s32 %s3902_s30, %s3976_s11  ;;  %p232_p0 = scmp.ne.s32.totalorder %s3898_s29, %s3894_s28 }
   0x8   : > { %p220_p1 = scmp.eq.s32.totalorder %s219_s13, 0  ;;  %p233_p2 = scmp.eq.s32.totalorder %s3972_s9, 1 }
   0x9   : > { %p238_p3 = scmp.ne.s32.totalorder %s3894_s28, %s3890_s27  ;;  %p239_p4 = scmp.eq.s32.totalorder %s3411_s10, 1 }
   0xa   : > { %s3987_s14 = scalar_select %p220_p1, %s3898_s29, %s222_s12  }
   0xb   : > { %p3989_p5 = por %p233_p2, %p232_p0  ;;  %p3993_p6 = por %p239_p4, %p238_p3 }
   0xc   : > { %p3414_p7 = scmp.ge.s32.totalorder %s3902_s30, 1  ;;  %p275_p8 = scmp.lt.s32.totalorder %s3902_s30, 3 }
   0xe   : > { %p276_p9 = pnand %p3414_p7, %p275_p8 }
  0x10   : > { %279 = sbr.rel (%p276_p9) target bundleno = 1151 (0x47f), region = 36 }
  0x15   : > { %v388_v0 = vld [vmem:[%s6422_s1 + $0x18] sm:$0xff]  ;;  %v387_v1 = vld [vmem:[%s6422_s1 + $0x10] sm:$0xff]  ;;  %s3415_s21 = sshll.u32 %s3972_s9, 5  ;;  %v386_v2 = vld [vmem:[%s6422_s1 + $0x8] sm:$0xff]  ;;  %vm389_vm0 = vcmask 261120   ;;  %s6548_s0 = sld [smem:[#allocation52_spill]] }
  0x16   : > { %3632 = vmatprep.subr.mxu0 %v388_v0  ;;  %p327_p10 = scmp.lt.s32.totalorder %s3415_s21, 63  ;;  %v385_v3 = vld [vmem:[%s6422_s1] sm:$0xff]  ;;  %vm944_vm1 = vcmask 523264   ;;  %s3520_s24 = sshll.u32 %s3972_s9, 8 }
  0x17   : > { %3633 = vmatpush3.msra.mxu0 %v388_v0  ;;  %s324_s17 = sand.u32 1, %s3894_s28   ;;  %s3905_s19 = smov [#allocation2]  }
  0x18   : > { %3634 = vmatprep.subr.mxu0 %v387_v1  ;;  %s6778_s21 = smov (!%p327_p10, %s3415_s21), 63  ;;  %s5661_s18 = scalar_lea.vmem [#allocation2], %s324_s17 }
  0x19   : > { %3635 = vmatpush3.msra.mxu0 %v387_v1  ;;  %s4012_s26 = sshll.u32 %s6778_s21, 3  ;;  %s3262_s25 = sshll.u32 %s5661_s18, 4  ;;  %s3263_s25 = int_to_ptr.vmem [resolvable:$true] %s3262_s25 }
  0x1a   : > { %3636 = vmatprep.subr.mxu0 %v386_v2  ;;  %s4852_s12 = scalar_lea.vmem %s6426_s5, %s4012_s26  ;;  %s5895_s21 = scalar_lea.vmem %s6425_s4, %s4012_s26 }
  0x1b   : > { %3637 = vmatpush3.msra.mxu0 %v386_v2  ;;  %s4018_s13 = scalar_lea.vmem %s6548_s0, %s4012_s26  ;;  %s3235_s10 = scalar_lea.sflag [#allocation3], %s324_s17 }
  0x1c   : > { %3638 = vmatprep.subr.mxu0 %v385_v3  ;;  %v353_v4 = vld [vmem:[%s4018_s13] sm:$0xff]  ;;  %v354_v5 = vld [vmem:[%s4018_s13 + $0x8] sm:$0xff]  ;;  %v355_v6 = vld [vmem:[%s4018_s13 + $0x10] sm:$0xff]  ;;  %s3846_s20 = sshll.u32 %s3905_s19, 4  ;;  %s3847_s20 = int_to_ptr.vmem [resolvable:$false] %s3846_s20 }
  0x1d   : > { %3639 = vmatpush3.msra.mxu0 %v385_v3  ;;  %3640 = vmatprep.mubr.msk.f32.mxu0 %vm389_vm0, %v353_v4  ;;  %v356_v7 = vld [vmem:[%s4018_s13 + $0x18] sm:$0xff]  ;;  %v711_v8 = vmul.f32 %v353_v4, %v353_v4  ;;  %v713_v9 = vmul.f32 %v355_v6, %v355_v6  ;;  %v712_v10 = vmul.f32 %v354_v5, %v354_v5  ;;  %v357_v14 = vld [vmem:[%s4018_s13 + $0x20] sm:$0xff]  ;;  %v358_v15 = vld [vmem:[%s4018_s13 + $0x28] sm:$0xff]  ;;  %p3849_p0 = scmp.lt.s32.totalorder %s3263_s25, %s3847_s20 }
  0x1e   : > { %3641 = vmatmul.mubr.msk.f32.vlgmr.msra.gmra.mxu0 %vm389_vm0, %v354_v5  ;;  %v714_v11 = vmul.f32 %v356_v7, %v356_v7  ;;  %v716_v18 = vmul.f32 %v358_v15, %v358_v15  ;;  %v715_v19 = vmul.f32 %v357_v14, %v357_v14  ;;  %v359_v20 = vld [vmem:[%s4018_s13 + $0x30] sm:$0xff]  ;;  %v360_v21 = vld [vmem:[%s4018_s13 + $0x38] sm:$0xff]  ;;  %v361_v26 = vld [vmem:[%s4018_s13 + $0x40] sm:$0xff] }
  0x1f   : > { %3643 = vmatprep.mubr.msk.f32.mxu0 %vm389_vm0, %v355_v6  ;;  %v743_v12 = vsel %vm389_vm0, %v711_v8, 0.0  ;;  %v749_v13 = vsel %vm389_vm0, %v713_v9, 0.0  ;;  %v746_v16 = vsel %vm389_vm0, %v712_v10, 0.0  ;;  %v718_v24 = vmul.f32 %v360_v21, %v360_v21  ;;  %v362_v27 = vld [vmem:[%s4018_s13 + $0x48] sm:$0xff]  ;;  %v363_v32 = vld [vmem:[%s4018_s13 + $0x50] sm:$0xff]  ;;  %v364_v33 = vld [vmem:[%s4018_s13 + $0x58] sm:$0xff] }
  0x20   : > { %744 = vadd.xlane.f32.xlu0 %v743_v12  ;;  %750 = vadd.xlane.f32.xlu1 %v749_v13  ;;  %v752_v17 = vsel %vm389_vm0, %v714_v11, 0.0  ;;  %v758_v22 = vsel %vm389_vm0, %v716_v18, 0.0  ;;  %v755_v23 = vsel %vm389_vm0, %v715_v19, 0.0  ;;  %v717_v25 = vmul.f32 %v359_v20, %v359_v20  ;;  %v365_v38 = vld [vmem:[%s4018_s13 + $0x60] sm:$0xff]  ;;  %v366_v39 = vld [vmem:[%s4018_s13 + $0x68] sm:$0xff]  ;;  %v367_v44 = vld [vmem:[%s4018_s13 + $0x70] sm:$0xff] }
  0x21   : > { %v764_v28 = vsel %vm389_vm0, %v718_v24, 0.0  ;;  %v720_v30 = vmul.f32 %v362_v27, %v362_v27  ;;  %v719_v31 = vmul.f32 %v361_v26, %v361_v26  ;;  %v722_v36 = vmul.f32 %v364_v33, %v364_v33  ;;  %v368_v45 = vld [vmem:[%s4018_s13 + $0x78] sm:$0xff]  ;;  %v369_v50 = vld [vmem:[%s4018_s13 + $0x80] sm:$0xff]  ;;  %v370_v51 = vld [vmem:[%s4018_s13 + $0x88] sm:$0xff] }
  0x22   : > { %3644 = vmatmul.mubr.msk.f32.gmra.mxu0 %vm389_vm0, %v356_v7  ;;  %v761_v29 = vsel %vm389_vm0, %v717_v25, 0.0  ;;  %v721_v37 = vmul.f32 %v363_v32, %v363_v32  ;;  %v724_v42 = vmul.f32 %v366_v39, %v366_v39  ;;  %v723_v43 = vmul.f32 %v365_v38, %v365_v38  ;;  %v371_v56 = vld [vmem:[%s4018_s13 + $0x90] sm:$0xff]  ;;  %v372_v57 = vld [vmem:[%s4018_s13 + $0x98] sm:$0xff]  ;;  %v373_v62 = vld [vmem:[%s4018_s13 + $0xa0] sm:$0xff] }
  0x23   : > { %3646 = vmatprep.mubr.msk.f32.mxu0 %vm389_vm0, %v357_v14  ;;  %v770_v34 = vsel %vm389_vm0, %v720_v30, 0.0  ;;  %v767_v35 = vsel %vm389_vm0, %v719_v31, 0.0  ;;  %v776_v40 = vsel %vm389_vm0, %v722_v36, 0.0  ;;  %v726_v48 = vmul.f32 %v368_v45, %v368_v45  ;;  %v374_v63 = vld [vmem:[%s4018_s13 + $0xa8] sm:$0xff]  ;;  %v375_v4 = vld [vmem:[%s4018_s13 + $0xb0] sm:$0xff]  ;;  %v376_v5 = vld [vmem:[%s4018_s13 + $0xb8] sm:$0xff] }
  0x24   : > { %747 = vadd.xlane.f32.xlu0 %v746_v16  ;;  %753 = vadd.xlane.f32.xlu1 %v752_v17  ;;  %v773_v41 = vsel %vm389_vm0, %v721_v37, 0.0  ;;  %v782_v46 = vsel %vm389_vm0, %v724_v42, 0.0  ;;  %v779_v47 = vsel %vm389_vm0, %v723_v43, 0.0  ;;  %v725_v49 = vmul.f32 %v367_v44, %v367_v44  ;;  %v377_v10 = vld [vmem:[%s4018_s13 + $0xc0] sm:$0xff]  ;;  %v378_v11 = vld [vmem:[%s4018_s13 + $0xc8] sm:$0xff]  ;;  %v379_v16 = vld [vmem:[%s4018_s13 + $0xd0] sm:$0xff] }
  0x25   : > { %v788_v52 = vsel %vm389_vm0, %v726_v48, 0.0  ;;  %v728_v54 = vmul.f32 %v370_v51, %v370_v51  ;;  %v727_v55 = vmul.f32 %v369_v50, %v369_v50  ;;  %v730_v60 = vmul.f32 %v372_v57, %v372_v57  ;;  %v380_v17 = vld [vmem:[%s4018_s13 + $0xd8] sm:$0xff] }
  0x26   : > { %3647 = vmatmul.mubr.msk.f32.gmra.mxu0 %vm389_vm0, %v358_v15  ;;  %v785_v53 = vsel %vm389_vm0, %v725_v49, 0.0  ;;  %v729_v61 = vmul.f32 %v371_v56, %v371_v56  ;;  %v732_v2 = vmul.f32 %v374_v63, %v374_v63  ;;  %v731_v3 = vmul.f32 %v373_v62, %v373_v62 }
  0x27   : > { %3649 = vmatprep.mubr.msk.f32.mxu0 %vm389_vm0, %v359_v20  ;;  %v794_v58 = vsel %vm389_vm0, %v728_v54, 0.0  ;;  %v791_v59 = vsel %vm389_vm0, %v727_v55, 0.0  ;;  %v800_v0 = vsel %vm389_vm0, %v730_v60, 0.0  ;;  %v734_v8 = vmul.f32 %v376_v5, %v376_v5 }
  0x28   : > { %759 = vadd.xlane.f32.xlu1 %v758_v22  ;;  %756 = vadd.xlane.f32.xlu0 %v755_v23  ;;  %v797_v1 = vsel %vm389_vm0, %v729_v61, 0.0  ;;  %v806_v6 = vsel %vm389_vm0, %v732_v2, 0.0  ;;  %v803_v7 = vsel %vm389_vm0, %v731_v3, 0.0  ;;  %v733_v9 = vmul.f32 %v375_v4, %v375_v4  ;;  %v381_v22 = vld [vmem:[%s4018_s13 + $0xe0] sm:$0xff]  ;;  %v382_v23 = vld [vmem:[%s4018_s13 + $0xe8] sm:$0xff] }
  0x29   : > { %v812_v12 = vsel %vm389_vm0, %v734_v8, 0.0  ;;  %v736_v14 = vmul.f32 %v378_v11, %v378_v11  ;;  %v735_v15 = vmul.f32 %v377_v10, %v377_v10  ;;  %v738_v20 = vmul.f32 %v380_v17, %v380_v17 }
  0x2a   : > { %3650 = vmatmul.mubr.msk.f32.gmra.mxu0 %vm389_vm0, %v360_v21  ;;  %v809_v13 = vsel %vm389_vm0, %v733_v9, 0.0  ;;  %v737_v21 = vmul.f32 %v379_v16, %v379_v16 }
  0x2b   : > { %3652 = vmatprep.mubr.msk.f32.mxu0 %vm389_vm0, %v361_v26  ;;  %v818_v18 = vsel %vm389_vm0, %v736_v14, 0.0  ;;  %v815_v19 = vsel %vm389_vm0, %v735_v15, 0.0  ;;  %v824_v24 = vsel %vm389_vm0, %v738_v20, 0.0  ;;  %v740_v26 = vmul.f32 %v382_v23, %v382_v23 }
  0x2c   : > { %765 = vadd.xlane.f32.xlu1 %v764_v28  ;;  %762 = vadd.xlane.f32.xlu0 %v761_v29  ;;  %v821_v25 = vsel %vm389_vm0, %v737_v21, 0.0  ;;  %v383_v28 = vld [vmem:[%s4018_s13 + $0xf0] sm:$0xff]  ;;  %v384_v29 = vld [vmem:[%s4018_s13 + $0xf8] sm:$0xff] }
  0x2d   : > { %v830_v30 = vsel %vm389_vm0, %v740_v26, 0.0 }
  0x2e   : > { %3653 = vmatmul.mubr.msk.f32.gmra.mxu0 %vm389_vm0, %v362_v27  ;;  %v739_v27 = vmul.f32 %v381_v22, %v381_v22 }
  0x2f   : > { %3655 = vmatprep.mubr.msk.f32.mxu0 %vm389_vm0, %v363_v32  ;;  %v742_v32 = vmul.f32 %v384_v29, %v384_v29 }
  0x30   : > { %771 = vadd.xlane.f32.xlu1 %v770_v34  ;;  %768 = vadd.xlane.f32.xlu0 %v767_v35  ;;  %v827_v31 = vsel %vm389_vm0, %v739_v27, 0.0 }
  0x31   : > { %v836_v34 = vsel %vm389_vm0, %v742_v32, 0.0 }
  0x32   : > { %3656 = vmatmul.mubr.msk.f32.gmra.mxu0 %vm389_vm0, %v364_v33  ;;  %v741_v33 = vmul.f32 %v383_v28, %v383_v28 }
  0x33   : > { %3658 = vmatprep.mubr.msk.f32.mxu0 %vm389_vm0, %v365_v38 }
  0x34   : > { %777 = vadd.xlane.f32.xlu1 %v776_v40  ;;  %774 = vadd.xlane.f32.xlu0 %v773_v41  ;;  %v833_v35 = vsel %vm389_vm0, %v741_v33, 0.0 }
  0x36   : > { %3659 = vmatmul.mubr.msk.f32.gmra.mxu0 %vm389_vm0, %v366_v39 }
  0x37   : > { %3661 = vmatprep.mubr.msk.f32.mxu0 %vm389_vm0, %v367_v44 }
  0x38   : > { %783 = vadd.xlane.f32.xlu1 %v782_v46  ;;  %780 = vadd.xlane.f32.xlu0 %v779_v47  ;;  %v4121_v47 = vld [vmem:[%s6424_s3] ss:$0 sm:$0xff] }
  0x3a   : > { %3662 = vmatmul.mubr.msk.f32.gmra.mxu0 %vm389_vm0, %v368_v45 }
  0x3b   : > { %3664 = vmatprep.mubr.msk.f32.mxu0 %vm389_vm0, %v369_v50 }
  0x3c   : > { %789 = vadd.xlane.f32.xlu1 %v788_v52  ;;  %786 = vadd.xlane.f32.xlu0 %v785_v53 }
  0x3e   : > { %3665 = vmatmul.mubr.msk.f32.gmra.mxu0 %vm389_vm0, %v370_v51 }
  0x3f   : > { %3667 = vmatprep.mubr.msk.f32.mxu0 %vm389_vm0, %v371_v56 }
  0x40   : > { %795 = vadd.xlane.f32.xlu1 %v794_v58  ;;  %792 = vadd.xlane.f32.xlu0 %v791_v59 }
  0x42   : > { %3668 = vmatmul.mubr.msk.f32.gmra.mxu0 %vm389_vm0, %v372_v57 }
  0x43   : > { %3670 = vmatprep.mubr.msk.f32.mxu0 %vm389_vm0, %v373_v62 }
  0x44   : > { %801 = vadd.xlane.f32.xlu1 %v800_v0  ;;  %798 = vadd.xlane.f32.xlu0 %v797_v1 }
  0x46   : > { %3671 = vmatmul.mubr.msk.f32.gmra.mxu0 %vm389_vm0, %v374_v63 }
  0x47   : > { %3673 = vmatprep.mubr.msk.f32.mxu0 %vm389_vm0, %v375_v4 }
  0x48   : > { %807 = vadd.xlane.f32.xlu1 %v806_v6  ;;  %804 = vadd.xlane.f32.xlu0 %v803_v7 }
  0x4a   : > { %3674 = vmatmul.mubr.msk.f32.gmra.mxu0 %vm389_vm0, %v376_v5 }
  0x4b   : > { %3676 = vmatprep.mubr.msk.f32.mxu0 %vm389_vm0, %v377_v10 }
  0x4c   : > { %813 = vadd.xlane.f32.xlu1 %v812_v12  ;;  %810 = vadd.xlane.f32.xlu0 %v809_v13 }
  0x4e   : > { %3677 = vmatmul.mubr.msk.f32.gmra.mxu0 %vm389_vm0, %v378_v11 }
  0x4f   : > { %3679 = vmatprep.mubr.msk.f32.mxu0 %vm389_vm0, %v379_v16 }
  0x50   : > { %819 = vadd.xlane.f32.xlu1 %v818_v18  ;;  %816 = vadd.xlane.f32.xlu0 %v815_v19 }
  0x52   : > { %3680 = vmatmul.mubr.msk.f32.gmra.mxu0 %vm389_vm0, %v380_v17 }
  0x53   : > { %3682 = vmatprep.mubr.msk.f32.mxu0 %vm389_vm0, %v381_v22 }
  0x54   : > { %825 = vadd.xlane.f32.xlu1 %v824_v24  ;;  %822 = vadd.xlane.f32.xlu0 %v821_v25 }
  0x56   : > { %3683 = vmatmul.mubr.msk.f32.gmra.mxu0 %vm389_vm0, %v382_v23 }
  0x57   : > { %3685 = vmatprep.mubr.msk.f32.mxu0 %vm389_vm0, %v383_v28 }
  0x58   : > { %831 = vadd.xlane.f32.xlu1 %v830_v30  ;;  %828 = vadd.xlane.f32.xlu0 %v827_v31 }
  0x5a   : > { %3686 = vmatmul.mubr.msk.f32.gmra.mxu0 %vm389_vm0, %v384_v29 }
  0x5c   : > { %837 = vadd.xlane.f32.xlu1 %v836_v34  ;;  %834 = vadd.xlane.f32.xlu0 %v833_v35 }
  0xa9   : > { %v751_v36 = vpop.xlane.xlu1 %750  ;;  %v745_v37 = vpop.xlane.xlu0 %744 }
  0xaa   : > { %v846_v54 = vadd.f32 %v4121_v47, %v745_v37  ;;  %v848_v63 = vadd.f32 %v4121_v47, %v751_v36 }
  0xad   : > { %v754_v38 = vpop.xlane.xlu1 %753  ;;  %v748_v39 = vpop.xlane.xlu0 %747 }
  0xae   : > { %v847_v49 = vadd.f32 %v4121_v47, %v748_v39  ;;  %v849_v57 = vadd.f32 %v4121_v47, %v754_v38 }
  0xb1   : > { %v760_v40 = vpop.xlane.xlu1 %759  ;;  %v757_v41 = vpop.xlane.xlu0 %756 }
  0xb2   : > { %v851_v3 = vadd.f32 %v4121_v47, %v760_v40  ;;  %v850_v9 = vadd.f32 %v4121_v47, %v757_v41 }
  0xb5   : > { %v766_v42 = vpop.xlane.xlu1 %765  ;;  %v763_v43 = vpop.xlane.xlu0 %762 }
  0xb6   : > { %v853_v15 = vadd.f32 %v4121_v47, %v766_v42  ;;  %v852_v20 = vadd.f32 %v4121_v47, %v763_v43 }
  0xb9   : > { %v772_v44 = vpop.xlane.xlu1 %771  ;;  %v769_v45 = vpop.xlane.xlu0 %768 }
  0xba   : > { %v855_v26 = vadd.f32 %v4121_v47, %v772_v44  ;;  %v854_v32 = vadd.f32 %v4121_v47, %v769_v45 }
  0xbd   : > { %v4116_v46 = vpop.xlane.xlu1 %777  ;;  %v4123_v48 = vpop.xlane.xlu0 %774 }
  0xbe   : > { %v857_v37 = vadd.f32 %v4121_v47, %v4116_v46  ;;  %v856_v43 = vadd.f32 %v4121_v47, %v4123_v48 }
  0xc1   : > { %v4126_v53 = vpop.xlane.xlu1 %783  ;;  %v4132_v59 = vpop.xlane.xlu0 %780 }
  0xc5   : > { %v4144_v6 = vpop.xlane.xlu1 %789  ;;  %v4151_v12 = vpop.xlane.xlu0 %786 }
  0xc9   : > { %v796_v23 = vpop.xlane.xlu1 %795  ;;  %v793_v29 = vpop.xlane.xlu0 %792 }
  0xcd   : > { %v802_v40 = vpop.xlane.xlu1 %801 }
  0xde   : > { %v3642_v50 = vpop.f32.mrf.mxu0 }
  0xdf   : > { %v879_v51 = vmul.f32 2.0, %v3642_v50 }
  0xe0   : > { %v552_v52 = vpop.f32.mrf.mxu0 }
  0xe1   : > { %v4129_v55 = vsub.f32 %v847_v49, %v879_v51  ;;  %v878_v56 = vmul.f32 2.0, %v552_v52  ;;  %v799_v49 = vpop.xlane.xlu0 %798  ;;  %v859_v51 = vadd.f32 %v4121_v47, %v4126_v53 }
  0xe2   : > { %v3645_v58 = vpop.f32.mrf.mxu0 }
  0xe3   : > { %6549 = vst [vmem:[#allocation5_spill] sm:$0xff] %v4129_v55  ;;  %v4134_v60 = vsub.f32 %v846_v54, %v878_v56  ;;  %v881_v61 = vmul.f32 2.0, %v3645_v58  ;;  %v948_v62 = vsel %vm944_vm1, %v4129_v55, inf }
  0xe4   : > { %949 = vmin.xlane.f32.xlu1 %v948_v62  ;;  %v562_v0 = vpop.f32.mrf.mxu0  ;;  %v808_v62 = vpop.xlane.xlu1 %807 }
  0xe5   : > { %6550 = vst [vmem:[#allocation6_spill] sm:$0xff] %v4134_v60  ;;  %v4139_v1 = vsub.f32 %v849_v57, %v881_v61  ;;  %v880_v2 = vmul.f32 2.0, %v562_v0  ;;  %v945_v4 = vsel %vm944_vm1, %v4134_v60, inf  ;;  %v858_v57 = vadd.f32 %v4121_v47, %v4132_v59 }
  0xe6   : > { %946 = vmin.xlane.f32.xlu0 %v945_v4  ;;  %v3648_v5 = vpop.f32.mrf.mxu0  ;;  %v861_v0 = vadd.f32 %v4121_v47, %v4144_v6  ;;  %v805_v4 = vpop.xlane.xlu0 %804 }
  0xe7   : > { %6551 = vst [vmem:[#allocation7_spill] sm:$0xff] %v4139_v1  ;;  %v4146_v7 = vsub.f32 %v848_v63, %v880_v2  ;;  %v883_v8 = vmul.f32 2.0, %v3648_v5  ;;  %v954_v10 = vsel %vm944_vm1, %v4139_v1, inf }
  0xe8   : > { %955 = vmin.xlane.f32.xlu1 %v954_v10  ;;  %v572_v11 = vpop.f32.mrf.mxu0 }
  0xe9   : > { %6552 = vst [vmem:[#allocation8_spill] sm:$0xff] %v4146_v7  ;;  %v4153_v13 = vsub.f32 %v851_v3, %v883_v8  ;;  %v882_v14 = vmul.f32 2.0, %v572_v11  ;;  %v951_v16 = vsel %vm944_vm1, %v4146_v7, inf  ;;  %v860_v8 = vadd.f32 %v4121_v47, %v4151_v12 }
  0xea   : > { %952 = vmin.xlane.f32.xlu0 %v951_v16  ;;  %v3651_v17 = vpop.f32.mrf.mxu0  ;;  %v862_v12 = vadd.f32 %v4121_v47, %v793_v29  ;;  %v864_v29 = vadd.f32 %v4121_v47, %v799_v49 }
  0xeb   : > { %6553 = vst [vmem:[#allocation9_spill] sm:$0xff] %v4153_v13  ;;  %v4158_v18 = vsub.f32 %v850_v9, %v882_v14  ;;  %v885_v19 = vmul.f32 2.0, %v3651_v17  ;;  %v960_v21 = vsel %vm944_vm1, %v4153_v13, inf  ;;  %v863_v14 = vadd.f32 %v4121_v47, %v796_v23  ;;  %v814_v17 = vpop.xlane.xlu1 %813 }
  0xec   : > { %961 = vmin.xlane.f32.xlu1 %v960_v21  ;;  %v582_v22 = vpop.f32.mrf.mxu0 }
  0xed   : > { %6554 = vst [vmem:[#allocation10_spill] sm:$0xff] %v4158_v18  ;;  %v4163_v24 = vsub.f32 %v853_v15, %v885_v19  ;;  %v884_v25 = vmul.f32 2.0, %v582_v22  ;;  %v957_v27 = vsel %vm944_vm1, %v4158_v18, inf }
  0xee   : > { %958 = vmin.xlane.f32.xlu0 %v957_v27  ;;  %v3654_v28 = vpop.f32.mrf.mxu0  ;;  %v865_v27 = vadd.f32 %v4121_v47, %v802_v40  ;;  %v867_v40 = vadd.f32 %v4121_v47, %v808_v62 }
  0xef   : > { %6555 = vst [vmem:[#allocation11_spill] sm:$0xff] %v4163_v24  ;;  %v4168_v30 = vsub.f32 %v852_v20, %v884_v25  ;;  %v887_v31 = vmul.f32 2.0, %v3654_v28  ;;  %v966_v33 = vsel %vm944_vm1, %v4163_v24, inf  ;;  %v811_v25 = vpop.xlane.xlu0 %810 }
  0xf0   : > { %967 = vmin.xlane.f32.xlu1 %v966_v33  ;;  %v592_v34 = vpop.f32.mrf.mxu0 }
  0xf1   : > { %6556 = vst [vmem:[#allocation12_spill] sm:$0xff] %v4168_v30  ;;  %v4173_v35 = vsub.f32 %v855_v26, %v887_v31  ;;  %v886_v36 = vmul.f32 2.0, %v592_v34  ;;  %v963_v38 = vsel %vm944_vm1, %v4168_v30, inf }
  0xf2   : > { %964 = vmin.xlane.f32.xlu0 %v963_v38  ;;  %v3657_v39 = vpop.f32.mrf.mxu0 }
  0xf3   : > { %6557 = vst [vmem:[#allocation13_spill] sm:$0xff] %v4173_v35  ;;  %v4179_v41 = vsub.f32 %v854_v32, %v886_v36  ;;  %v889_v42 = vmul.f32 2.0, %v3657_v39  ;;  %v972_v44 = vsel %vm944_vm1, %v4173_v35, inf }
  0xf4   : > { %973 = vmin.xlane.f32.xlu1 %v972_v44  ;;  %v602_v45 = vpop.f32.mrf.mxu0  ;;  %v817_v44 = vpop.xlane.xlu0 %816 }
  0xf5   : > { %6558 = vst [vmem:[#allocation14_spill] sm:$0xff] %v4179_v41  ;;  %v4185_v50 = vsub.f32 %v857_v37, %v889_v42  ;;  %v888_v46 = vmul.f32 2.0, %v602_v45  ;;  %v969_v52 = vsel %vm944_vm1, %v4179_v41, inf  ;;  %v820_v37 = vpop.xlane.xlu1 %819 }
  0xf6   : > { %970 = vmin.xlane.f32.xlu0 %v969_v52  ;;  %v3660_v54 = vpop.f32.mrf.mxu0 }
  0xf7   : > { %6559 = vst [vmem:[#allocation15_spill] sm:$0xff] %v4185_v50  ;;  %v4191_v56 = vsub.f32 %v856_v43, %v888_v46  ;;  %v891_v48 = vmul.f32 2.0, %v3660_v54  ;;  %v978_v58 = vsel %vm944_vm1, %v4185_v50, inf  ;;  %v866_v46 = vadd.f32 %v4121_v47, %v805_v4 }
  0xf8   : > { %979 = vmin.xlane.f32.xlu1 %v978_v58  ;;  %v612_v61 = vpop.f32.mrf.mxu0 }
  0xf9   : > { %6560 = vst [vmem:[#allocation16_spill] sm:$0xff] %v4191_v56  ;;  %v4197_v63 = vsub.f32 %v859_v51, %v891_v48  ;;  %v890_v53 = vmul.f32 2.0, %v612_v61  ;;  %v975_v2 = vsel %vm944_vm1, %v4191_v56, inf  ;;  %v826_v62 = vpop.xlane.xlu1 %825 }
  0xfa   : > { %976 = vmin.xlane.f32.xlu0 %v975_v2  ;;  %v3663_v3 = vpop.f32.mrf.mxu0  ;;  %v868_v2 = vadd.f32 %v4121_v47, %v811_v25 }
  0xfb   : > { %6561 = vst [vmem:[#allocation17_spill] sm:$0xff] %v4197_v63  ;;  %v4203_v5 = vsub.f32 %v858_v57, %v890_v53  ;;  %v893_v59 = vmul.f32 2.0, %v3663_v3  ;;  %v984_v9 = vsel %vm944_vm1, %v4197_v63, inf  ;;  %v869_v57 = vadd.f32 %v4121_v47, %v814_v17 }
  0xfc   : > { %985 = vmin.xlane.f32.xlu1 %v984_v9  ;;  %v622_v10 = vpop.f32.mrf.mxu0  ;;  %v870_v17 = vadd.f32 %v4121_v47, %v817_v44 }
  0xfd   : > { %6562 = vst [vmem:[#allocation18_spill] sm:$0xff] %v4203_v5  ;;  %v4209_v11 = vsub.f32 %v861_v0, %v893_v59  ;;  %v892_v6 = vmul.f32 2.0, %v622_v10  ;;  %v981_v15 = vsel %vm944_vm1, %v4203_v5, inf  ;;  %v823_v59 = vpop.xlane.xlu0 %822  ;;  %v871_v10 = vadd.f32 %v4121_v47, %v820_v37 }
  0xfe   : > { %982 = vmin.xlane.f32.xlu0 %v981_v15  ;;  %v3666_v16 = vpop.f32.mrf.mxu0 }
  0xff   : > { %6563 = vst [vmem:[#allocation19_spill] sm:$0xff] %v4209_v11  ;;  %v4214_v19 = vsub.f32 %v860_v8, %v892_v6  ;;  %v895_v20 = vmul.f32 2.0, %v3666_v16  ;;  %v990_v21 = vsel %vm944_vm1, %v4209_v11, inf }
 0x100   : > { %991 = vmin.xlane.f32.xlu1 %v990_v21  ;;  %v632_v22 = vpop.f32.mrf.mxu0  ;;  %v832_v21 = vpop.xlane.xlu1 %831 }
 0x101   : > { %6564 = vst [vmem:[#allocation20_spill] sm:$0xff] %v4214_v19  ;;  %v4219_v26 = vsub.f32 %v863_v14, %v895_v20  ;;  %v894_v23 = vmul.f32 2.0, %v632_v22  ;;  %v987_v28 = vsel %vm944_vm1, %v4214_v19, inf }
 0x102   : > { %988 = vmin.xlane.f32.xlu0 %v987_v28  ;;  %v3669_v31 = vpop.f32.mrf.mxu0 }
 0x103   : > { %6565 = vst [vmem:[#allocation21_spill] sm:$0xff] %v4219_v26  ;;  %v4224_v32 = vsub.f32 %v862_v12, %v894_v23  ;;  %v897_v33 = vmul.f32 2.0, %v3669_v31  ;;  %v996_v34 = vsel %vm944_vm1, %v4219_v26, inf  ;;  %v873_v23 = vadd.f32 %v4121_v47, %v826_v62  ;;  %v829_v31 = vpop.xlane.xlu0 %828 }
 0x104   : > { %997 = vmin.xlane.f32.xlu1 %v996_v34  ;;  %v642_v36 = vpop.f32.mrf.mxu0  ;;  %v872_v34 = vadd.f32 %v4121_v47, %v823_v59 }
 0x105   : > { %6566 = vst [vmem:[#allocation22_spill] sm:$0xff] %v4224_v32  ;;  %v4229_v38 = vsub.f32 %v865_v27, %v897_v33  ;;  %v896_v39 = vmul.f32 2.0, %v642_v36  ;;  %v993_v42 = vsel %vm944_vm1, %v4224_v32, inf }
 0x106   : > { %994 = vmin.xlane.f32.xlu0 %v993_v42  ;;  %v3672_v43 = vpop.f32.mrf.mxu0  ;;  %v875_v42 = vadd.f32 %v4121_v47, %v832_v21  ;;  %v6430_v21 = vlaneseq }
 0x107   : > { %6567 = vst [vmem:[#allocation23_spill] sm:$0xff] %v4229_v38  ;;  %v4234_v45 = vsub.f32 %v864_v29, %v896_v39  ;;  %v899_v49 = vmul.f32 2.0, %v3672_v43  ;;  %v1002_v51 = vsel %vm944_vm1, %v4229_v38, inf }
 0x108   : > { %1003 = vmin.xlane.f32.xlu1 %v1002_v51  ;;  %v652_v52 = vpop.f32.mrf.mxu0 }
 0x109   : > { %6568 = vst [vmem:[#allocation24_spill] sm:$0xff] %v4234_v45  ;;  %v4239_v54 = vsub.f32 %v867_v40, %v899_v49  ;;  %v898_v48 = vmul.f32 2.0, %v652_v52  ;;  %v999_v58 = vsel %vm944_vm1, %v4234_v45, inf  ;;  %v838_v49 = vpop.xlane.xlu1 %837  ;;  %v874_v52 = vadd.f32 %v4121_v47, %v829_v31 }
 0x10a   : > { %1000 = vmin.xlane.f32.xlu0 %v999_v58  ;;  %v3675_v61 = vpop.f32.mrf.mxu0  ;;  %v835_v58 = vpop.xlane.xlu0 %834 }
 0x10b   : > { %6569 = vst [vmem:[#allocation25_spill] sm:$0xff] %v4239_v54  ;;  %v4244_v53 = vsub.f32 %v866_v46, %v898_v48  ;;  %v901_v0 = vmul.f32 2.0, %v3675_v61  ;;  %v1008_v3 = vsel %vm944_vm1, %v4239_v54, inf }
 0x10c   : > { %1009 = vmin.xlane.f32.xlu1 %v1008_v3  ;;  %v662_v4 = vpop.f32.mrf.mxu0 }
 0x10d   : > { %6570 = vst [vmem:[#allocation26_spill] sm:$0xff] %v4244_v53  ;;  %v4249_v8 = vsub.f32 %v869_v57, %v901_v0  ;;  %v900_v9 = vmul.f32 2.0, %v662_v4  ;;  %v1005_v6 = vsel %vm944_vm1, %v4244_v53, inf  ;;  %v877_v0 = vadd.f32 %v4121_v47, %v838_v49 }
 0x10e   : > { %1006 = vmin.xlane.f32.xlu0 %v1005_v6  ;;  %v3678_v14 = vpop.f32.mrf.mxu0 }
 0x10f   : > { %6571 = vst [vmem:[#allocation27_spill] sm:$0xff] %v4249_v8  ;;  %v4254_v15 = vsub.f32 %v868_v2, %v900_v9  ;;  %v903_v16 = vmul.f32 2.0, %v3678_v14  ;;  %v1014_v20 = vsel %vm944_vm1, %v4249_v8, inf  ;;  %v876_v9 = vadd.f32 %v4121_v47, %v835_v58 }
 0x110   : > { %1015 = vmin.xlane.f32.xlu1 %v1014_v20  ;;  %v672_v12 = vpop.f32.mrf.mxu0 }
 0x111   : > { %6572 = vst [vmem:[#allocation28_spill] sm:$0xff] %v4254_v15  ;;  %v4259_v22 = vsub.f32 %v871_v10, %v903_v16  ;;  %v902_v25 = vmul.f32 2.0, %v672_v12  ;;  %v1011_v27 = vsel %vm944_vm1, %v4254_v15, inf }
 0x112   : > { %1012 = vmin.xlane.f32.xlu0 %v1011_v27  ;;  %v3681_v28 = vpop.f32.mrf.mxu0 }
 0x113   : > { %6573 = vst [vmem:[#allocation29_spill] sm:$0xff] %v4259_v22  ;;  %v4264_v33 = vsub.f32 %v870_v17, %v902_v25  ;;  %v905_v29 = vmul.f32 2.0, %v3681_v28  ;;  %v1020_v36 = vsel %vm944_vm1, %v4259_v22, inf  ;;  %v4300_v25 = vand.u32 127, %v6430_v21 }
 0x114   : > { %1021 = vmin.xlane.f32.xlu1 %v1020_v36  ;;  %v682_v37 = vpop.f32.mrf.mxu0 }
 0x115   : > { %6574 = vst [vmem:[#allocation30_spill] sm:$0xff] %v4264_v33  ;;  %v4269_v39 = vsub.f32 %v873_v23, %v905_v29  ;;  %v904_v40 = vmul.f32 2.0, %v682_v37  ;;  %v1017_v43 = vsel %vm944_vm1, %v4264_v33, inf  ;;  %6581 = vst [vmem:[#allocation37_spill] sm:$0xff] %v4300_v25 }
 0x116   : > { %1018 = vmin.xlane.f32.xlu0 %v1017_v43  ;;  %v3684_v44 = vpop.f32.mrf.mxu0 }
 0x117   : > { %6575 = vst [vmem:[#allocation31_spill] sm:$0xff] %v4269_v39  ;;  %v4274_v46 = vsub.f32 %v872_v34, %v904_v40  ;;  %v907_v51 = vmul.f32 2.0, %v3684_v44  ;;  %v1026_v48 = vsel %vm944_vm1, %v4269_v39, inf }
 0x118   : > { %1027 = vmin.xlane.f32.xlu1 %v1026_v48  ;;  %v692_v57 = vpop.f32.mrf.mxu0 }
 0x119   : > { %6576 = vst [vmem:[#allocation32_spill] sm:$0xff] %v4274_v46  ;;  %v4279_v61 = vsub.f32 %v875_v42, %v907_v51  ;;  %v906_v62 = vmul.f32 2.0, %v692_v57  ;;  %v1023_v2 = vsel %vm944_vm1, %v4274_v46, inf }
 0x11a   : > { %1024 = vmin.xlane.f32.xlu0 %v1023_v2  ;;  %v3687_v3 = vpop.f32.mrf.mxu0 }
 0x11b   : > { %6577 = vst [vmem:[#allocation33_spill] sm:$0xff] %v4279_v61  ;;  %v4284_v4 = vsub.f32 %v874_v52, %v906_v62  ;;  %v909_v59 = vmul.f32 2.0, %v3687_v3  ;;  %v1032_v10 = vsel %vm944_vm1, %v4279_v61, inf }
 0x11c   : > { %1033 = vmin.xlane.f32.xlu1 %v1032_v10  ;;  %v702_v6 = vpop.f32.mrf.mxu0 }
 0x11d   : > { %6578 = vst [vmem:[#allocation34_spill] sm:$0xff] %v4284_v4  ;;  %v4289_v14 = vsub.f32 %v877_v0, %v909_v59  ;;  %v908_v16 = vmul.f32 2.0, %v702_v6  ;;  %v1029_v17 = vsel %vm944_vm1, %v4284_v4, inf }
 0x11e   : > { %1030 = vmin.xlane.f32.xlu0 %v1029_v17 }
 0x11f   : > { %6579 = vst [vmem:[#allocation35_spill] sm:$0xff] %v4289_v14  ;;  %v4293_v20 = vsub.f32 %v876_v9, %v908_v16  ;;  %v1038_v12 = vsel %vm944_vm1, %v4289_v14, inf }
 0x120   : > { %1039 = vmin.xlane.f32.xlu1 %v1038_v12 }
 0x121   : > { %6580 = vst [vmem:[#allocation36_spill] sm:$0xff] %v4293_v20  ;;  %v1035_v47 = vsel %vm944_vm1, %v4293_v20, inf }
 0x122   : > { %1036 = vmin.xlane.f32.xlu0 %v1035_v47 }
 0x16d   : > { %v950_v23 = vpop.xlane.xlu1 %949 }
 0x16e   : > { %vm1042_vm2 = vcmp.eq.f32.partialorder %v4129_v55, %v950_v23 }
 0x16f   : > { %v1074_v27 = vsel %vm1042_vm2, %v4300_v25, 64  ;;  %v947_v28 = vpop.xlane.xlu0 %946 }
 0x170   : > { %vm1041_vm3 = vcmp.eq.f32.partialorder %v4134_v60, %v947_v28  ;;  %v4306_v31 = vsel %vm944_vm1, %v1074_v27, 2147483647 }
 0x171   : > { %v1073_v29 = vsel %vm1041_vm3, %v4300_v25, 64  ;;  %v956_v34 = vpop.xlane.xlu1 %955  ;;  %v1122_v36 = vshra.s32 %v4306_v31, 16 }
 0x172   : > { %vm1044_vm4 = vcmp.eq.f32.partialorder %v4139_v1, %v956_v34  ;;  %v4312_v37 = vsel %vm944_vm1, %v1073_v29, 2147483647 }
 0x173   : > { %v1076_v40 = vsel %vm1044_vm4, %v4300_v25, 64  ;;  %v953_v42 = vpop.xlane.xlu0 %952  ;;  %v4315_v43 = vcvt.s32.f32 %v1122_v36  ;;  %v1107_v44 = vshra.s32 %v4312_v37, 16 }
 0x174   : > { %vm1043_vm5 = vcmp.eq.f32.partialorder %v4146_v7, %v953_v42  ;;  %v4320_v49 = vsel %vm944_vm1, %v1076_v40, 2147483647 }
 0x175   : > { %v1075_v51 = vsel %vm1043_vm5, %v4300_v25, 64  ;;  %v962_v52 = vpop.xlane.xlu1 %961  ;;  %1125 = vmin.xlane.f32.xlu1 %v4315_v43  ;;  %v4324_v48 = vcvt.s32.f32 %v1107_v44  ;;  %v1152_v57 = vshra.s32 %v4320_v49, 16 }
 0x176   : > { %vm1046_vm6 = vcmp.eq.f32.partialorder %v4153_v13, %v962_v52  ;;  %v4329_v58 = vsel %vm944_vm1, %v1075_v51, 2147483647 }
 0x177   : > { %v1078_v62 = vsel %vm1046_vm6, %v4300_v25, 64  ;;  %v959_v0 = vpop.xlane.xlu0 %958  ;;  %1110 = vmin.xlane.f32.xlu0 %v4324_v48  ;;  %v4333_v2 = vcvt.s32.f32 %v1152_v57  ;;  %v1137_v3 = vshra.s32 %v4329_v58, 16 }
 0x178   : > { %vm1045_vm7 = vcmp.eq.f32.partialorder %v4158_v18, %v959_v0  ;;  %v4338_v59 = vsel %vm944_vm1, %v1078_v62, 2147483647 }
 0x179   : > { %v1077_v9 = vsel %vm1045_vm7, %v4300_v25, 64  ;;  %v968_v10 = vpop.xlane.xlu1 %967  ;;  %1155 = vmin.xlane.f32.xlu1 %v4333_v2  ;;  %v4342_v6 = vcvt.s32.f32 %v1137_v3  ;;  %v1182_v16 = vshra.s32 %v4338_v59, 16 }
 0x17a   : > { %vm1048_vm8 = vcmp.eq.f32.partialorder %v4163_v24, %v968_v10  ;;  %v4347_v17 = vsel %vm944_vm1, %v1077_v9, 2147483647 }
 0x17b   : > { %v1080_v12 = vsel %vm1048_vm8, %v4300_v25, 64  ;;  %v965_v47 = vpop.xlane.xlu0 %964  ;;  %1140 = vmin.xlane.f32.xlu0 %v4342_v6  ;;  %v4351_v23 = vcvt.s32.f32 %v1182_v16  ;;  %v1167_v27 = vshra.s32 %v4347_v17, 16 }
 0x17c   : > { %vm1047_vm9 = vcmp.eq.f32.partialorder %v4168_v30, %v965_v47  ;;  %v4356_v28 = vsel %vm944_vm1, %v1080_v12, 2147483647 }
 0x17d   : > { %v1079_v29 = vsel %vm1047_vm9, %v4300_v25, 64  ;;  %v974_v34 = vpop.xlane.xlu1 %973  ;;  %1185 = vmin.xlane.f32.xlu1 %v4351_v23  ;;  %v4360_v36 = vcvt.s32.f32 %v1167_v27  ;;  %v1212_v40 = vshra.s32 %v4356_v28, 16 }
 0x17e   : > { %vm1050_vm10 = vcmp.eq.f32.partialorder %v4173_v35, %v974_v34  ;;  %v4365_v42 = vsel %vm944_vm1, %v1079_v29, 2147483647 }
 0x17f   : > { %v1082_v44 = vsel %vm1050_vm10, %v4300_v25, 64  ;;  %v971_v51 = vpop.xlane.xlu0 %970  ;;  %1170 = vmin.xlane.f32.xlu0 %v4360_v36  ;;  %v4369_v52 = vcvt.s32.f32 %v1212_v40  ;;  %v1197_v57 = vshra.s32 %v4365_v42, 16 }
 0x180   : > { %vm1049_vm11 = vcmp.eq.f32.partialorder %v4179_v41, %v971_v51  ;;  %v4374_v62 = vsel %vm944_vm1, %v1082_v44, 2147483647 }
 0x181   : > { %v1081_v0 = vsel %vm1049_vm11, %v4300_v25, 64  ;;  %v980_v3 = vpop.xlane.xlu1 %979  ;;  %1215 = vmin.xlane.f32.xlu1 %v4369_v52  ;;  %v4378_v9 = vcvt.s32.f32 %v1197_v57  ;;  %v1242_v10 = vshra.s32 %v4374_v62, 16 }
 0x182   : > { %vm1052_vm12 = vcmp.eq.f32.partialorder %v4185_v50, %v980_v3  ;;  %v4383_v16 = vsel %vm944_vm1, %v1081_v0, 2147483647 }
 0x183   : > { %v1084_v12 = vsel %vm1052_vm12, %v4300_v25, 64  ;;  %v977_v47 = vpop.xlane.xlu0 %976  ;;  %1200 = vmin.xlane.f32.xlu0 %v4378_v9  ;;  %v4387_v27 = vcvt.s32.f32 %v1242_v10  ;;  %v1227_v29 = vshra.s32 %v4383_v16, 16 }
 0x184   : > { %vm1051_vm13 = vcmp.eq.f32.partialorder %v4191_v56, %v977_v47  ;;  %v4392_v34 = vsel %vm944_vm1, %v1084_v12, 2147483647 }
 0x185   : > { %v1083_v40 = vsel %vm1051_vm13, %v4300_v25, 64  ;;  %v986_v44 = vpop.xlane.xlu1 %985  ;;  %1245 = vmin.xlane.f32.xlu1 %v4387_v27  ;;  %v4396_v51 = vcvt.s32.f32 %v1227_v29  ;;  %v1272_v57 = vshra.s32 %v4392_v34, 16 }
 0x186   : > { %vm1054_vm14 = vcmp.eq.f32.partialorder %v4197_v63, %v986_v44  ;;  %v4401_v0 = vsel %vm944_vm1, %v1083_v40, 2147483647 }
 0x187   : > { %v1086_v3 = vsel %vm1054_vm14, %v4300_v25, 64  ;;  %v983_v10 = vpop.xlane.xlu0 %982  ;;  %1230 = vmin.xlane.f32.xlu0 %v4396_v51  ;;  %v4405_v12 = vcvt.s32.f32 %v1272_v57  ;;  %v1257_v47 = vshra.s32 %v4401_v0, 16 }
 0x188   : > { %vm1053_vm15 = vcmp.eq.f32.partialorder %v4203_v5, %v983_v10  ;;  %v4410_v29 = vsel %vm944_vm1, %v1086_v3, 2147483647 }
 0x189   : > { %v1085_v21 = vsel %vm1053_vm15, %v4300_v25, 64  ;;  %v992_v44 = vpop.xlane.xlu1 %991  ;;  %1275 = vmin.xlane.f32.xlu1 %v4405_v12  ;;  %v4414_v40 = vcvt.s32.f32 %v1257_v47  ;;  %v1302_v63 = vshra.s32 %v4410_v29, 16 }
 0x18a   : > { %vm1056_vm2 = vcmp.eq.f32.partialorder %v4209_v11, %v992_v44  ;;  %v4419_v57 = vsel %vm944_vm1, %v1085_v21, 2147483647 }
 0x18b   : > { %v1088_v56 = vsel %vm1056_vm2, %v4300_v25, 64  ;;  %v989_v10 = vpop.xlane.xlu0 %988  ;;  %1260 = vmin.xlane.f32.xlu0 %v4414_v40  ;;  %v4423_v3 = vcvt.s32.f32 %v1302_v63  ;;  %v1287_v5 = vshra.s32 %v4419_v57, 16 }
 0x18c   : > { %vm1055_vm3 = vcmp.eq.f32.partialorder %v4214_v19, %v989_v10  ;;  %v4428_v47 = vsel %vm944_vm1, %v1088_v56, 2147483647 }
 0x18d   : > { %v1087_v50 = vsel %vm1055_vm3, %v4300_v25, 64  ;;  %v998_v44 = vpop.xlane.xlu1 %997  ;;  %1305 = vmin.xlane.f32.xlu1 %v4423_v3  ;;  %v4432_v21 = vcvt.s32.f32 %v1287_v5  ;;  %v1332_v11 = vshra.s32 %v4428_v47, 16 }
 0x18e   : > { %vm1058_vm4 = vcmp.eq.f32.partialorder %v4219_v26, %v998_v44  ;;  %v4437_v63 = vsel %vm944_vm1, %v1087_v50, 2147483647 }
 0x18f   : > { %v1090_v41 = vsel %vm1058_vm4, %v4300_v25, 64  ;;  %v995_v10 = vpop.xlane.xlu0 %994  ;;  %1290 = vmin.xlane.f32.xlu0 %v4432_v21  ;;  %v4441_v56 = vcvt.s32.f32 %v1332_v11  ;;  %v1317_v19 = vshra.s32 %v4437_v63, 16 }
 0x190   : > { %vm1057_vm5 = vcmp.eq.f32.partialorder %v4224_v32, %v995_v10  ;;  %v4446_v5 = vsel %vm944_vm1, %v1090_v41, 2147483647 }
 0x191   : > { %v1089_v35 = vsel %vm1057_vm5, %v4300_v25, 64  ;;  %v1004_v44 = vpop.xlane.xlu1 %1003  ;;  %1335 = vmin.xlane.f32.xlu1 %v4441_v56  ;;  %v4450_v50 = vcvt.s32.f32 %v1317_v19  ;;  %v1362_v26 = vshra.s32 %v4446_v5, 16 }
 0x192   : > { %vm1060_vm6 = vcmp.eq.f32.partialorder %v4229_v38, %v1004_v44  ;;  %v4455_v11 = vsel %vm944_vm1, %v1089_v35, 2147483647 }
 0x193   : > { %v1092_v30 = vsel %vm1060_vm6, %v4300_v25, 64  ;;  %v1001_v10 = vpop.xlane.xlu0 %1000  ;;  %1320 = vmin.xlane.f32.xlu0 %v4450_v50  ;;  %v4459_v41 = vcvt.s32.f32 %v1362_v26  ;;  %v1347_v32 = vshra.s32 %v4455_v11, 16 }
 0x194   : > { %vm1059_vm7 = vcmp.eq.f32.partialorder %v4234_v45, %v1001_v10  ;;  %v4464_v19 = vsel %vm944_vm1, %v1092_v30, 2147483647 }
 0x195   : > { %v1091_v24 = vsel %vm1059_vm7, %v4300_v25, 64  ;;  %v1010_v44 = vpop.xlane.xlu1 %1009  ;;  %1365 = vmin.xlane.f32.xlu1 %v4459_v41  ;;  %v4468_v35 = vcvt.s32.f32 %v1347_v32  ;;  %v1392_v38 = vshra.s32 %v4464_v19, 16 }
 0x196   : > { %vm1062_vm8 = vcmp.eq.f32.partialorder %v4239_v54, %v1010_v44  ;;  %v4473_v26 = vsel %vm944_vm1, %v1091_v24, 2147483647 }
 0x197   : > { %v1094_v18 = vsel %vm1062_vm8, %v4300_v25, 64  ;;  %v1007_v10 = vpop.xlane.xlu0 %1006  ;;  %1350 = vmin.xlane.f32.xlu0 %v4468_v35  ;;  %v4477_v30 = vcvt.s32.f32 %v1392_v38  ;;  %v1377_v45 = vshra.s32 %v4473_v26, 16 }
 0x198   : > { %vm1061_vm9 = vcmp.eq.f32.partialorder %v4244_v53, %v1007_v10  ;;  %v4482_v32 = vsel %vm944_vm1, %v1094_v18, 2147483647 }
 0x199   : > { %v1093_v13 = vsel %vm1061_vm9, %v4300_v25, 64  ;;  %v1016_v44 = vpop.xlane.xlu1 %1015  ;;  %1395 = vmin.xlane.f32.xlu1 %v4477_v30  ;;  %v4486_v24 = vcvt.s32.f32 %v1377_v45  ;;  %v1422_v54 = vshra.s32 %v4482_v32, 16 }
 0x19a   : > { %vm1064_vm10 = vcmp.eq.f32.partialorder %v4249_v8, %v1016_v44  ;;  %v4491_v38 = vsel %vm944_vm1, %v1093_v13, 2147483647 }
 0x19b   : > { %v1096_v7 = vsel %vm1064_vm10, %v4300_v25, 64  ;;  %v1013_v10 = vpop.xlane.xlu0 %1012  ;;  %1380 = vmin.xlane.f32.xlu0 %v4486_v24  ;;  %v4495_v18 = vcvt.s32.f32 %v1422_v54  ;;  %v1407_v53 = vshra.s32 %v4491_v38, 16 }
 0x19c   : > { %vm1063_vm11 = vcmp.eq.f32.partialorder %v4254_v15, %v1013_v10  ;;  %v4500_v45 = vsel %vm944_vm1, %v1096_v7, 2147483647 }
 0x19d   : > { %v1095_v1 = vsel %vm1063_vm11, %v4300_v25, 64  ;;  %v1022_v44 = vpop.xlane.xlu1 %1021  ;;  %1425 = vmin.xlane.f32.xlu1 %v4495_v18  ;;  %v4504_v13 = vcvt.s32.f32 %v1407_v53  ;;  %v1452_v8 = vshra.s32 %v4500_v45, 16 }
 0x19e   : > { %vm1066_vm12 = vcmp.eq.f32.partialorder %v4259_v22, %v1022_v44  ;;  %v4509_v54 = vsel %vm944_vm1, %v1095_v1, 2147483647 }
 0x19f   : > { %6582 = vst [vmem:[#allocation38_spill] sm:$0xff] %v4504_v13  ;;  %v1098_v60 = vsel %vm1066_vm12, %v4300_v25, 64  ;;  %v1019_v10 = vpop.xlane.xlu0 %1018  ;;  %1410 = vmin.xlane.f32.xlu0 %v4504_v13  ;;  %v4513_v7 = vcvt.s32.f32 %v1452_v8  ;;  %v1437_v15 = vshra.s32 %v4509_v54, 16 }
 0x1a0   : > { %vm1065_vm13 = vcmp.eq.f32.partialorder %v4264_v33, %v1019_v10  ;;  %v4518_v53 = vsel %vm944_vm1, %v1098_v60, 2147483647 }
 0x1a1   : > { %6583 = vst [vmem:[#allocation39_spill] sm:$0xff] %v4513_v7  ;;  %v1097_v55 = vsel %vm1065_vm13, %v4300_v25, 64  ;;  %v1028_v44 = vpop.xlane.xlu1 %1027  ;;  %1455 = vmin.xlane.f32.xlu1 %v4513_v7  ;;  %v4522_v1 = vcvt.s32.f32 %v1437_v15  ;;  %v1482_v22 = vshra.s32 %v4518_v53, 16 }
 0x1a2   : > { %vm1068_vm14 = vcmp.eq.f32.partialorder %v4269_v39, %v1028_v44  ;;  %v4527_v8 = vsel %vm944_vm1, %v1097_v55, 2147483647 }
 0x1a3   : > { %6584 = vst [vmem:[#allocation40_spill] sm:$0xff] %v4522_v1  ;;  %v1100_v13 = vsel %vm1068_vm14, %v4300_v25, 64  ;;  %v1025_v10 = vpop.xlane.xlu0 %1024  ;;  %1440 = vmin.xlane.f32.xlu0 %v4522_v1  ;;  %v4531_v60 = vcvt.s32.f32 %v1482_v22  ;;  %v1467_v33 = vshra.s32 %v4527_v8, 16 }
 0x1a4   : > { %vm1067_vm15 = vcmp.eq.f32.partialorder %v4274_v46, %v1025_v10  ;;  %v4536_v15 = vsel %vm944_vm1, %v1100_v13, 2147483647 }
 0x1a5   : > { %6585 = vst [vmem:[#allocation41_spill] sm:$0xff] %v4531_v60  ;;  %v1099_v7 = vsel %vm1067_vm15, %v4300_v25, 64  ;;  %v1034_v44 = vpop.xlane.xlu1 %1033  ;;  %1485 = vmin.xlane.f32.xlu1 %v4531_v60  ;;  %v4540_v55 = vcvt.s32.f32 %v1467_v33  ;;  %v1512_v39 = vshra.s32 %v4536_v15, 16 }
 0x1a6   : > { %vm1070_vm2 = vcmp.eq.f32.partialorder %v4279_v61, %v1034_v44  ;;  %v4545_v22 = vsel %vm944_vm1, %v1099_v7, 2147483647 }
 0x1a7   : > { %6586 = vst [vmem:[#allocation42_spill] sm:$0xff] %v4540_v55  ;;  %v1102_v1 = vsel %vm1070_vm2, %v4300_v25, 64  ;;  %v1031_v10 = vpop.xlane.xlu0 %1030  ;;  %1470 = vmin.xlane.f32.xlu0 %v4540_v55  ;;  %v4549_v13 = vcvt.s32.f32 %v1512_v39  ;;  %v1497_v46 = vshra.s32 %v4545_v22, 16 }
 0x1a8   : > { %vm1069_vm3 = vcmp.eq.f32.partialorder %v4284_v4, %v1031_v10  ;;  %v4554_v33 = vsel %vm944_vm1, %v1102_v1, 2147483647 }
 0x1a9   : > { %6587 = vst [vmem:[#allocation43_spill] sm:$0xff] %v4549_v13  ;;  %v1101_v60 = vsel %vm1069_vm3, %v4300_v25, 64  ;;  %1515 = vmin.xlane.f32.xlu1 %v4549_v13  ;;  %v1040_v7 = vpop.xlane.xlu1 %1039  ;;  %v4558_v44 = vcvt.s32.f32 %v1497_v46  ;;  %v1542_v61 = vshra.s32 %v4554_v33, 16 }
 0x1aa   : > { %vm1072_vm4 = vcmp.eq.f32.partialorder %v4289_v14, %v1040_v7  ;;  %v4563_v39 = vsel %vm944_vm1, %v1101_v60, 2147483647 }
 0x1ab   : > { %v1104_v55 = vsel %vm1072_vm4, %v4300_v25, 64  ;;  %1500 = vmin.xlane.f32.xlu0 %v4558_v44  ;;  %v1037_v1 = vpop.xlane.xlu0 %1036  ;;  %v4567_v10 = vcvt.s32.f32 %v1542_v61  ;;  %v1527_v4 = vshra.s32 %v4563_v39, 16 }
 0x1ac   : > { %vm1071_vm5 = vcmp.eq.f32.partialorder %v4293_v20, %v1037_v1  ;;  %v4572_v46 = vsel %vm944_vm1, %v1104_v55, 2147483647  ;;  %v2356_v20 = vld [vmem:[%s6423_s2 + $0x18] sm:$0xff] }
 0x1ad   : > { %v1103_v13 = vsel %vm1071_vm5, %v4300_v25, 64  ;;  %1545 = vmin.xlane.f32.xlu1 %v4567_v10  ;;  %v4576_v60 = vcvt.s32.f32 %v1527_v4  ;;  %v1572_v7 = vshra.s32 %v4572_v46, 16  ;;  %v2360_v4 = vld [vmem:[%s6423_s2 + $0x38] sm:$0xff]  ;;  %v1151_v25 = vand.u32 65535, %v4320_v49 }
 0x1ae   : > { %v4580_v14 = vsel %vm944_vm1, %v1103_v13, 2147483647  ;;  %v2359_v13 = vld [vmem:[%s6423_s2 + $0x30] sm:$0xff]  ;;  %3688 = vmatprep.subr.mxu0 %v2360_v4  ;;  %3752 = vmatprep.subr.mxu1 %v2360_v4 }
 0x1af   : > { %6588 = vst [vmem:[#allocation44_spill] sm:$0xff] %v4576_v60  ;;  %6589 = vst [vmem:[#allocation45_spill] sm:$0xff] %v4580_v14  ;;  %1530 = vmin.xlane.f32.xlu0 %v4576_v60  ;;  %v4583_v61 = vcvt.s32.f32 %v1572_v7  ;;  %v1557_v1 = vshra.s32 %v4580_v14, 16  ;;  %3689 = vmatpush3.msra.mxu0 %v2360_v4  ;;  %v2358_v7 = vld [vmem:[%s6423_s2 + $0x28] sm:$0xff]  ;;  %v1153_v49 = vcvt.s32.f32 %v1151_v25 }
 0x1b0   : > { %3760 = vmatpush3.msra.mxu1 %v2360_v4  ;;  %3690 = vmatprep.subr.mxu0 %v2359_v13  ;;  %v1121_v4 = vand.u32 65535, %v4306_v31 }
 0x1b1   : > { %6590 = vst [vmem:[#allocation46_spill] sm:$0xff] %v4583_v61  ;;  %1575 = vmin.xlane.f32.xlu1 %v4583_v61  ;;  %v4587_v55 = vcvt.s32.f32 %v1557_v1  ;;  %3753 = vmatprep.subr.mxu1 %v2359_v13  ;;  %v2357_v1 = vld [vmem:[%s6423_s2 + $0x20] sm:$0xff] }
 0x1b2   : > { %3691 = vmatpush3.msra.mxu0 %v2359_v13  ;;  %3761 = vmatpush3.msra.mxu1 %v2359_v13  ;;  %v1106_v13 = vand.u32 65535, %v4312_v37  ;;  %v1123_v61 = vcvt.s32.f32 %v1121_v4 }
 0x1b3   : > { %6591 = vst [vmem:[#allocation47_spill] sm:$0xff] %v4587_v55  ;;  %1560 = vmin.xlane.f32.xlu0 %v4587_v55  ;;  %3692 = vmatprep.subr.mxu0 %v2358_v7 }
 0x1b4   : > { %3754 = vmatprep.subr.mxu1 %v2358_v7  ;;  %3693 = vmatpush3.msra.mxu0 %v2358_v7  ;;  %v1108_v14 = vcvt.s32.f32 %v1106_v13 }
 0x1b5   : > { %3762 = vmatpush3.msra.mxu1 %v2358_v7  ;;  %3694 = vmatprep.subr.mxu0 %v2357_v1  ;;  %v1136_v7 = vand.u32 65535, %v4329_v58 }
 0x1b6   : > { %3755 = vmatprep.subr.mxu1 %v2357_v1  ;;  %3695 = vmatpush3.msra.mxu0 %v2357_v1 }
 0x1b7   : > { %3763 = vmatpush3.msra.mxu1 %v2357_v1  ;;  %3696 = vmatprep.subr.mxu0 %v2356_v20  ;;  %v1138_v4 = vcvt.s32.f32 %v1136_v7 }
 0x1b8   : > { %3756 = vmatprep.subr.mxu1 %v2356_v20  ;;  %3697 = vmatpush3.msra.mxu0 %v2356_v20 }
 0x1b9   : > { %3764 = vmatpush3.msra.mxu1 %v2356_v20  ;;  %v1181_v20 = vand.u32 65535, %v4338_v59 }
 0x1bb   : > { %v1183_v25 = vcvt.s32.f32 %v1181_v20 }
 0x1fe   : > { %v4608_v55 = vpop.xlane.xlu1 %1125 }
 0x1ff   : > { %vm1127_vm6 = vcmp.eq.f32.partialorder %v4315_v43, %v4608_v55  ;;  %v1166_v43 = vand.u32 65535, %v4347_v17 }
 0x200   : > { %v4613_v60 = vpop.xlane.xlu0 %1110  ;;  %v1128_v1 = vsel %vm1127_vm6, %v1123_v61, inf }
 0x201   : > { %1129 = vmin.xlane.f32.xlu1 %v1128_v1  ;;  %vm1112_vm7 = vcmp.eq.f32.partialorder %v4324_v48, %v4613_v60  ;;  %v1211_v48 = vand.u32 65535, %v4356_v28  ;;  %v1168_v7 = vcvt.s32.f32 %v1166_v43 }
 0x202   : > { %v4618_v31 = vpop.xlane.xlu1 %1155  ;;  %v1113_v37 = vsel %vm1112_vm7, %v1108_v14, inf }
 0x203   : > { %1114 = vmin.xlane.f32.xlu0 %v1113_v37  ;;  %vm1157_vm8 = vcmp.eq.f32.partialorder %v4333_v2, %v4618_v31  ;;  %v1196_v2 = vand.u32 65535, %v4365_v42  ;;  %v1213_v20 = vcvt.s32.f32 %v1211_v48 }
 0x204   : > { %v4623_v58 = vpop.xlane.xlu0 %1140  ;;  %v1158_v61 = vsel %vm1157_vm8, %v1153_v49, inf }
 0x205   : > { %1159 = vmin.xlane.f32.xlu1 %v1158_v61  ;;  %vm1142_vm9 = vcmp.eq.f32.partialorder %v4342_v6, %v4623_v58  ;;  %v1241_v6 = vand.u32 65535, %v4374_v62  ;;  %v1198_v49 = vcvt.s32.f32 %v1196_v2  ;;  %v2353_v2 = vld [vmem:[%s6423_s2] sm:$0xff] }
 0x206   : > { %v4628_v59 = vpop.xlane.xlu1 %1185  ;;  %v1143_v14 = vsel %vm1142_vm9, %v1138_v4, inf }
 0x207   : > { %1144 = vmin.xlane.f32.xlu0 %v1143_v14  ;;  %vm1187_vm10 = vcmp.eq.f32.partialorder %v4351_v23, %v4628_v59  ;;  %v1226_v23 = vand.u32 65535, %v4383_v16  ;;  %v1243_v61 = vcvt.s32.f32 %v1241_v6  ;;  %v1256_v16 = vand.u32 65535, %v4401_v0 }
 0x208   : > { %v4633_v17 = vpop.xlane.xlu0 %1170  ;;  %v1188_v13 = vsel %vm1187_vm10, %v1183_v25, inf  ;;  %v1331_v6 = vand.u32 65535, %v4428_v47 }
 0x209   : > { %1189 = vmin.xlane.f32.xlu1 %v1188_v13  ;;  %vm1172_vm11 = vcmp.eq.f32.partialorder %v4360_v36, %v4633_v17  ;;  %v1271_v36 = vand.u32 65535, %v4392_v34  ;;  %v1228_v48 = vcvt.s32.f32 %v1226_v23  ;;  %v2354_v34 = vld [vmem:[%s6423_s2 + $0x8] sm:$0xff] }
 0x20a   : > { %v4638_v28 = vpop.xlane.xlu1 %1215  ;;  %v1173_v1 = vsel %vm1172_vm11, %v1168_v7, inf  ;;  %v1258_v7 = vcvt.s32.f32 %v1256_v16 }
 0x20b   : > { %1174 = vmin.xlane.f32.xlu0 %v1173_v1  ;;  %vm1217_vm12 = vcmp.eq.f32.partialorder %v4369_v52, %v4638_v28  ;;  %v2355_v52 = vld [vmem:[%s6423_s2 + $0x10] sm:$0xff]  ;;  %v1273_v25 = vcvt.s32.f32 %v1271_v36 }
 0x20c   : > { %v4643_v42 = vpop.xlane.xlu0 %1200  ;;  %v1218_v37 = vsel %vm1217_vm12, %v1213_v20, inf  ;;  %3698 = vmatprep.subr.mxu0 %v2355_v52  ;;  %3757 = vmatprep.subr.mxu1 %v2355_v52 }
 0x20d   : > { %1219 = vmin.xlane.f32.xlu1 %v1218_v37  ;;  %vm1202_vm13 = vcmp.eq.f32.partialorder %v4378_v9, %v4643_v42  ;;  %3699 = vmatpush3.msra.mxu0 %v2355_v52 }
 0x20e   : > { %v4648_v62 = vpop.xlane.xlu1 %1245  ;;  %v1203_v43 = vsel %vm1202_vm13, %v1198_v49, inf  ;;  %3700 = vmatprep.subr.mxu0 %v2354_v34  ;;  %3765 = vmatpush3.msra.mxu1 %v2355_v52 }
 0x20f   : > { %1204 = vmin.xlane.f32.xlu0 %v1203_v43  ;;  %vm1247_vm14 = vcmp.eq.f32.partialorder %v4387_v27, %v4648_v62  ;;  %v1301_v27 = vand.u32 65535, %v4410_v29  ;;  %3701 = vmatpush3.msra.mxu0 %v2354_v34  ;;  %v1333_v43 = vcvt.s32.f32 %v1331_v6 }
 0x210   : > { %v4656_v4 = vpop.xlane.xlu0 %1230  ;;  %v1248_v9 = vsel %vm1247_vm14, %v1243_v61, inf  ;;  %3702 = vmatprep.subr.mxu0 %v2353_v2  ;;  %3758 = vmatprep.subr.mxu1 %v2354_v34 }
 0x211   : > { %1249 = vmin.xlane.f32.xlu1 %v1248_v9  ;;  %vm1232_vm15 = vcmp.eq.f32.partialorder %v4396_v51, %v4656_v4  ;;  %v1286_v51 = vand.u32 65535, %v4419_v57  ;;  %3703 = vmatpush3.msra.mxu0 %v2353_v2  ;;  %v1316_v57 = vand.u32 65535, %v4437_v63 }
 0x212   : > { %v4664_v14 = vpop.xlane.xlu1 %1275  ;;  %v1233_v0 = vsel %vm1232_vm15, %v1228_v48, inf  ;;  %3766 = vmatpush3.msra.mxu1 %v2354_v34 }
 0x213   : > { %1234 = vmin.xlane.f32.xlu0 %v1233_v0  ;;  %vm1277_vm2 = vcmp.eq.f32.partialorder %v4405_v12, %v4664_v14  ;;  %v1303_v12 = vcvt.s32.f32 %v1301_v27  ;;  %3759 = vmatprep.subr.mxu1 %v2353_v2  ;;  %v1288_v49 = vcvt.s32.f32 %v1286_v51  ;;  %v1318_v52 = vcvt.s32.f32 %v1316_v57 }
 0x214   : > { %v4672_v13 = vpop.xlane.xlu0 %1260  ;;  %v1278_v29 = vsel %vm1277_vm2, %v1273_v25, inf  ;;  %3767 = vmatpush3.msra.mxu1 %v2353_v2 }
 0x215   : > { %1279 = vmin.xlane.f32.xlu1 %v1278_v29  ;;  %vm1262_vm3 = vcmp.eq.f32.partialorder %v4414_v40, %v4672_v13  ;;  %v1361_v40 = vand.u32 65535, %v4446_v5 }
 0x216   : > { %v4677_v1 = vpop.xlane.xlu1 %1305  ;;  %v1263_v20 = vsel %vm1262_vm3, %v1258_v7, inf }
 0x217   : > { %1264 = vmin.xlane.f32.xlu0 %v1263_v20  ;;  %vm1307_vm4 = vcmp.eq.f32.partialorder %v4423_v3, %v4677_v1  ;;  %v1346_v3 = vand.u32 65535, %v4455_v11  ;;  %v1363_v9 = vcvt.s32.f32 %v1361_v40  ;;  %v6592_v20 = vld [vmem:[#allocation38_spill] sm:$0xff] }
 0x218   : > { %v4682_v23 = vpop.xlane.xlu0 %1290  ;;  %v1308_v37 = vsel %vm1307_vm4, %v1303_v12, inf }
 0x219   : > { %1309 = vmin.xlane.f32.xlu1 %v1308_v37  ;;  %vm1292_vm5 = vcmp.eq.f32.partialorder %v4432_v21, %v4682_v23  ;;  %v1391_v21 = vand.u32 65535, %v4464_v19  ;;  %v1348_v34 = vcvt.s32.f32 %v1346_v3  ;;  %v6593_v37 = vld [vmem:[#allocation39_spill] sm:$0xff] }
 0x21a   : > { %v4687_v47 = vpop.xlane.xlu1 %1335  ;;  %v1293_v36 = vsel %vm1292_vm5, %v1288_v49, inf }
 0x21b   : > { %1294 = vmin.xlane.f32.xlu0 %v1293_v36  ;;  %vm1337_vm6 = vcmp.eq.f32.partialorder %v4441_v56, %v4687_v47  ;;  %v1376_v56 = vand.u32 65535, %v4473_v26  ;;  %v1393_v0 = vcvt.s32.f32 %v1391_v21  ;;  %v6594_v36 = vld [vmem:[#allocation40_spill] sm:$0xff] }
 0x21c   : > { %v4692_v63 = vpop.xlane.xlu0 %1320  ;;  %v1338_v61 = vsel %vm1337_vm6, %v1333_v43, inf }
 0x21d   : > { %1339 = vmin.xlane.f32.xlu1 %v1338_v61  ;;  %vm1322_vm7 = vcmp.eq.f32.partialorder %v4450_v50, %v4692_v63  ;;  %v1421_v50 = vand.u32 65535, %v4482_v32  ;;  %v1378_v2 = vcvt.s32.f32 %v1376_v56  ;;  %v6596_v56 = vld [vmem:[#allocation42_spill] sm:$0xff] }
 0x21e   : > { %v4697_v5 = vpop.xlane.xlu1 %1365  ;;  %v1323_v16 = vsel %vm1322_vm7, %v1318_v52, inf  ;;  %v6595_v52 = vld [vmem:[#allocation41_spill] sm:$0xff] }
 0x21f   : > { %1324 = vmin.xlane.f32.xlu0 %v1323_v16  ;;  %vm1367_vm8 = vcmp.eq.f32.partialorder %v4459_v41, %v4697_v5  ;;  %v1406_v41 = vand.u32 65535, %v4491_v38  ;;  %v1423_v29 = vcvt.s32.f32 %v1421_v50 }
 0x220   : > { %v4702_v11 = vpop.xlane.xlu0 %1350  ;;  %v1368_v48 = vsel %vm1367_vm8, %v1363_v9, inf }
 0x221   : > { %1369 = vmin.xlane.f32.xlu1 %v1368_v48  ;;  %vm1352_vm9 = vcmp.eq.f32.partialorder %v4468_v35, %v4702_v11  ;;  %v1451_v35 = vand.u32 65535, %v4500_v45  ;;  %v1408_v6 = vcvt.s32.f32 %v1406_v41 }
 0x222   : > { %v4707_v19 = vpop.xlane.xlu1 %1395  ;;  %v1353_v27 = vsel %vm1352_vm9, %v1348_v34, inf }
 0x223   : > { %1354 = vmin.xlane.f32.xlu0 %v1353_v27  ;;  %vm1397_vm10 = vcmp.eq.f32.partialorder %v4477_v30, %v4707_v19  ;;  %v1436_v30 = vand.u32 65535, %v4509_v54  ;;  %v1453_v57 = vcvt.s32.f32 %v1451_v35  ;;  %v6597_v27 = vld [vmem:[#allocation43_spill] sm:$0xff] }
 0x224   : > { %v4712_v26 = vpop.xlane.xlu0 %1380  ;;  %v1398_v25 = vsel %vm1397_vm10, %v1393_v0, inf  ;;  %vm2714_vm10 = vcmask 7168  }
 0x225   : > { %1399 = vmin.xlane.f32.xlu1 %v1398_v25  ;;  %vm1382_vm11 = vcmp.eq.f32.partialorder %v4486_v24, %v4712_v26  ;;  %v1481_v24 = vand.u32 65535, %v4518_v53  ;;  %v1438_v40 = vcvt.s32.f32 %v1436_v30  ;;  %v1511_v53 = vand.u32 65535, %v4536_v15 }
 0x226   : > { %v4717_v32 = vpop.xlane.xlu1 %1425  ;;  %v1383_v51 = vsel %vm1382_vm11, %v1378_v2, inf  ;;  %v1541_v15 = vand.u32 65535, %v4554_v33  ;;  %v1571_v33 = vand.u32 65535, %v4572_v46 }
 0x227   : > { %1384 = vmin.xlane.f32.xlu0 %v1383_v51  ;;  %vm1427_vm12 = vcmp.eq.f32.partialorder %v4495_v18, %v4717_v32  ;;  %v1466_v18 = vand.u32 65535, %v4527_v8  ;;  %v1483_v61 = vcvt.s32.f32 %v1481_v24  ;;  %v1496_v8 = vand.u32 65535, %v4545_v22 }
 0x228   : > { %v4722_v38 = vpop.xlane.xlu0 %1410  ;;  %v1428_v7 = vsel %vm1427_vm12, %v1423_v29, inf  ;;  %v1513_v50 = vcvt.s32.f32 %v1511_v53  ;;  %v1526_v22 = vand.u32 65535, %v4563_v39  ;;  %v1543_v51 = vcvt.s32.f32 %v1541_v15  ;;  %v6598_v29 = vld [vmem:[#allocation45_spill] sm:$0xff] }
 0x229   : > { %1429 = vmin.xlane.f32.xlu1 %v1428_v7  ;;  %vm1412_vm13 = vcmp.eq.f32.partialorder %v6592_v20, %v4722_v38  ;;  %v1468_v9 = vcvt.s32.f32 %v1466_v18  ;;  %v1498_v25 = vcvt.s32.f32 %v1496_v8  ;;  %v1556_v39 = vand.u32 65535, %v6598_v29  ;;  %v6601_v18 = vld [vmem:[#allocation47_spill] sm:$0xff] }
 0x22a   : > { %v4727_v45 = vpop.xlane.xlu1 %1455  ;;  %v1413_v12 = vsel %vm1412_vm13, %v1408_v6, inf  ;;  %v1528_v6 = vcvt.s32.f32 %v1526_v22  ;;  %v1573_v24 = vcvt.s32.f32 %v1571_v33  ;;  %v1132_v53 = vcvt.f32.s32 %v4608_v55 }
 0x22b   : > { %1414 = vmin.xlane.f32.xlu0 %v1413_v12  ;;  %vm1457_vm14 = vcmp.eq.f32.partialorder %v6593_v37, %v4727_v45  ;;  %v6600_v12 = vld [vmem:[#allocation46_spill] sm:$0xff]  ;;  %v1558_v37 = vcvt.s32.f32 %v1556_v39  ;;  %v1177_v15 = vcvt.f32.s32 %v4633_v17  ;;  %v1222_v55 = vcvt.f32.s32 %v4638_v28 }
 0x22c   : > { %v4732_v54 = vpop.xlane.xlu0 %1440  ;;  %v1458_v49 = vsel %vm1457_vm14, %v1453_v57, inf  ;;  %v1252_v28 = vcvt.f32.s32 %v4648_v62  ;;  %v1282_v39 = vcvt.f32.s32 %v4664_v14 }
 0x22d   : > { %1459 = vmin.xlane.f32.xlu1 %v1458_v49  ;;  %vm1442_vm15 = vcmp.eq.f32.partialorder %v6594_v36, %v4732_v54  ;;  %v4803_v33 = vshll.u32 %v1177_v15, 16  ;;  %v4808_v29 = vshll.u32 %v1222_v55, 16  ;;  %v1372_v15 = vcvt.f32.s32 %v4697_v5 }
 0x22e   : > { %v4737_v43 = vpop.xlane.xlu1 %1485  ;;  %v1443_v3 = vsel %vm1442_vm15, %v1438_v40, inf  ;;  %v6602_v40 = vlaneseq }
 0x22f   : > { %1444 = vmin.xlane.f32.xlu0 %v1443_v3  ;;  %vm1487_vm2 = vcmp.eq.f32.partialorder %v6595_v52, %v4737_v43  ;;  %v1117_v3 = vcvt.f32.s32 %v4613_v60  ;;  %v1147_v52 = vcvt.f32.s32 %v4623_v58 }
 0x230   : > { %v4742_v21 = vpop.xlane.xlu0 %1470  ;;  %v1488_v16 = vsel %vm1487_vm2, %v1483_v61, inf  ;;  %v4775_v36 = vshrl.u32 %v6602_v40, 7  ;;  %v1162_v61 = vcvt.f32.s32 %v4618_v31 }
 0x231   : > { %1489 = vmin.xlane.f32.xlu1 %v1488_v16  ;;  %vm1472_vm3 = vcmp.eq.f32.partialorder %v6596_v56, %v4742_v21  ;;  %v1192_v16 = vcvt.f32.s32 %v4628_v59  ;;  %v4794_v58 = vshll.u32 %v1147_v52, 16 }
 0x232   : > { %v4747_v48 = vpop.xlane.xlu1 %1515  ;;  %v1473_v34 = vsel %vm1472_vm3, %v1468_v9, inf  ;;  %v2782_v8 = vadd.s32 8, %v4775_v36  ;;  %v4784_v9 = vstv %s3520_s24  ;;  %v2784_v56 = vadd.s32 24, %v4775_v36 }
 0x233   : > { %1474 = vmin.xlane.f32.xlu0 %v1473_v34  ;;  %vm1517_vm4 = vcmp.eq.f32.partialorder %v6597_v27, %v4747_v48  ;;  %v1133_v34 = vshll.u32 %v1132_v53, 16  ;;  %v2783_v60 = vadd.s32 16, %v4775_v36  ;;  %v4792_v31 = vshll.u32 %v1162_v61, 16 }
 0x234   : > { %v4752_v0 = vpop.xlane.xlu0 %1500  ;;  %v1518_v41 = vsel %vm1517_vm4, %v1513_v50, inf  ;;  %v4788_v50 = vshll.u32 %v1117_v3, 16  ;;  %v2785_v27 = vadd.s32 32, %v4775_v36  ;;  %v2815_v59 = vadd.s32 %v4784_v9, %v2782_v8 }
 0x235   : > { %1519 = vmin.xlane.f32.xlu1 %v1518_v41  ;;  %vm1502_vm5 = vcmp.eq.f32.partialorder %v4558_v44, %v4752_v0  ;;  %v6599_v44 = vld [vmem:[#allocation44_spill] sm:$0xff]  ;;  %v4798_v22 = vshll.u32 %v1192_v16, 16  ;;  %v1207_v41 = vcvt.f32.s32 %v4643_v42  ;;  %v2817_v17 = vadd.s32 %v4784_v9, %v2784_v56 }
 0x236   : > { %v4757_v2 = vpop.xlane.xlu1 %1545  ;;  %v1503_v35 = vsel %vm1502_vm5, %v1498_v25, inf  ;;  %v2786_v25 = vadd.s32 40, %v4775_v36  ;;  %v1267_v42 = vcvt.f32.s32 %v4672_v13  ;;  %vm2847_vm11 = vcmp.lt.s32.totalorder %v2815_v59, 512 }
 0x237   : > { %1504 = vmin.xlane.f32.xlu0 %v1503_v35  ;;  %vm1547_vm6 = vcmp.eq.f32.partialorder %v4567_v10, %v4757_v2  ;;  %v1237_v35 = vcvt.f32.s32 %v4656_v4  ;;  %v4816_v62 = vshll.u32 %v1207_v41, 16  ;;  %vm2849_vm12 = vcmp.lt.s32.totalorder %v2817_v17, 512 }
 0x238   : > { %v4762_v30 = vpop.xlane.xlu0 %1530  ;;  %v1548_v7 = vsel %vm1547_vm6, %v1543_v51, inf  ;;  %v2788_v51 = vadd.s32 56, %v4775_v36  ;;  %v2819_v4 = vadd.s32 %v4784_v9, %v2786_v25  ;;  %v4832_v40 = vshll.u32 %v1267_v42, 16 }
 0x239   : > { %1549 = vmin.xlane.f32.xlu1 %v1548_v7  ;;  %vm1532_vm7 = vcmp.eq.f32.partialorder %v6599_v44, %v4762_v30  ;;  %v2816_v7 = vadd.s32 %v4784_v9, %v2783_v60  ;;  %v2814_v44 = vadd.s32 %v4784_v9, %v4775_v36  ;;  %v4822_v14 = vshll.u32 %v1237_v35, 16 }
 0x23a   : > { %v4766_v46 = vpop.xlane.xlu1 %1575  ;;  %v1533_v20 = vsel %vm1532_vm7, %v1528_v6, inf  ;;  %v2818_v6 = vadd.s32 %v4784_v9, %v2785_v27  ;;  %v2821_v13 = vadd.s32 %v4784_v9, %v2788_v51  ;;  %v1327_v3 = vcvt.f32.s32 %v4692_v63  ;;  %v6607_v51 = vld [vmem:[#allocation37_spill] sm:$0xff] }
 0x23b   : > { %1534 = vmin.xlane.f32.xlu0 %v1533_v20  ;;  %vm1577_vm8 = vcmp.eq.f32.partialorder %v6600_v12, %v4766_v46  ;;  %v2787_v20 = vadd.s32 48, %v4775_v36  ;;  %v1312_v12 = vcvt.f32.s32 %v4677_v1  ;;  %vm2848_vm13 = vcmp.lt.s32.totalorder %v2816_v7, 512 }
 0x23c   : > { %v4770_v10 = vpop.xlane.xlu0 %1560  ;;  %v1578_v57 = vsel %vm1577_vm8, %v1573_v24, inf  ;;  %v4820_v24 = vshll.u32 %v1252_v28, 16  ;;  %vm2850_vm14 = vcmp.lt.s32.totalorder %v2818_v6, 512  ;;  %vm2846_vm15 = vcmp.lt.s32.totalorder %v2814_v44, 512  ;;  %v6608_v44 = vld [vmem:[#allocation5_spill] sm:$0xff] }
 0x23d   : > { %1579 = vmin.xlane.f32.xlu1 %v1578_v57  ;;  %vm1562_vm9 = vcmp.eq.f32.partialorder %v6601_v18, %v4770_v10  ;;  %v4826_v57 = vshll.u32 %v1282_v39, 16  ;;  %v6475_v18 = vmov 0.0   ;;  %v1342_v1 = vcvt.f32.s32 %v4687_v47 }
 0x23e   : > { %v1563_v49 = vsel %vm1562_vm9, %v1558_v37, inf  ;;  %v1297_v37 = vcvt.f32.s32 %v4682_v23  ;;  %v4835_v53 = vsel %vm2849_vm12, 1.0, %v6475_v18  ;;  %vm2851_vm2 = vcmp.lt.s32.totalorder %v2819_v4, 512 }
 0x23f   : > { %1564 = vmin.xlane.f32.xlu0 %v1563_v49  ;;  %v4830_v49 = vsel %vm2847_vm11, 1.0, %v6475_v18  ;;  %v2820_v23 = vadd.s32 %v4784_v9, %v2787_v20  ;;  %v4840_v52 = vshll.u32 %v1312_v12, 16  ;;  %v4843_v16 = vsel %vm2848_vm13, 1.0, %v6475_v18 }
 0x240   : > { %6603 = vst [vmem:[#allocation38_spill] sm:$0xff] %v4830_v49  ;;  %6604 = vst [vmem:[#allocation39_spill] sm:$0xff] %v4843_v16  ;;  %vm2853_vm3 = vcmp.lt.s32.totalorder %v2821_v13, 512  ;;  %v4845_v56 = vshll.u32 %v1297_v37, 16  ;;  %v2790_v63 = vadd.s32 72, %v4775_v36  ;;  %v4856_v55 = vsel %vm2846_vm15, 1.0, %v6475_v18 }
 0x241   : > { %6605 = vst [vmem:[#allocation40_spill] sm:$0xff] %v4856_v55  ;;  %v4860_v59 = vsel %vm2850_vm14, 1.0, %v6475_v18  ;;  %v4863_v5 = vsel %vm2851_vm2, 1.0, %v6475_v18  ;;  %v4865_v41 = vshll.u32 %v1342_v1, 16  ;;  %v4867_v17 = vshll.u32 %v1327_v3, 16  ;;  %v6609_v3 = vld [vmem:[#allocation6_spill] sm:$0xff] }
 0x242   : > { %vm2852_vm4 = vcmp.lt.s32.totalorder %v2820_v23, 512  ;;  %v4870_v28 = vsel %vm2853_vm3, 1.0, %v6475_v18  ;;  %v2789_v39 = vadd.s32 64, %v4775_v36  ;;  %v4877_v7 = vshll.u32 %v1372_v15, 16 }
 0x243   : > { %6606 = vst [vmem:[#allocation41_spill] sm:$0xff] %v4870_v28  ;;  %v1357_v42 = vcvt.f32.s32 %v4702_v11  ;;  %v2823_v20 = vadd.s32 %v4784_v9, %v2790_v63  ;;  %v6611_v63 = vld [vmem:[#allocation7_spill] sm:$0xff] }
 0x245   : > { %vm2855_vm8 = vcmp.lt.s32.totalorder %v2823_v20, 512  ;;  %v1387_v20 = vcvt.f32.s32 %v4712_v26 }
 0x28a   : > { %v1130_v61 = vpop.xlane.xlu1 %1129 }
 0x28b   : > { %v1131_v8 = vcvt.f32.s32 %v1130_v61 }
 0x28c   : > { %v1115_v47 = vpop.xlane.xlu0 %1114 }
 0x28d   : > { %v1134_v60 = vadd.s32 %v1133_v34, %v1131_v8  ;;  %v1116_v27 = vcvt.f32.s32 %v1115_v47 }
 0x28e   : > { %v1160_v25 = vpop.xlane.xlu1 %1159 }
 0x28f   : > { %2716 = vst.msk [vmem:[%s4852_s12 + $0x8] sm:$0xff] %vm2714_vm10, %v1134_v60  ;;  %v1119_v34 = vadd.s32 %v4788_v50, %v1116_v27  ;;  %v1161_v35 = vcvt.f32.s32 %v1160_v25  ;;  %vm1586_vm5 = vcmp.eq.s32.totalorder %v6607_v51, %v1134_v60  ;;  %v2822_v27 = vadd.s32 %v4784_v9, %v2789_v39  ;;  %v6612_v39 = vld [vmem:[#allocation8_spill] sm:$0xff] }
 0x290   : > { %v1145_v6 = vpop.xlane.xlu0 %1144  ;;  %v4881_v4 = vsel %vm1586_vm5, inf, %v6608_v44  ;;  %v4891_v37 = vsel %vm1586_vm5, 1.0, %v6475_v18  ;;  %v2792_v25 = vadd.s32 88, %v4775_v36  ;;  %v1402_v44 = vcvt.f32.s32 %v4707_v19 }
 0x291   : > { %2715 = vst.msk [vmem:[%s4852_s12] sm:$0xff] %vm2714_vm10, %v1119_v34  ;;  %v1164_v50 = vadd.s32 %v4792_v31, %v1161_v35  ;;  %v1146_v12 = vcvt.f32.s32 %v1145_v6  ;;  %v1652_v13 = vsel %vm944_vm1, %v4881_v4, inf  ;;  %vm1585_vm6 = vcmp.eq.s32.totalorder %v6607_v51, %v1119_v34 }
 0x292   : > { %1653 = vmin.xlane.f32.xlu1 %v1652_v13  ;;  %v1190_v11 = vpop.xlane.xlu1 %1189  ;;  %v4894_v1 = vsel %vm1585_vm6, 1.0, %v6475_v18  ;;  %v4897_v61 = vsel %vm1585_vm6, inf, %v6609_v3  ;;  %v4901_v31 = vsel %vm2852_vm4, 1.0, %v6475_v18  ;;  %v4926_v6 = vshll.u32 %v1357_v42, 16 }
 0x293   : > { %6610 = vst [vmem:[#allocation42_spill] sm:$0xff] %v4901_v31  ;;  %2718 = vst.msk [vmem:[%s4852_s12 + $0x18] sm:$0xff] %vm2714_vm10, %v1164_v50  ;;  %v1191_v8 = vcvt.f32.s32 %v1190_v11  ;;  %3704 = vmatprep.mubr.msk.f32.mxu0 %vm944_vm1, %v4894_v1  ;;  %v1649_v15 = vsel %vm944_vm1, %v4897_v61, inf  ;;  %vm1588_vm7 = vcmp.eq.s32.totalorder %v6607_v51, %v1164_v50  ;;  %v1149_v47 = vadd.s32 %v4794_v58, %v1146_v12 }
 0x294   : > { %3705 = vmatmul.mubr.msk.f32.vlgmr.msra.gmra.mxu0 %vm944_vm1, %v4891_v37  ;;  %1650 = vmin.xlane.f32.xlu0 %v1649_v15  ;;  %v1175_v23 = vpop.xlane.xlu0 %1174  ;;  %v4916_v60 = vsel %vm1588_vm7, inf, %v6611_v63  ;;  %v4943_v19 = vsel %vm1588_vm7, 1.0, %v6475_v18  ;;  %vm2854_vm12 = vcmp.lt.s32.totalorder %v2822_v27, 512  ;;  %v2791_v50 = vadd.s32 80, %v4775_v36 }
 0x295   : > { %v1194_v34 = vadd.s32 %v4798_v22, %v1191_v8  ;;  %v1176_v35 = vcvt.f32.s32 %v1175_v23  ;;  %v1658_v58 = vsel %vm944_vm1, %v4916_v60, inf  ;;  %vm1587_vm9 = vcmp.eq.s32.totalorder %v6607_v51, %v1149_v47  ;;  %2717 = vst.msk [vmem:[%s4852_s12 + $0x10] sm:$0xff] %vm2714_vm10, %v1149_v47  ;;  %v6614_v23 = vld [vmem:[#allocation9_spill] sm:$0xff] }
 0x296   : > { %1659 = vmin.xlane.f32.xlu1 %v1658_v58  ;;  %v1220_v12 = vpop.xlane.xlu1 %1219  ;;  %v4930_v13 = vsel %vm1587_vm9, inf, %v6612_v39  ;;  %v4933_v22 = vsel %vm1587_vm9, 1.0, %v6475_v18  ;;  %v4966_v58 = vshll.u32 %v1402_v44, 16  ;;  %v4980_v44 = vsel %vm2854_vm12, 1.0, %v6475_v18 }
 0x297   : > { %6613 = vst [vmem:[#allocation43_spill] sm:$0xff] %v4930_v13  ;;  %2720 = vst.msk [vmem:[%s4852_s12 + $0x28] sm:$0xff] %vm2714_vm10, %v1194_v34  ;;  %v1179_v11 = vadd.s32 %v4803_v33, %v1176_v35  ;;  %v1221_v3 = vcvt.f32.s32 %v1220_v12  ;;  %3707 = vmatprep.mubr.msk.f32.mxu1 %vm944_vm1, %v4933_v22  ;;  %v1655_v42 = vsel %vm944_vm1, %v4930_v13, inf  ;;  %vm1590_vm11 = vcmp.eq.s32.totalorder %v6607_v51, %v1194_v34 }
 0x298   : > { %3708 = vmatmul.mubr.msk.f32.vlgmr.msra.gmra.mxu1 %vm944_vm1, %v4943_v19  ;;  %1656 = vmin.xlane.f32.xlu0 %v1655_v42  ;;  %v1205_v8 = vpop.xlane.xlu0 %1204  ;;  %v4952_v33 = vsel %vm2855_vm8, 1.0, %v6475_v18  ;;  %v4961_v63 = vsel %vm1590_vm11, inf, %v6614_v23  ;;  %v4964_v35 = vadd.s32 %v4784_v9, %v2792_v25  ;;  %6616 = vst [vmem:[#allocation44_spill] sm:$0xff] %v4980_v44  ;;  %v4987_v26 = vsel %vm1590_vm11, 1.0, %v6475_v18 }
 0x299   : > { %2719 = vst.msk [vmem:[%s4852_s12 + $0x20] sm:$0xff] %vm2714_vm10, %v1179_v11  ;;  %v1224_v15 = vadd.s32 %v4808_v29, %v1221_v3  ;;  %v1206_v47 = vcvt.f32.s32 %v1205_v8  ;;  %6615 = vst [vmem:[#allocation45_spill] sm:$0xff] %v4961_v63  ;;  %v1664_v12 = vsel %vm944_vm1, %v4961_v63, inf  ;;  %vm1589_vm13 = vcmp.eq.s32.totalorder %v6607_v51, %v1179_v11  ;;  %v6617_v11 = vld [vmem:[#allocation10_spill] sm:$0xff] }
 0x29a   : > { %v1250_v39 = vpop.xlane.xlu1 %1249  ;;  %1665 = vmin.xlane.f32.xlu1 %v1664_v12  ;;  %v4976_v25 = vsel %vm1589_vm13, 1.0, %v6475_v18  ;;  %v4990_v42 = vsel %vm1589_vm13, inf, %v6617_v11  ;;  %v2824_v8 = vadd.s32 %v4784_v9, %v2791_v50  ;;  %v2794_v23 = vadd.s32 104, %v4775_v36  ;;  %v6619_v11 = vld [vmem:[#allocation11_spill] sm:$0xff] }
 0x29b   : > { %2722 = vst.msk [vmem:[%s4852_s12 + $0x38] sm:$0xff] %vm2714_vm10, %v1224_v15  ;;  %v1209_v29 = vadd.s32 %v4816_v62, %v1206_v47  ;;  %v1251_v3 = vcvt.f32.s32 %v1250_v39  ;;  %3710 = vmatprep.mubr.msk.f32.mxu1 %vm944_vm1, %v4976_v25  ;;  %6618 = vst [vmem:[#allocation46_spill] sm:$0xff] %v4990_v42  ;;  %vm1592_vm14 = vcmp.eq.s32.totalorder %v6607_v51, %v1224_v15  ;;  %v1661_v34 = vsel %vm944_vm1, %v4990_v42, inf }
 0x29c   : > { %v1235_v62 = vpop.xlane.xlu0 %1234  ;;  %3711 = vmatmul.mubr.msk.f32.gmra.mxu1 %vm944_vm1, %v4987_v26  ;;  %v5002_v12 = vshll.u32 %v1387_v20, 16  ;;  %v1432_v39 = vcvt.f32.s32 %v4717_v32  ;;  %1662 = vmin.xlane.f32.xlu0 %v1661_v34  ;;  %v5008_v50 = vsel %vm1592_vm14, inf, %v6619_v11  ;;  %v5024_v34 = vsel %vm1592_vm14, 1.0, %v6475_v18 }
 0x29d   : > { %2721 = vst.msk [vmem:[%s4852_s12 + $0x30] sm:$0xff] %vm2714_vm10, %v1209_v29  ;;  %v1254_v27 = vadd.s32 %v4820_v24, %v1251_v3  ;;  %v1236_v47 = vcvt.f32.s32 %v1235_v62  ;;  %6620 = vst [vmem:[#allocation47_spill] sm:$0xff] %v5008_v50  ;;  %vm1591_vm15 = vcmp.eq.s32.totalorder %v6607_v51, %v1209_v29  ;;  %v1670_v20 = vsel %vm944_vm1, %v5008_v50, inf  ;;  %v6621_v29 = vld [vmem:[#allocation12_spill] sm:$0xff] }
 0x29e   : > { %v1280_v24 = vpop.xlane.xlu1 %1279  ;;  %v5017_v32 = vsel %vm1591_vm15, 1.0, %v6475_v18  ;;  %1671 = vmin.xlane.f32.xlu1 %v1670_v20  ;;  %v5027_v11 = vsel %vm1591_vm15, inf, %v6621_v29  ;;  %vm2856_vm3 = vcmp.lt.s32.totalorder %v2824_v8, 512  ;;  %v6623_v20 = vld [vmem:[#allocation13_spill] sm:$0xff] }
 0x29f   : > { %2724 = vst.msk [vmem:[%s4852_s12 + $0x48] sm:$0xff] %vm2714_vm10, %v1254_v27  ;;  %v1239_v3 = vadd.s32 %v4822_v14, %v1236_v47  ;;  %v1281_v62 = vcvt.f32.s32 %v1280_v24  ;;  %3713 = vmatprep.mubr.msk.f32.mxu1 %vm944_vm1, %v5017_v32  ;;  %6622 = vst [vmem:[#allocation37_spill] sm:$0xff] %v5027_v11  ;;  %vm1594_vm2 = vcmp.eq.s32.totalorder %v6607_v51, %v1254_v27  ;;  %v1667_v15 = vsel %vm944_vm1, %v5027_v11, inf }
 0x2a0   : > { %v1265_v14 = vpop.xlane.xlu0 %1264  ;;  %3714 = vmatmul.mubr.msk.f32.gmra.mxu1 %vm944_vm1, %v5024_v34  ;;  %v5040_v29 = vsel %vm1594_vm2, inf, %v6623_v20  ;;  %1668 = vmin.xlane.f32.xlu0 %v1667_v15  ;;  %v5049_v11 = vshll.u32 %v1432_v39, 16  ;;  %v6625_v15 = vmov 0.0   ;;  %v6626_v39 = vld [vmem:[#allocation14_spill] sm:$0xff] }
 0x2a1   : > { %2723 = vst.msk [vmem:[%s4852_s12 + $0x40] sm:$0xff] %vm2714_vm10, %v1239_v3  ;;  %v1284_v47 = vadd.s32 %v4826_v57, %v1281_v62  ;;  %v1266_v24 = vcvt.f32.s32 %v1265_v14  ;;  %6624 = vst [vmem:[#allocation5_spill] sm:$0xff] %v5040_v29  ;;  %v1676_v18 = vsel %vm944_vm1, %v5040_v29, inf  ;;  %vm1593_vm4 = vcmp.eq.s32.totalorder %v6607_v51, %v1239_v3 }
 0x2a2   : > { %v1310_v50 = vpop.xlane.xlu1 %1309  ;;  %v2793_v57 = vadd.s32 96, %v4775_v36  ;;  %v5047_v62 = vadd.s32 %v4784_v9, %v2794_v23  ;;  %v5055_v42 = vsel %vm1593_vm4, 1.0, %v6625_v15  ;;  %v1417_v29 = vcvt.f32.s32 %v4722_v38  ;;  %1677 = vmin.xlane.f32.xlu1 %v1676_v18 }
 0x2a3   : > { %2726 = vst.msk [vmem:[%s4852_s12 + $0x58] sm:$0xff] %vm2714_vm10, %v1284_v47  ;;  %v1269_v14 = vadd.s32 %v4832_v40, %v1266_v24  ;;  %v1311_v20 = vcvt.f32.s32 %v1310_v50  ;;  %3716 = vmatprep.mubr.msk.f32.mxu1 %vm944_vm1, %v5055_v42  ;;  %v5063_v23 = vsel %vm1594_vm2, 1.0, %v6625_v15  ;;  %v5066_v3 = vsel %vm1593_vm4, inf, %v6626_v39  ;;  %v6628_v50 = vld [vmem:[#allocation15_spill] sm:$0xff] }
 0x2a4   : > { %6627 = vst [vmem:[#allocation6_spill] sm:$0xff] %v5066_v3  ;;  %v1295_v40 = vpop.xlane.xlu0 %1294  ;;  %vm1596_vm5 = vcmp.eq.s32.totalorder %v6607_v51, %v1284_v47  ;;  %3717 = vmatmul.mubr.msk.f32.gmra.mxu1 %vm944_vm1, %v5063_v23  ;;  %v1673_v18 = vsel %vm944_vm1, %v5066_v3, inf  ;;  %v1462_v39 = vcvt.f32.s32 %v4727_v45  ;;  %v5096_v45 = vadd.s32 %v4784_v9, %v2793_v57  ;;  %v6632_v57 = vld [vmem:[#allocation17_spill] sm:$0xff] }
 0x2a5   : > { %2725 = vst.msk [vmem:[%s4852_s12 + $0x50] sm:$0xff] %vm2714_vm10, %v1269_v14  ;;  %v1314_v38 = vadd.s32 %v4840_v52, %v1311_v20  ;;  %v1296_v27 = vcvt.f32.s32 %v1295_v40  ;;  %v5079_v24 = vsel %vm1596_vm5, inf, %v6628_v50  ;;  %1674 = vmin.xlane.f32.xlu0 %v1673_v18  ;;  %vm1595_vm6 = vcmp.eq.s32.totalorder %v6607_v51, %v1269_v14  ;;  %v6630_v14 = vld [vmem:[#allocation16_spill] sm:$0xff] }
 0x2a6   : > { %6629 = vst [vmem:[#allocation7_spill] sm:$0xff] %v5079_v24  ;;  %v1682_v63 = vsel %vm944_vm1, %v5079_v24, inf  ;;  %v1340_v52 = vpop.xlane.xlu1 %1339  ;;  %v5087_v20 = vsel %vm2856_vm3, 1.0, %v6625_v15  ;;  %v5093_v3 = vsel %vm1595_vm6, 1.0, %v6625_v15  ;;  %v5098_v18 = vshll.u32 %v1417_v29, 16 }
 0x2a7   : > { %2728 = vst.msk [vmem:[%s4852_s12 + $0x68] sm:$0xff] %vm2714_vm10, %v1314_v38  ;;  %v1299_v40 = vadd.s32 %v4845_v56, %v1296_v27  ;;  %v1341_v50 = vcvt.f32.s32 %v1340_v52  ;;  %1683 = vmin.xlane.f32.xlu1 %v1682_v63  ;;  %3719 = vmatprep.mubr.msk.f32.mxu1 %vm944_vm1, %v5093_v3  ;;  %v5105_v8 = vsel %vm1596_vm5, 1.0, %v6625_v15  ;;  %v5108_v56 = vsel %vm1595_vm6, inf, %v6630_v14 }
 0x2a8   : > { %6631 = vst [vmem:[#allocation8_spill] sm:$0xff] %v5108_v56  ;;  %v1325_v27 = vpop.xlane.xlu0 %1324  ;;  %vm1598_vm7 = vcmp.eq.s32.totalorder %v6607_v51, %v1314_v38  ;;  %3720 = vmatmul.mubr.msk.f32.gmra.mxu1 %vm944_vm1, %v5105_v8  ;;  %v1679_v63 = vsel %vm944_vm1, %v5108_v56, inf  ;;  %v5123_v14 = vshll.u32 %v1462_v39, 16  ;;  %v1447_v24 = vcvt.f32.s32 %v4732_v54 }
 0x2a9   : > { %2727 = vst.msk [vmem:[%s4852_s12 + $0x60] sm:$0xff] %vm2714_vm10, %v1299_v40  ;;  %v1344_v29 = vadd.s32 %v4865_v41, %v1341_v50  ;;  %v1326_v47 = vcvt.f32.s32 %v1325_v27  ;;  %v5121_v52 = vsel %vm1598_vm7, inf, %v6632_v57  ;;  %1680 = vmin.xlane.f32.xlu0 %v1679_v63  ;;  %vm1597_vm8 = vcmp.eq.s32.totalorder %v6607_v51, %v1299_v40 }
 0x2aa   : > { %6633 = vst [vmem:[#allocation9_spill] sm:$0xff] %v5121_v52  ;;  %v1688_v41 = vsel %vm944_vm1, %v5121_v52, inf  ;;  %v1370_v50 = vpop.xlane.xlu1 %1369  ;;  %v1492_v56 = vcvt.f32.s32 %v4737_v43  ;;  %v5134_v39 = vsel %vm1597_vm8, 1.0, %v6625_v15  ;;  %v1477_v54 = vcvt.f32.s32 %v4742_v21  ;;  %v6634_v43 = vld [vmem:[#allocation18_spill] sm:$0xff] }
 0x2ab   : > { %2730 = vst.msk [vmem:[%s4852_s12 + $0x78] sm:$0xff] %vm2714_vm10, %v1344_v29  ;;  %v1329_v27 = vadd.s32 %v4867_v17, %v1326_v47  ;;  %v1371_v57 = vcvt.f32.s32 %v1370_v50  ;;  %1689 = vmin.xlane.f32.xlu1 %v1688_v41  ;;  %3722 = vmatprep.mubr.msk.f32.mxu1 %vm944_vm1, %v5134_v39  ;;  %v5142_v40 = vsel %vm1598_vm7, 1.0, %v6625_v15  ;;  %v5145_v63 = vsel %vm1597_vm8, inf, %v6634_v43  ;;  %v6636_v41 = vld [vmem:[#allocation19_spill] sm:$0xff] }
 0x2ac   : > { %6635 = vst [vmem:[#allocation10_spill] sm:$0xff] %v5145_v63  ;;  %v1355_v17 = vpop.xlane.xlu0 %1354  ;;  %vm1600_vm9 = vcmp.eq.s32.totalorder %v6607_v51, %v1344_v29  ;;  %3723 = vmatmul.mubr.msk.f32.gmra.mxu1 %vm944_vm1, %v5142_v40  ;;  %v1685_v47 = vsel %vm944_vm1, %v5145_v63, inf  ;;  %v5160_v43 = vshll.u32 %v1447_v24, 16  ;;  %v1522_v52 = vcvt.f32.s32 %v4747_v48 }
 0x2ad   : > { %2729 = vst.msk [vmem:[%s4852_s12 + $0x70] sm:$0xff] %vm2714_vm10, %v1329_v27  ;;  %v1374_v21 = vadd.s32 %v4877_v7, %v1371_v57  ;;  %v1356_v38 = vcvt.f32.s32 %v1355_v17  ;;  %v5158_v50 = vsel %vm1600_vm9, inf, %v6636_v41  ;;  %1686 = vmin.xlane.f32.xlu0 %v1685_v47  ;;  %vm1599_vm11 = vcmp.eq.s32.totalorder %v6607_v51, %v1329_v27 }
 0x2ae   : > { %6637 = vst [vmem:[#allocation11_spill] sm:$0xff] %v5158_v50  ;;  %v1694_v7 = vsel %vm944_vm1, %v5158_v50, inf  ;;  %v1400_v57 = vpop.xlane.xlu1 %1399  ;;  %v5166_v13 = vshll.u32 %v1492_v56, 16  ;;  %v5172_v24 = vsel %vm1599_vm11, 1.0, %v6625_v15  ;;  %v5174_v63 = vshll.u32 %v1477_v54, 16  ;;  %v6638_v56 = vld [vmem:[#allocation20_spill] sm:$0xff] }
 0x2af   : > { %2732 = vst.msk [vmem:[%s4852_s12 + $0x88] sm:$0xff] %vm2714_vm10, %v1374_v21  ;;  %v1359_v17 = vadd.s32 %v4926_v6, %v1356_v38  ;;  %v1401_v41 = vcvt.f32.s32 %v1400_v57  ;;  %1695 = vmin.xlane.f32.xlu1 %v1694_v7  ;;  %3725 = vmatprep.mubr.msk.f32.mxu1 %vm944_vm1, %v5172_v24  ;;  %v5181_v48 = vsel %vm1600_vm9, 1.0, %v6625_v15  ;;  %v5184_v27 = vsel %vm1599_vm11, inf, %v6638_v56  ;;  %v6640_v38 = vld [vmem:[#allocation21_spill] sm:$0xff] }
 0x2b0   : > { %6639 = vst [vmem:[#allocation12_spill] sm:$0xff] %v5184_v27  ;;  %v1385_v6 = vpop.xlane.xlu0 %1384  ;;  %vm1602_vm12 = vcmp.eq.s32.totalorder %v6607_v51, %v1374_v21  ;;  %3726 = vmatmul.mubr.msk.f32.gmra.mxu1 %vm944_vm1, %v5181_v48  ;;  %v1691_v47 = vsel %vm944_vm1, %v5184_v27, inf  ;;  %v5199_v57 = vshll.u32 %v1522_v52, 16  ;;  %v1507_v56 = vcvt.f32.s32 %v4752_v0 }
 0x2b1   : > { %2731 = vst.msk [vmem:[%s4852_s12 + $0x80] sm:$0xff] %vm2714_vm10, %v1359_v17  ;;  %v1404_v54 = vadd.s32 %v4966_v58, %v1401_v41  ;;  %v1386_v29 = vcvt.f32.s32 %v1385_v6  ;;  %v5197_v7 = vsel %vm1602_vm12, inf, %v6640_v38  ;;  %1692 = vmin.xlane.f32.xlu0 %v1691_v47  ;;  %vm1601_vm13 = vcmp.eq.s32.totalorder %v6607_v51, %v1359_v17 }
 0x2b2   : > { %6641 = vst [vmem:[#allocation13_spill] sm:$0xff] %v5197_v7  ;;  %v1700_v58 = vsel %vm944_vm1, %v5197_v7, inf  ;;  %v1430_v41 = vpop.xlane.xlu1 %1429  ;;  %v1552_v27 = vcvt.f32.s32 %v4757_v2  ;;  %v5210_v52 = vsel %vm1601_vm13, 1.0, %v6625_v15  ;;  %v1537_v0 = vcvt.f32.s32 %v4762_v30  ;;  %v6642_v2 = vld [vmem:[#allocation22_spill] sm:$0xff] }
 0x2b3   : > { %2734 = vst.msk [vmem:[%s4852_s12 + $0x98] sm:$0xff] %vm2714_vm10, %v1404_v54  ;;  %v1389_v6 = vadd.s32 %v5002_v12, %v1386_v29  ;;  %v1431_v38 = vcvt.f32.s32 %v1430_v41  ;;  %1701 = vmin.xlane.f32.xlu1 %v1700_v58  ;;  %3728 = vmatprep.mubr.msk.f32.mxu1 %vm944_vm1, %v5210_v52  ;;  %v5218_v17 = vsel %vm1602_vm12, 1.0, %v6625_v15  ;;  %v5221_v47 = vsel %vm1601_vm13, inf, %v6642_v2  ;;  %v6644_v58 = vld [vmem:[#allocation23_spill] sm:$0xff] }
 0x2b4   : > { %6643 = vst [vmem:[#allocation14_spill] sm:$0xff] %v5221_v47  ;;  %v1415_v12 = vpop.xlane.xlu0 %1414  ;;  %vm1604_vm14 = vcmp.eq.s32.totalorder %v6607_v51, %v1404_v54  ;;  %3729 = vmatmul.mubr.msk.f32.gmra.mxu1 %vm944_vm1, %v5218_v17  ;;  %v1697_v29 = vsel %vm944_vm1, %v5221_v47, inf  ;;  %v5236_v2 = vshll.u32 %v1507_v56, 16  ;;  %v1582_v7 = vcvt.f32.s32 %v4766_v46 }
 0x2b5   : > { %2733 = vst.msk [vmem:[%s4852_s12 + $0x90] sm:$0xff] %vm2714_vm10, %v1389_v6  ;;  %v1434_v30 = vadd.s32 %v5049_v11, %v1431_v38  ;;  %v1416_v21 = vcvt.f32.s32 %v1415_v12  ;;  %v5234_v41 = vsel %vm1604_vm14, inf, %v6644_v58  ;;  %1698 = vmin.xlane.f32.xlu0 %v1697_v29  ;;  %vm1603_vm15 = vcmp.eq.s32.totalorder %v6607_v51, %v1389_v6 }
 0x2b6   : > { %v1706_v11 = vsel %vm944_vm1, %v5234_v41, inf  ;;  %v1460_v38 = vpop.xlane.xlu1 %1459  ;;  %v5242_v50 = vshll.u32 %v1552_v27, 16  ;;  %v5248_v56 = vsel %vm1603_vm15, 1.0, %v6625_v15  ;;  %v5250_v47 = vshll.u32 %v1537_v0, 16  ;;  %v6645_v27 = vld [vmem:[#allocation24_spill] sm:$0xff] }
 0x2b7   : > { %2736 = vst.msk [vmem:[%s4852_s12 + $0xa8] sm:$0xff] %vm2714_vm10, %v1434_v30  ;;  %v1419_v12 = vadd.s32 %v5098_v18, %v1416_v21  ;;  %v1461_v58 = vcvt.f32.s32 %v1460_v38  ;;  %1707 = vmin.xlane.f32.xlu1 %v1706_v11  ;;  %3731 = vmatprep.mubr.msk.f32.mxu1 %vm944_vm1, %v5248_v56  ;;  %v5257_v46 = vsel %vm1604_vm14, 1.0, %v6625_v15  ;;  %v5260_v6 = vsel %vm1603_vm15, inf, %v6645_v27  ;;  %v6647_v21 = vld [vmem:[#allocation25_spill] sm:$0xff] }
 0x2b8   : > { %6646 = vst [vmem:[#allocation15_spill] sm:$0xff] %v5260_v6  ;;  %v1445_v18 = vpop.xlane.xlu0 %1444  ;;  %vm1606_vm2 = vcmp.eq.s32.totalorder %v6607_v51, %v1434_v30  ;;  %3732 = vmatmul.mubr.msk.f32.gmra.mxu1 %vm944_vm1, %v5257_v46  ;;  %v1703_v29 = vsel %vm944_vm1, %v5260_v6, inf  ;;  %v5275_v38 = vshll.u32 %v1582_v7, 16  ;;  %v3113_v7 = vmul.f32 %v4856_v55, %v4894_v1 }
 0x2b9   : > { %2735 = vst.msk [vmem:[%s4852_s12 + $0xa0] sm:$0xff] %vm2714_vm10, %v1419_v12  ;;  %v1464_v0 = vadd.s32 %v5123_v14, %v1461_v58  ;;  %v1446_v54 = vcvt.f32.s32 %v1445_v18  ;;  %v5273_v11 = vsel %vm1606_vm2, inf, %v6647_v21  ;;  %1704 = vmin.xlane.f32.xlu0 %v1703_v29  ;;  %vm1605_vm3 = vcmp.eq.s32.totalorder %v6607_v51, %v1419_v12 }
 0x2ba   : > { %v1712_v27 = vsel %vm944_vm1, %v5273_v11, inf  ;;  %v1490_v14 = vpop.xlane.xlu1 %1489  ;;  %v3114_v58 = vmul.f32 %v4830_v49, %v4891_v37  ;;  %v5286_v21 = vsel %vm1605_vm3, 1.0, %v6625_v15  ;;  %v3115_v29 = vmul.f32 %v4843_v16, %v4933_v22 }
 0x2bb   : > { %2738 = vst.msk [vmem:[%s4852_s12 + $0xb8] sm:$0xff] %vm2714_vm10, %v1464_v0  ;;  %v1449_v18 = vadd.s32 %v5160_v43, %v1446_v54  ;;  %v1491_v6 = vcvt.f32.s32 %v1490_v14  ;;  %1713 = vmin.xlane.f32.xlu1 %v1712_v27  ;;  %3734 = vmatprep.mubr.msk.f32.mxu1 %vm944_vm1, %v5286_v21  ;;  %v5297_v37 = vsel %vm1606_vm2, 1.0, %v6625_v15  ;;  %v6648_v43 = vld [vmem:[#allocation26_spill] sm:$0xff]  ;;  %vm1608_vm4 = vcmp.eq.s32.totalorder %v6607_v51, %v1464_v0  ;;  %v6649_v27 = vld [vmem:[#allocation27_spill] sm:$0xff] }
 0x2bc   : > { %v5300_v12 = vsel %vm1605_vm3, inf, %v6648_v43  ;;  %v1475_v54 = vpop.xlane.xlu0 %1474  ;;  %3735 = vmatmul.mubr.msk.f32.gmra.mxu1 %vm944_vm1, %v5297_v37  ;;  %v5313_v14 = vsel %vm1608_vm4, inf, %v6649_v27  ;;  %v1567_v43 = vcvt.f32.s32 %v4770_v10  ;;  %v3145_v10 = vsel %vm944_vm1, %v3113_v7, 0.0 }
 0x2bd   : > { %2737 = vst.msk [vmem:[%s4852_s12 + $0xb0] sm:$0xff] %vm2714_vm10, %v1449_v18  ;;  %v1494_v1 = vadd.s32 %v5166_v13, %v1491_v6  ;;  %v1709_v22 = vsel %vm944_vm1, %v5300_v12, inf  ;;  %v1476_v30 = vcvt.f32.s32 %v1475_v54  ;;  %6650 = vst [vmem:[#allocation16_spill] sm:$0xff] %v5313_v14  ;;  %v1718_v16 = vsel %vm944_vm1, %v5313_v14, inf }
 0x2be   : > { %1710 = vmin.xlane.f32.xlu0 %v1709_v22  ;;  %v1520_v13 = vpop.xlane.xlu1 %1519  ;;  %vm1607_vm5 = vcmp.eq.s32.totalorder %v6607_v51, %v1449_v18  ;;  %v3146_v6 = vsel %vm944_vm1, %v3114_v58, 0.0  ;;  %v3148_v22 = vsel %vm944_vm1, %v3115_v29, 0.0  ;;  %v5333_v58 = vsel %vm1608_vm4, 1.0, %v6625_v15  ;;  %v6651_v18 = vld [vmem:[#allocation28_spill] sm:$0xff]  ;;  %v6653_v29 = vld [vmem:[#allocation29_spill] sm:$0xff] }
 0x2bf   : > { %2740 = vst.msk [vmem:[%s4852_s12 + $0xc8] sm:$0xff] %vm2714_vm10, %v1494_v1  ;;  %v1479_v54 = vadd.s32 %v5174_v63, %v1476_v30  ;;  %v1521_v55 = vcvt.f32.s32 %v1520_v13  ;;  %v5324_v27 = vsel %vm1607_vm5, 1.0, %v6625_v15  ;;  %1719 = vmin.xlane.f32.xlu1 %v1718_v16  ;;  %v5336_v49 = vsel %vm1607_vm5, inf, %v6651_v18 }
 0x2c0   : > { %3737 = vmatprep.mubr.msk.f32.mxu1 %vm944_vm1, %v5324_v27  ;;  %6652 = vst [vmem:[#allocation17_spill] sm:$0xff] %v5336_v49  ;;  %v1505_v63 = vpop.xlane.xlu0 %1504  ;;  %vm1610_vm6 = vcmp.eq.s32.totalorder %v6607_v51, %v1494_v1  ;;  %v1715_v16 = vsel %vm944_vm1, %v5336_v49, inf  ;;  %v3116_v13 = vmul.f32 %v4835_v53, %v4943_v19  ;;  %v1568_v14 = vshll.u32 %v1567_v43, 16 }
 0x2c1   : > { %2739 = vst.msk [vmem:[%s4852_s12 + $0xc0] sm:$0xff] %vm2714_vm10, %v1479_v54  ;;  %v1524_v7 = vadd.s32 %v5199_v57, %v1521_v55  ;;  %3738 = vmatmul.mubr.msk.f32.gmra.mxu1 %vm944_vm1, %v5333_v58  ;;  %v1506_v0 = vcvt.f32.s32 %v1505_v63  ;;  %v5349_v30 = vsel %vm1610_vm6, inf, %v6653_v29  ;;  %vm1609_vm7 = vcmp.eq.s32.totalorder %v6607_v51, %v1479_v54  ;;  %v6654_v54 = vld [vmem:[#allocation30_spill] sm:$0xff] }
 0x2c2   : > { %1716 = vmin.xlane.f32.xlu0 %v1715_v16  ;;  %v1724_v18 = vsel %vm944_vm1, %v5349_v30, inf  ;;  %v1550_v55 = vpop.xlane.xlu1 %1549  ;;  %v3147_v57 = vadd.f32 %v3146_v6, %v3145_v10  ;;  %v5360_v29 = vsel %vm1609_vm7, 1.0, %v6625_v15  ;;  %v5367_v19 = vsel %vm1610_vm6, 1.0, %v6625_v15 }
 0x2c3   : > { %2742 = vst.msk [vmem:[%s4852_s12 + $0xd8] sm:$0xff] %vm2714_vm10, %v1524_v7  ;;  %v1509_v63 = vadd.s32 %v5236_v2, %v1506_v0  ;;  %v1551_v49 = vcvt.f32.s32 %v1550_v55  ;;  %1725 = vmin.xlane.f32.xlu1 %v1724_v18  ;;  %3740 = vmatprep.mubr.msk.f32.mxu1 %vm944_vm1, %v5360_v29  ;;  %v5370_v6 = vsel %vm1609_vm7, inf, %v6654_v54  ;;  %vm1612_vm8 = vcmp.eq.s32.totalorder %v6607_v51, %v1524_v7  ;;  %v6655_v0 = vld [vmem:[#allocation31_spill] sm:$0xff] }
 0x2c4   : > { %v1535_v43 = vpop.xlane.xlu0 %1534  ;;  %v3149_v2 = vadd.f32 %v3148_v22, %v3147_v57  ;;  %v1721_v1 = vsel %vm944_vm1, %v5370_v6, inf  ;;  %v5383_v18 = vsel %vm1612_vm8, inf, %v6655_v0  ;;  %v3150_v55 = vsel %vm944_vm1, %v3116_v13, 0.0 }
 0x2c5   : > { %2741 = vst.msk [vmem:[%s4852_s12 + $0xd0] sm:$0xff] %vm2714_vm10, %v1509_v63  ;;  %v1554_v10 = vadd.s32 %v5242_v50, %v1551_v49  ;;  %3741 = vmatmul.mubr.msk.f32.gmra.mxu1 %vm944_vm1, %v5367_v19  ;;  %v1536_v16 = vcvt.f32.s32 %v1535_v43  ;;  %v3117_v22 = vmul.f32 %v4860_v59, %v4976_v25  ;;  %vm2857_vm9 = vcmp.lt.s32.totalorder %v4964_v35, 512 }
 0x2c6   : > { %1722 = vmin.xlane.f32.xlu0 %v1721_v1  ;;  %v1730_v49 = vsel %vm944_vm1, %v5383_v18, inf  ;;  %v1580_v50 = vpop.xlane.xlu1 %1579  ;;  %vm1611_vm11 = vcmp.eq.s32.totalorder %v6607_v51, %v1509_v63  ;;  %v3118_v57 = vmul.f32 %v4863_v5, %v4987_v26  ;;  %v5405_v43 = vsel %vm1612_vm8, 1.0, %v6625_v15  ;;  %v6656_v63 = vld [vmem:[#allocation32_spill] sm:$0xff] }
 0x2c7   : > { %2744 = vst.msk [vmem:[%s4852_s12 + $0xe8] sm:$0xff] %vm2714_vm10, %v1554_v10  ;;  %v1539_v13 = vadd.s32 %v5250_v47, %v1536_v16  ;;  %v1581_v54 = vcvt.f32.s32 %v1580_v50  ;;  %v5398_v25 = vsel %vm1611_vm11, 1.0, %v6625_v15  ;;  %1731 = vmin.xlane.f32.xlu1 %v1730_v49  ;;  %v5408_v1 = vsel %vm1611_vm11, inf, %v6656_v63  ;;  %v6657_v49 = vld [vmem:[#allocation33_spill] sm:$0xff] }
 0x2c8   : > { %3743 = vmatprep.mubr.msk.f32.mxu1 %vm944_vm1, %v5398_v25  ;;  %v1565_v26 = vpop.xlane.xlu0 %1564  ;;  %vm1614_vm12 = vcmp.eq.s32.totalorder %v6607_v51, %v1554_v10  ;;  %v3151_v47 = vadd.f32 %v3150_v55, %v3149_v2  ;;  %v1727_v7 = vsel %vm944_vm1, %v5408_v1, inf  ;;  %v3152_v63 = vsel %vm944_vm1, %v3117_v22, 0.0 }
 0x2c9   : > { %2743 = vst.msk [vmem:[%s4852_s12 + $0xe0] sm:$0xff] %vm2714_vm10, %v1539_v13  ;;  %v1584_v16 = vadd.s32 %v5275_v38, %v1581_v54  ;;  %3744 = vmatmul.mubr.msk.f32.gmra.mxu1 %vm944_vm1, %v5405_v43  ;;  %v1566_v0 = vcvt.f32.s32 %v1565_v26  ;;  %v5421_v50 = vsel %vm1614_vm12, inf, %v6657_v49  ;;  %v3119_v2 = vmul.f32 %v4901_v31, %v5017_v32  ;;  %v6658_v49 = vld [vmem:[#allocation34_spill] sm:$0xff] }
 0x2ca   : > { %1728 = vmin.xlane.f32.xlu0 %v1727_v7  ;;  %v1736_v38 = vsel %vm944_vm1, %v5421_v50, inf  ;;  %vm1613_vm13 = vcmp.eq.s32.totalorder %v6607_v51, %v1539_v13  ;;  %v2795_v55 = vadd.s32 112, %v4775_v36  ;;  %v3154_v32 = vsel %vm944_vm1, %v3118_v57, 0.0  ;;  %v6659_v57 = vld [vmem:[#allocation35_spill] sm:$0xff] }
 0x2cb   : > { %2746 = vst.msk [vmem:[%s4852_s12 + $0xf8] sm:$0xff] %vm2714_vm10, %v1584_v16  ;;  %v1569_v54 = vadd.s32 %v1568_v14, %v1566_v0  ;;  %v5433_v26 = vsel %vm1613_vm13, 1.0, %v6625_v15  ;;  %v5436_v22 = vsel %vm1613_vm13, inf, %v6658_v49  ;;  %1737 = vmin.xlane.f32.xlu1 %v1736_v38  ;;  %v5444_v13 = vsel %vm1614_vm12, 1.0, %v6625_v15 }
 0x2cc   : > { %3746 = vmatprep.mubr.msk.f32.mxu1 %vm944_vm1, %v5433_v26  ;;  %v1733_v14 = vsel %vm944_vm1, %v5436_v22, inf  ;;  %vm1616_vm14 = vcmp.eq.s32.totalorder %v6607_v51, %v1584_v16  ;;  %v3120_v7 = vmul.f32 %v4870_v28, %v5024_v34  ;;  %v3153_v10 = vadd.f32 %v3152_v63, %v3151_v47  ;;  %v6660_v47 = vld [vmem:[#allocation36_spill] sm:$0xff] }
 0x2cd   : > { %2745 = vst.msk [vmem:[%s4852_s12 + $0xf0] sm:$0xff] %vm2714_vm10, %v1569_v54  ;;  %3747 = vmatmul.mubr.msk.f32.gmra.mxu1 %vm944_vm1, %v5444_v13  ;;  %v5458_v0 = vsel %vm1616_vm14, inf, %v6659_v57  ;;  %vm1615_vm15 = vcmp.eq.s32.totalorder %v6607_v51, %v1569_v54  ;;  %v3156_v38 = vsel %vm944_vm1, %v3119_v2, 0.0  ;;  %v3121_v49 = vmul.f32 %v4980_v44, %v5055_v42  ;;  %s3842_s12 = scalar_lea.vmem %s3263_s25, 16 }
 0x2ce   : > { %1734 = vmin.xlane.f32.xlu0 %v1733_v14  ;;  %v1742_v34 = vsel %vm944_vm1, %v5458_v0, inf  ;;  %v5467_v28 = vsel %vm1615_vm15, 1.0, %v6625_v15  ;;  %vm2858_vm2 = vcmp.lt.s32.totalorder %v5096_v45, 512  ;;  %v2796_v57 = vadd.s32 120, %v4775_v36  ;;  %p3843_p11 = scmp.ne.s32.totalorder %s3263_s25, %s3842_s12 }
 0x2cf   : > { %3749 = vmatprep.mubr.msk.f32.mxu1 %vm944_vm1, %v5467_v28  ;;  %v5474_v63 = vsel %vm1615_vm15, inf, %v6660_v47  ;;  %v3155_v2 = vadd.f32 %v3154_v32, %v3153_v10  ;;  %v2828_v42 = vadd.s32 %v4784_v9, %v2795_v55  ;;  %v2797_v54 = vadd.s32 128, %v4775_v36  ;;  %1743 = vmin.xlane.f32.xlu1 %v1742_v34 }
 0x2d0   : > { %v5481_v14 = vsel %vm1616_vm14, 1.0, %v6625_v15  ;;  %v1739_v44 = vsel %vm944_vm1, %v5474_v63, inf  ;;  %v5488_v31 = vsel %vm2857_vm9, 1.0, %v6625_v15  ;;  %vm2859_vm3 = vcmp.lt.s32.totalorder %v5047_v62, 512  ;;  %p3844_p12 = pnand %p3843_p11, %p3989_p5 }
 0x2d1   : > { %3750 = vmatmul.mubr.msk.f32.gmra.mxu1 %vm944_vm1, %v5481_v14  ;;  %v3157_v55 = vadd.f32 %v3156_v38, %v3155_v2  ;;  %v3158_v32 = vsel %vm944_vm1, %v3120_v7, 0.0  ;;  %v3160_v16 = vsel %vm944_vm1, %v3121_v49, 0.0  ;;  %v3122_v10 = vmul.f32 %v4952_v33, %v5063_v23 }
 0x2d2   : > { %v3123_v34 = vmul.f32 %v5087_v20, %v5093_v3  ;;  %1740 = vmin.xlane.f32.xlu0 %v1739_v44  ;;  %v5502_v35 = vsel %vm2858_vm2, 1.0, %v6625_v15  ;;  %v2829_v62 = vadd.s32 %v4784_v9, %v2796_v57  ;;  %v2798_v38 = vadd.s32 136, %v4775_v36  ;;  %p3845_p13 = pneg %p3844_p12 }
 0x2d3   : > { %v3159_v47 = vadd.f32 %v3158_v32, %v3157_v55  ;;  %vm2860_vm4 = vcmp.lt.s32.totalorder %v2828_v42, 512  ;;  %v2830_v7 = vadd.s32 %v4784_v9, %v2797_v54  ;;  %v2799_v49 = vadd.s32 144, %v4775_v36 }
 0x2d4   : > { %v5509_v23 = vsel %vm2859_vm3, 1.0, %v6625_v15  ;;  %v3162_v44 = vsel %vm944_vm1, %v3122_v10, 0.0  ;;  %v3164_v45 = vsel %vm944_vm1, %v3123_v34, 0.0  ;;  %v3124_v2 = vmul.f32 %v5488_v31, %v5105_v8 }
 0x2d5   : > { %v3161_v3 = vadd.f32 %v3160_v16, %v3159_v47  ;;  %v3125_v57 = vmul.f32 %v5502_v35, %v5134_v39  ;;  %v5518_v42 = vsel %vm2860_vm4, 1.0, %v6625_v15  ;;  %vm2861_vm5 = vcmp.lt.s32.totalorder %v2829_v62, 512 }
 0x2d6   : > { %6661 = vst [vmem:[#allocation18_spill] sm:$0xff] %v5518_v42  ;;  %v2831_v54 = vadd.s32 %v4784_v9, %v2798_v38  ;;  %vm2862_vm6 = vcmp.lt.s32.totalorder %v2830_v7, 512  ;;  %v2832_v32 = vadd.s32 %v4784_v9, %v2799_v49  ;;  %v2800_v16 = vadd.s32 152, %v4775_v36 }
 0x2d7   : > { %v3163_v55 = vadd.f32 %v3162_v44, %v3161_v3  ;;  %v2801_v10 = vadd.s32 160, %v4775_v36  ;;  %v2802_v34 = vadd.s32 168, %v4775_v36  ;;  %v3166_v47 = vsel %vm944_vm1, %v3124_v2, 0.0 }
 0x2d8   : > { %v3168_v39 = vsel %vm944_vm1, %v3125_v57, 0.0  ;;  %v3126_v62 = vmul.f32 %v5509_v23, %v5142_v40  ;;  %v3127_v38 = vmul.f32 %v5518_v42, %v5172_v24  ;;  %v5532_v7 = vsel %vm2861_vm5, 1.0, %v6625_v15 }
 0x2d9   : > { %v3165_v8 = vadd.f32 %v3164_v45, %v3163_v55  ;;  %v5535_v49 = vsel %vm2862_vm6, 1.0, %v6625_v15  ;;  %vm2863_vm7 = vcmp.lt.s32.totalorder %v2831_v54, 512  ;;  %vm2864_vm8 = vcmp.lt.s32.totalorder %v2832_v32, 512 }
 0x2da   : > { %v2833_v44 = vadd.s32 %v4784_v9, %v2800_v16  ;;  %v2834_v45 = vadd.s32 %v4784_v9, %v2801_v10  ;;  %v2803_v2 = vadd.s32 176, %v4775_v36  ;;  %v2835_v40 = vadd.s32 %v4784_v9, %v2802_v34 }
 0x2db   : > { %v3167_v3 = vadd.f32 %v3166_v47, %v3165_v8  ;;  %v2804_v57 = vadd.s32 184, %v4775_v36  ;;  %v3170_v55 = vsel %vm944_vm1, %v3126_v62, 0.0  ;;  %v3172_v42 = vsel %vm944_vm1, %v3127_v38, 0.0 }
 0x2dc   : > { %v3128_v54 = vmul.f32 %v5532_v7, %v5181_v48  ;;  %v3129_v32 = vmul.f32 %v5535_v49, %v5210_v52  ;;  %v5549_v16 = vsel %vm2863_vm7, 1.0, %v6625_v15  ;;  %v5552_v10 = vsel %vm2864_vm8, 1.0, %v6625_v15 }
 0x2dd   : > { %v3169_v24 = vadd.f32 %v3168_v39, %v3167_v3  ;;  %vm2865_vm9 = vcmp.lt.s32.totalorder %v2833_v44, 512  ;;  %vm2866_vm11 = vcmp.lt.s32.totalorder %v2834_v45, 512  ;;  %v2836_v8 = vadd.s32 %v4784_v9, %v2803_v2 }
 0x2de   : > { %v2805_v47 = vadd.s32 192, %v4775_v36  ;;  %vm2867_vm12 = vcmp.lt.s32.totalorder %v2835_v40, 512  ;;  %v2837_v39 = vadd.s32 %v4784_v9, %v2804_v57  ;;  %v3174_v62 = vsel %vm944_vm1, %v3128_v54, 0.0 }
 0x2df   : > { %v3171_v34 = vadd.f32 %v3170_v55, %v3169_v24  ;;  %v3176_v52 = vsel %vm944_vm1, %v3129_v32, 0.0  ;;  %v3130_v38 = vmul.f32 %v5549_v16, %v5218_v17  ;;  %v3131_v3 = vmul.f32 %v5552_v10, %v5248_v56 }
 0x2e0   : > { %v5564_v44 = vsel %vm2865_vm9, 1.0, %v6625_v15  ;;  %v5567_v45 = vsel %vm2866_vm11, 1.0, %v6625_v15  ;;  %v2806_v2 = vadd.s32 200, %v4775_v36  ;;  %vm2868_vm13 = vcmp.lt.s32.totalorder %v2836_v8, 512 }
 0x2e1   : > { %v3173_v48 = vadd.f32 %v3172_v42, %v3171_v34  ;;  %v2838_v42 = vadd.s32 %v4784_v9, %v2805_v47  ;;  %v2807_v57 = vadd.s32 208, %v4775_v36  ;;  %v5573_v24 = vsel %vm2867_vm12, 1.0, %v6625_v15 }
 0x2e2   : > { %vm2869_vm14 = vcmp.lt.s32.totalorder %v2837_v39, 512  ;;  %v3178_v56 = vsel %vm944_vm1, %v3130_v38, 0.0  ;;  %v3180_v55 = vsel %vm944_vm1, %v3131_v3, 0.0  ;;  %v3132_v54 = vmul.f32 %v5564_v44, %v5257_v46 }
 0x2e3   : > { %v3175_v40 = vadd.f32 %v3174_v62, %v3173_v48  ;;  %v3133_v32 = vmul.f32 %v5567_v45, %v5286_v21  ;;  %v5582_v34 = vsel %vm2868_vm13, 1.0, %v6625_v15  ;;  %v2839_v8 = vadd.s32 %v4784_v9, %v2806_v2 }
 0x2e4   : > { %v2808_v47 = vadd.s32 216, %v4775_v36  ;;  %vm2870_vm15 = vcmp.lt.s32.totalorder %v2838_v42, 512  ;;  %v2840_v39 = vadd.s32 %v4784_v9, %v2807_v57  ;;  %v2809_v62 = vadd.s32 224, %v4775_v36 }
 0x2e5   : > { %v3177_v17 = vadd.f32 %v3176_v52, %v3175_v40  ;;  %v5589_v52 = vsel %vm2869_vm14, 1.0, %v6625_v15  ;;  %v3182_v38 = vsel %vm944_vm1, %v3132_v54, 0.0  ;;  %v3184_v21 = vsel %vm944_vm1, %v3133_v32, 0.0 }
 0x2e6   : > { %v3134_v3 = vmul.f32 %v5573_v24, %v5297_v37  ;;  %v3135_v2 = vmul.f32 %v5582_v34, %v5324_v27  ;;  %v5598_v40 = vsel %vm2870_vm15, 1.0, %v6625_v15  ;;  %vm2871_vm2 = vcmp.lt.s32.totalorder %v2839_v8, 512 }
 0x2e7   : > { %v3179_v48 = vadd.f32 %v3178_v56, %v3177_v17  ;;  %v2841_v42 = vadd.s32 %v4784_v9, %v2808_v47  ;;  %vm2872_vm3 = vcmp.lt.s32.totalorder %v2840_v39, 512  ;;  %v2842_v17 = vadd.s32 %v4784_v9, %v2809_v62 }
 0x2e8   : > { %v2810_v56 = vadd.s32 232, %v4775_v36  ;;  %v3186_v37 = vsel %vm944_vm1, %v3134_v3, 0.0  ;;  %v3188_v32 = vsel %vm944_vm1, %v3135_v2, 0.0  ;;  %v3136_v27 = vmul.f32 %v5589_v52, %v5333_v58 }
 0x2e9   : > { %v3181_v46 = vadd.f32 %v3180_v55, %v3179_v48  ;;  %v2811_v55 = vadd.s32 240, %v4775_v36  ;;  %v3137_v8 = vmul.f32 %v5598_v40, %v5360_v29  ;;  %v5611_v47 = vsel %vm2871_vm2, 1.0, %v6625_v15 }
 0x2ea   : > { %v5614_v48 = vsel %vm2872_vm3, 1.0, %v6625_v15  ;;  %vm2873_vm4 = vcmp.lt.s32.totalorder %v2841_v42, 512  ;;  %vm2874_vm5 = vcmp.lt.s32.totalorder %v2842_v17, 512  ;;  %v2843_v62 = vadd.s32 %v4784_v9, %v2810_v56 }
 0x2eb   : > { %v3183_v57 = vadd.f32 %v3182_v38, %v3181_v46  ;;  %v2812_v46 = vadd.s32 248, %v4775_v36  ;;  %v2844_v38 = vadd.s32 %v4784_v9, %v2811_v55  ;;  %v3190_v58 = vsel %vm944_vm1, %v3136_v27, 0.0 }
 0x2ec   : > { %v3192_v29 = vsel %vm944_vm1, %v3137_v8, 0.0  ;;  %v3138_v3 = vmul.f32 %v5611_v47, %v5367_v19  ;;  %v3139_v2 = vmul.f32 %v5614_v48, %v5398_v25  ;;  %v5626_v42 = vsel %vm2873_vm4, 1.0, %v6625_v15 }
 0x2ed   : > { %v3185_v54 = vadd.f32 %v3184_v21, %v3183_v57  ;;  %v5629_v57 = vsel %vm2874_vm5, 1.0, %v6625_v15  ;;  %vm2875_vm6 = vcmp.lt.s32.totalorder %v2843_v62, 512  ;;  %v2845_v17 = vadd.s32 %v4784_v9, %v2812_v46 }
 0x2ee   : > { %vm2876_vm7 = vcmp.lt.s32.totalorder %v2844_v38, 512  ;;  %v3194_v55 = vsel %vm944_vm1, %v3138_v3, 0.0  ;;  %v3140_v19 = vmul.f32 %v5626_v42, %v5405_v43  ;;  %v3141_v25 = vmul.f32 %v5629_v57, %v5433_v26 }
 0x2ef   : > { %v3187_v39 = vadd.f32 %v3186_v37, %v3185_v54  ;;  %v3196_v54 = vsel %vm944_vm1, %v3139_v2, 0.0  ;;  %v5639_v37 = vsel %vm2875_vm6, 1.0, %v6625_v15  ;;  %vm2877_vm8 = vcmp.lt.s32.totalorder %v2845_v17, 512 }
 0x2f0   : > { %v3198_v8 = vsel %vm944_vm1, %v3140_v19, 0.0  ;;  %v3142_v43 = vmul.f32 %v5639_v37, %v5444_v13  ;;  %v5651_v62 = vsel %vm2877_vm8, 1.0, %v6625_v15  ;;  %vm3214_vm9 = vcmask 516096  }
 0x2f1   : > { %v3189_v21 = vadd.f32 %v3188_v32, %v3187_v39  ;;  %v5642_v32 = vsel %vm2876_vm7, 1.0, %v6625_v15  ;;  %v3200_v39 = vsel %vm944_vm1, %v3141_v25, 0.0 }
 0x2f2   : > { %v3143_v26 = vmul.f32 %v5642_v32, %v5467_v28 }
 0x2f3   : > { %v3191_v36 = vadd.f32 %v3190_v58, %v3189_v21  ;;  %v3202_v21 = vsel %vm944_vm1, %v3142_v43, 0.0  ;;  %v3144_v58 = vmul.f32 %v5651_v62, %v5481_v14 }
 0x2f5   : > { %v3193_v56 = vadd.f32 %v3192_v29, %v3191_v36  ;;  %v3204_v29 = vsel %vm944_vm1, %v3143_v26, 0.0  ;;  %v3206_v13 = vsel %vm944_vm1, %v3144_v58, 0.0 }
 0x2f7   : > { %v3195_v27 = vadd.f32 %v3194_v55, %v3193_v56 }
 0x2f9   : > { %v3197_v9 = vadd.f32 %v3196_v54, %v3195_v27 }
 0x2fb   : > { %v3199_v46 = vadd.f32 %v3198_v8, %v3197_v9 }
 0x2fd   : > { %v3201_v38 = vadd.f32 %v3200_v39, %v3199_v46 }
 0x2ff   : > { %v3203_v3 = vadd.f32 %v3202_v21, %v3201_v38 }
 0x301   : > { %v3205_v2 = vadd.f32 %v3204_v29, %v3203_v3 }
 0x303   : > { %v3207_v36 = vadd.f32 %v3206_v13, %v3205_v2 }
 0x305   : > { %v3208_v17 = vrot.slane %v3207_v36, 4 }
 0x307   : > { %v3209_v28 = vadd.f32 %v3208_v17, %v3207_v36  ;;  %v6663_v36 = vld [vmem:[#allocation45_spill] sm:$0xff] }
 0x309   : > { %v3210_v56 = vrot.slane %v3209_v28, 2 }
 0x30b   : > { %v3211_v15 = vadd.f32 %v3210_v56, %v3209_v28 }
 0x30d   : > { %v3212_v55 = vrot.slane %v3211_v15, 1 }
 0x30f   : > { %v3213_v54 = vadd.f32 %v3212_v55, %v3211_v15 }
 0x311   : > { %3215 = vst.msk [vmem:[%s5661_s18] sm:$0x1] %vm3214_vm9, %v3213_v54 }
 0x31b   : > { %v1654_v14 = vpop.xlane.xlu1 %1653 }
 0x31c   : > { %vm1746_vm11 = vcmp.eq.f32.partialorder %v4881_v4, %v1654_v14  ;;  %v6664_v14 = vld [vmem:[#allocation46_spill] sm:$0xff] }
 0x31d   : > { %v1778_v19 = vsel %vm1746_vm11, %v6607_v51, 64  ;;  %v1651_v25 = vpop.xlane.xlu0 %1650 }
 0x31e   : > { %v5667_v27 = vsel %vm944_vm1, %v1778_v19, 2147483647  ;;  %vm1745_vm12 = vcmp.eq.f32.partialorder %v4897_v61, %v1651_v25  ;;  %v6662_v61 = vld [vmem:[#allocation43_spill] sm:$0xff] }
 0x31f   : > { %v1826_v9 = vshra.s32 %v5667_v27, 16  ;;  %v1777_v8 = vsel %vm1745_vm12, %v6607_v51, 64  ;;  %v1660_v39 = vpop.xlane.xlu1 %1659 }
 0x320   : > { %v5673_v43 = vsel %vm944_vm1, %v1777_v8, 2147483647  ;;  %vm1748_vm13 = vcmp.eq.f32.partialorder %v4916_v60, %v1660_v39  ;;  %v6665_v8 = vld [vmem:[#allocation47_spill] sm:$0xff] }
 0x321   : > { %v1811_v4 = vshra.s32 %v5673_v43, 16  ;;  %v1780_v26 = vsel %vm1748_vm13, %v6607_v51, 64  ;;  %v1657_v46 = vpop.xlane.xlu0 %1656  ;;  %v5678_v38 = vcvt.s32.f32 %v1826_v9 }
 0x322   : > { %v5681_v21 = vsel %vm944_vm1, %v1780_v26, 2147483647  ;;  %vm1747_vm14 = vcmp.eq.f32.partialorder %v6662_v61, %v1657_v46 }
 0x323   : > { %v1856_v58 = vshra.s32 %v5681_v21, 16  ;;  %v1779_v29 = vsel %vm1747_vm14, %v6607_v51, 64  ;;  %1829 = vmin.xlane.f32.xlu1 %v5678_v38  ;;  %v5687_v3 = vcvt.s32.f32 %v1811_v4  ;;  %v1666_v2 = vpop.xlane.xlu1 %1665 }
 0x324   : > { %v5690_v60 = vsel %vm944_vm1, %v1779_v29, 2147483647  ;;  %vm1750_vm15 = vcmp.eq.f32.partialorder %v6663_v36, %v1666_v2 }
 0x325   : > { %v1841_v13 = vshra.s32 %v5690_v60, 16  ;;  %1814 = vmin.xlane.f32.xlu0 %v5687_v3  ;;  %v5695_v17 = vcvt.s32.f32 %v1856_v58  ;;  %v1782_v28 = vsel %vm1750_vm15, %v6607_v51, 64  ;;  %v1663_v15 = vpop.xlane.xlu0 %1662  ;;  %v6666_v58 = vld [vmem:[#allocation37_spill] sm:$0xff] }
 0x326   : > { %v5699_v56 = vsel %vm944_vm1, %v1782_v28, 2147483647  ;;  %vm1749_vm2 = vcmp.eq.f32.partialorder %v6664_v14, %v1663_v15  ;;  %v6667_v15 = vld [vmem:[#allocation5_spill] sm:$0xff] }
 0x327   : > { %1859 = vmin.xlane.f32.xlu1 %v5695_v17  ;;  %v5702_v55 = vcvt.s32.f32 %v1841_v13  ;;  %v1886_v54 = vshra.s32 %v5699_v56, 16  ;;  %v1781_v19 = vsel %vm1749_vm2, %v6607_v51, 64  ;;  %v1672_v25 = vpop.xlane.xlu1 %1671 }
 0x328   : > { %v5709_v9 = vsel %vm944_vm1, %v1781_v19, 2147483647  ;;  %vm1752_vm3 = vcmp.eq.f32.partialorder %v6665_v8, %v1672_v25 }
 0x329   : > { %1844 = vmin.xlane.f32.xlu0 %v5702_v55  ;;  %v5712_v39 = vcvt.s32.f32 %v1886_v54  ;;  %v1871_v4 = vshra.s32 %v5709_v9, 16  ;;  %v1784_v26 = vsel %vm1752_vm3, %v6607_v51, 64  ;;  %v1669_v46 = vpop.xlane.xlu0 %1668 }
 0x32a   : > { %v5717_v61 = vsel %vm944_vm1, %v1784_v26, 2147483647  ;;  %vm1751_vm4 = vcmp.eq.f32.partialorder %v6666_v58, %v1669_v46  ;;  %v6670_v26 = vld [vmem:[#allocation6_spill] sm:$0xff] }
 0x32b   : > { %1889 = vmin.xlane.f32.xlu1 %v5712_v39  ;;  %v1916_v29 = vshra.s32 %v5717_v61, 16  ;;  %v1783_v2 = vsel %vm1751_vm4, %v6607_v51, 64  ;;  %v1678_v13 = vpop.xlane.xlu1 %1677  ;;  %v5723_v36 = vcvt.s32.f32 %v1871_v4 }
 0x32c   : > { %v5726_v28 = vsel %vm944_vm1, %v1783_v2, 2147483647  ;;  %vm1754_vm5 = vcmp.eq.f32.partialorder %v6667_v15, %v1678_v13  ;;  %v6673_v15 = vld [vmem:[#allocation7_spill] sm:$0xff] }
 0x32d   : > { %v1901_v54 = vshra.s32 %v5726_v28, 16  ;;  %v1786_v14 = vsel %vm1754_vm5, %v6607_v51, 64  ;;  %1874 = vmin.xlane.f32.xlu0 %v5723_v36  ;;  %v5732_v25 = vcvt.s32.f32 %v1916_v29 }
 0x32e   : > { %v1675_v19 = vpop.xlane.xlu0 %1674  ;;  %v5735_v8 = vsel %vm944_vm1, %v1786_v14, 2147483647 }
 0x32f   : > { %6668 = vst [vmem:[#allocation19_spill] sm:$0xff] %v5732_v25  ;;  %6669 = vst [vmem:[#allocation20_spill] sm:$0xff] %v5735_v8  ;;  %vm1753_vm6 = vcmp.eq.f32.partialorder %v6670_v26, %v1675_v19  ;;  %v1946_v4 = vshra.s32 %v5735_v8, 16  ;;  %1919 = vmin.xlane.f32.xlu1 %v5732_v25  ;;  %v5741_v2 = vcvt.s32.f32 %v1901_v54  ;;  %v6676_v25 = vld [vmem:[#allocation8_spill] sm:$0xff] }
 0x330   : > { %v1785_v46 = vsel %vm1753_vm6, %v6607_v51, 64  ;;  %v1684_v58 = vpop.xlane.xlu1 %1683 }
 0x331   : > { %6671 = vst [vmem:[#allocation21_spill] sm:$0xff] %v5741_v2  ;;  %v5744_v13 = vsel %vm944_vm1, %v1785_v46, 2147483647  ;;  %vm1756_vm7 = vcmp.eq.f32.partialorder %v6673_v15, %v1684_v58  ;;  %1904 = vmin.xlane.f32.xlu0 %v5741_v2  ;;  %v5750_v26 = vcvt.s32.f32 %v1946_v4  ;;  %v6679_v2 = vld [vmem:[#allocation9_spill] sm:$0xff] }
 0x332   : > { %6672 = vst [vmem:[#allocation22_spill] sm:$0xff] %v5744_v13  ;;  %v1931_v29 = vshra.s32 %v5744_v13, 16  ;;  %v1788_v14 = vsel %vm1756_vm7, %v6607_v51, 64  ;;  %v1681_v19 = vpop.xlane.xlu0 %1680 }
 0x333   : > { %6674 = vst [vmem:[#allocation23_spill] sm:$0xff] %v5750_v26  ;;  %v5753_v8 = vsel %vm944_vm1, %v1788_v14, 2147483647  ;;  %vm1755_vm8 = vcmp.eq.f32.partialorder %v6676_v25, %v1681_v19  ;;  %1949 = vmin.xlane.f32.xlu1 %v5750_v26  ;;  %v6682_v26 = vld [vmem:[#allocation10_spill] sm:$0xff] }
 0x334   : > { %6675 = vst [vmem:[#allocation24_spill] sm:$0xff] %v5753_v8  ;;  %v1976_v54 = vshra.s32 %v5753_v8, 16  ;;  %v1787_v46 = vsel %vm1755_vm8, %v6607_v51, 64  ;;  %v1690_v58 = vpop.xlane.xlu1 %1689  ;;  %v5759_v15 = vcvt.s32.f32 %v1931_v29 }
 0x335   : > { %v5762_v13 = vsel %vm944_vm1, %v1787_v46, 2147483647  ;;  %vm1758_vm9 = vcmp.eq.f32.partialorder %v6679_v2, %v1690_v58 }
 0x336   : > { %6677 = vst [vmem:[#allocation25_spill] sm:$0xff] %v5759_v15  ;;  %6678 = vst [vmem:[#allocation26_spill] sm:$0xff] %v5762_v13  ;;  %v1961_v4 = vshra.s32 %v5762_v13, 16  ;;  %v1790_v14 = vsel %vm1758_vm9, %v6607_v51, 64  ;;  %1934 = vmin.xlane.f32.xlu0 %v5759_v15  ;;  %v1687_v25 = vpop.xlane.xlu0 %1686  ;;  %v5768_v19 = vcvt.s32.f32 %v1976_v54  ;;  %v6685_v15 = vld [vmem:[#allocation11_spill] sm:$0xff] }
 0x337   : > { %v5771_v8 = vsel %vm944_vm1, %v1790_v14, 2147483647  ;;  %vm1757_vm11 = vcmp.eq.f32.partialorder %v6682_v26, %v1687_v25 }
 0x338   : > { %6680 = vst [vmem:[#allocation27_spill] sm:$0xff] %v5768_v19  ;;  %6681 = vst [vmem:[#allocation28_spill] sm:$0xff] %v5771_v8  ;;  %v2006_v29 = vshra.s32 %v5771_v8, 16  ;;  %v1789_v46 = vsel %vm1757_vm11, %v6607_v51, 64  ;;  %1979 = vmin.xlane.f32.xlu1 %v5768_v19  ;;  %v1696_v2 = vpop.xlane.xlu1 %1695  ;;  %v5777_v58 = vcvt.s32.f32 %v1961_v4  ;;  %v6688_v19 = vld [vmem:[#allocation12_spill] sm:$0xff] }
 0x339   : > { %v5780_v13 = vsel %vm944_vm1, %v1789_v46, 2147483647  ;;  %vm1760_vm12 = vcmp.eq.f32.partialorder %v6685_v15, %v1696_v2 }
 0x33a   : > { %6683 = vst [vmem:[#allocation29_spill] sm:$0xff] %v5777_v58  ;;  %6684 = vst [vmem:[#allocation30_spill] sm:$0xff] %v5780_v13  ;;  %v1991_v54 = vshra.s32 %v5780_v13, 16  ;;  %v1792_v14 = vsel %vm1760_vm12, %v6607_v51, 64  ;;  %1964 = vmin.xlane.f32.xlu0 %v5777_v58  ;;  %v1693_v26 = vpop.xlane.xlu0 %1692  ;;  %v5786_v25 = vcvt.s32.f32 %v2006_v29  ;;  %v6690_v58 = vld [vmem:[#allocation13_spill] sm:$0xff] }
 0x33b   : > { %v5789_v8 = vsel %vm944_vm1, %v1792_v14, 2147483647  ;;  %vm1759_vm13 = vcmp.eq.f32.partialorder %v6688_v19, %v1693_v26 }
 0x33c   : > { %6686 = vst [vmem:[#allocation31_spill] sm:$0xff] %v5786_v25  ;;  %6687 = vst [vmem:[#allocation32_spill] sm:$0xff] %v5789_v8  ;;  %v2036_v4 = vshra.s32 %v5789_v8, 16  ;;  %v1791_v46 = vsel %vm1759_vm13, %v6607_v51, 64  ;;  %2009 = vmin.xlane.f32.xlu1 %v5786_v25  ;;  %v1702_v15 = vpop.xlane.xlu1 %1701  ;;  %v5795_v2 = vcvt.s32.f32 %v1991_v54  ;;  %v6693_v25 = vld [vmem:[#allocation14_spill] sm:$0xff] }
 0x33d   : > { %v5798_v13 = vsel %vm944_vm1, %v1791_v46, 2147483647  ;;  %vm1762_vm14 = vcmp.eq.f32.partialorder %v6690_v58, %v1702_v15 }
 0x33e   : > { %6689 = vst [vmem:[#allocation33_spill] sm:$0xff] %v5798_v13  ;;  %v2021_v29 = vshra.s32 %v5798_v13, 16  ;;  %v1794_v14 = vsel %vm1762_vm14, %v6607_v51, 64  ;;  %1994 = vmin.xlane.f32.xlu0 %v5795_v2  ;;  %v1699_v19 = vpop.xlane.xlu0 %1698  ;;  %v5804_v26 = vcvt.s32.f32 %v2036_v4 }
 0x33f   : > { %v5807_v8 = vsel %vm944_vm1, %v1794_v14, 2147483647  ;;  %vm1761_vm15 = vcmp.eq.f32.partialorder %v6693_v25, %v1699_v19 }
 0x340   : > { %6691 = vst [vmem:[#allocation34_spill] sm:$0xff] %v5804_v26  ;;  %6692 = vst [vmem:[#allocation35_spill] sm:$0xff] %v5807_v8  ;;  %v2066_v54 = vshra.s32 %v5807_v8, 16  ;;  %v1793_v46 = vsel %vm1761_vm15, %v6607_v51, 64  ;;  %2039 = vmin.xlane.f32.xlu1 %v5804_v26  ;;  %v1708_v58 = vpop.xlane.xlu1 %1707  ;;  %v5813_v15 = vcvt.s32.f32 %v2021_v29  ;;  %v6696_v26 = vld [vmem:[#allocation15_spill] sm:$0xff] }
 0x341   : > { %v5816_v13 = vsel %vm944_vm1, %v1793_v46, 2147483647  ;;  %vm1764_vm2 = vcmp.eq.f32.partialorder %v5234_v41, %v1708_v58 }
 0x342   : > { %6694 = vst [vmem:[#allocation36_spill] sm:$0xff] %v5816_v13  ;;  %v2051_v4 = vshra.s32 %v5816_v13, 16  ;;  %v1796_v14 = vsel %vm1764_vm2, %v6607_v51, 64  ;;  %2024 = vmin.xlane.f32.xlu0 %v5813_v15  ;;  %v1705_v25 = vpop.xlane.xlu0 %1704  ;;  %v5822_v19 = vcvt.s32.f32 %v2066_v54 }
 0x343   : > { %v5825_v8 = vsel %vm944_vm1, %v1796_v14, 2147483647  ;;  %vm1763_vm3 = vcmp.eq.f32.partialorder %v6696_v26, %v1705_v25 }
 0x344   : > { %6695 = vst [vmem:[#allocation43_spill] sm:$0xff] %v5825_v8  ;;  %v2096_v29 = vshra.s32 %v5825_v8, 16  ;;  %v1795_v46 = vsel %vm1763_vm3, %v6607_v51, 64  ;;  %2069 = vmin.xlane.f32.xlu1 %v5822_v19  ;;  %v1714_v41 = vpop.xlane.xlu1 %1713  ;;  %v5831_v58 = vcvt.s32.f32 %v2051_v4 }
 0x345   : > { %v5834_v13 = vsel %vm944_vm1, %v1795_v46, 2147483647  ;;  %vm1766_vm4 = vcmp.eq.f32.partialorder %v5273_v11, %v1714_v41 }
 0x346   : > { %6697 = vst [vmem:[#allocation45_spill] sm:$0xff] %v5831_v58  ;;  %6698 = vst [vmem:[#allocation46_spill] sm:$0xff] %v5834_v13  ;;  %v2081_v54 = vshra.s32 %v5834_v13, 16  ;;  %v1798_v14 = vsel %vm1766_vm4, %v6607_v51, 64  ;;  %2054 = vmin.xlane.f32.xlu0 %v5831_v58  ;;  %v5840_v25 = vcvt.s32.f32 %v2096_v29  ;;  %v6702_v58 = vld [vmem:[#allocation16_spill] sm:$0xff] }
 0x347   : > { %v1711_v26 = vpop.xlane.xlu0 %1710  ;;  %v5843_v8 = vsel %vm944_vm1, %v1798_v14, 2147483647 }
 0x348   : > { %6699 = vst [vmem:[#allocation47_spill] sm:$0xff] %v5840_v25  ;;  %6700 = vst [vmem:[#allocation37_spill] sm:$0xff] %v5843_v8  ;;  %vm1765_vm5 = vcmp.eq.f32.partialorder %v5300_v12, %v1711_v26  ;;  %v2126_v4 = vshra.s32 %v5843_v8, 16  ;;  %2099 = vmin.xlane.f32.xlu1 %v5840_v25  ;;  %v1720_v11 = vpop.xlane.xlu1 %1719  ;;  %v5849_v41 = vcvt.s32.f32 %v2081_v54  ;;  %v6705_v25 = vld [vmem:[#allocation17_spill] sm:$0xff] }
 0x349   : > { %v1797_v46 = vsel %vm1765_vm5, %v6607_v51, 64  ;;  %vm1768_vm6 = vcmp.eq.f32.partialorder %v6702_v58, %v1720_v11 }
 0x34a   : > { %v5852_v13 = vsel %vm944_vm1, %v1797_v46, 2147483647  ;;  %v1800_v14 = vsel %vm1768_vm6, %v6607_v51, 64  ;;  %2084 = vmin.xlane.f32.xlu0 %v5849_v41  ;;  %v5858_v26 = vcvt.s32.f32 %v2126_v4 }
 0x34b   : > { %6701 = vst [vmem:[#allocation5_spill] sm:$0xff] %v5852_v13  ;;  %v2111_v29 = vshra.s32 %v5852_v13, 16  ;;  %v1717_v12 = vpop.xlane.xlu0 %1716  ;;  %v5861_v8 = vsel %vm944_vm1, %v1800_v14, 2147483647 }
 0x34c   : > { %6703 = vst [vmem:[#allocation6_spill] sm:$0xff] %v5858_v26  ;;  %6704 = vst [vmem:[#allocation7_spill] sm:$0xff] %v5861_v8  ;;  %vm1767_vm7 = vcmp.eq.f32.partialorder %v6705_v25, %v1717_v12  ;;  %v2156_v54 = vshra.s32 %v5861_v8, 16  ;;  %2129 = vmin.xlane.f32.xlu1 %v5858_v26  ;;  %v1726_v58 = vpop.xlane.xlu1 %1725 }
 0x34d   : > { %v1799_v46 = vsel %vm1767_vm7, %v6607_v51, 64  ;;  %v5867_v11 = vcvt.s32.f32 %v2111_v29  ;;  %vm1770_vm8 = vcmp.eq.f32.partialorder %v5349_v30, %v1726_v58 }
 0x34e   : > { %v5870_v13 = vsel %vm944_vm1, %v1799_v46, 2147483647  ;;  %v1802_v14 = vsel %vm1770_vm8, %v6607_v51, 64  ;;  %v5876_v12 = vcvt.s32.f32 %v2156_v54 }
 0x34f   : > { %6706 = vst [vmem:[#allocation8_spill] sm:$0xff] %v5867_v11  ;;  %6707 = vst [vmem:[#allocation9_spill] sm:$0xff] %v5870_v13  ;;  %v2141_v4 = vshra.s32 %v5870_v13, 16  ;;  %2114 = vmin.xlane.f32.xlu0 %v5867_v11  ;;  %v1723_v25 = vpop.xlane.xlu0 %1722  ;;  %v5879_v26 = vsel %vm944_vm1, %v1802_v14, 2147483647 }
 0x350   : > { %6708 = vst [vmem:[#allocation10_spill] sm:$0xff] %v5876_v12  ;;  %6709 = vst [vmem:[#allocation11_spill] sm:$0xff] %v5879_v26  ;;  %vm1769_vm9 = vcmp.eq.f32.partialorder %v5370_v6, %v1723_v25  ;;  %v2186_v29 = vshra.s32 %v5879_v26, 16  ;;  %2159 = vmin.xlane.f32.xlu1 %v5876_v12  ;;  %v1732_v30 = vpop.xlane.xlu1 %1731 }
 0x351   : > { %v1801_v46 = vsel %vm1769_vm9, %v6607_v51, 64  ;;  %v5885_v58 = vcvt.s32.f32 %v2141_v4  ;;  %vm1772_vm11 = vcmp.eq.f32.partialorder %v5383_v18, %v1732_v30 }
 0x352   : > { %v5888_v13 = vsel %vm944_vm1, %v1801_v46, 2147483647  ;;  %v1804_v54 = vsel %vm1772_vm11, %v6607_v51, 64  ;;  %v5900_v14 = vcvt.s32.f32 %v2186_v29 }
 0x353   : > { %6710 = vst [vmem:[#allocation12_spill] sm:$0xff] %v5885_v58  ;;  %6711 = vst [vmem:[#allocation13_spill] sm:$0xff] %v5888_v13  ;;  %v2171_v6 = vshra.s32 %v5888_v13, 16  ;;  %2144 = vmin.xlane.f32.xlu0 %v5885_v58  ;;  %v1729_v4 = vpop.xlane.xlu0 %1728  ;;  %v5903_v25 = vsel %vm944_vm1, %v1804_v54, 2147483647  ;;  %v3810_v58 = vld [vmem:[%s4018_s13 + $0x8] sm:$0xff] }
 0x354   : > { %6712 = vst [vmem:[#allocation14_spill] sm:$0xff] %v5900_v14  ;;  %6713 = vst [vmem:[#allocation15_spill] sm:$0xff] %v5903_v25  ;;  %vm1771_vm12 = vcmp.eq.f32.partialorder %v5408_v1, %v1729_v4  ;;  %v3706_v18 = vpop.f32.mrf.mxu0  ;;  %v2216_v46 = vshra.s32 %v5903_v25, 16  ;;  %2189 = vmin.xlane.f32.xlu1 %v5900_v14  ;;  %v1738_v13 = vpop.xlane.xlu1 %1737 }
 0x355   : > { %v1803_v30 = vsel %vm1771_vm12, %v6607_v51, 64  ;;  %2683 = vst.msk [vmem:[%s5895_s21 + $0x8] sm:$0xff] %vm389_vm0, %v3706_v18  ;;  %v2943_v29 = vsub.f32 %v3706_v18, %v3810_v58  ;;  %vm1774_vm13 = vcmp.eq.f32.partialorder %v5421_v50, %v1738_v13  ;;  %v5916_v1 = vcvt.s32.f32 %v2171_v6  ;;  %v3811_v50 = vld [vmem:[%s4018_s13] sm:$0xff] }
 0x356   : > { %v5913_v12 = vsel %vm944_vm1, %v1803_v30, 2147483647  ;;  %v2523_v54 = vpop.f32.mrf.mxu0  ;;  %v1806_v25 = vsel %vm1774_vm13, %v6607_v51, 64  ;;  %v5928_v6 = vcvt.s32.f32 %v2216_v46 }
 0x357   : > { %6714 = vst [vmem:[#allocation16_spill] sm:$0xff] %v5913_v12  ;;  %6715 = vst [vmem:[#allocation17_spill] sm:$0xff] %v5916_v1  ;;  %v2201_v4 = vshra.s32 %v5913_v12, 16  ;;  %v2975_v14 = vmul.f32 %v2943_v29, %v2943_v29  ;;  %v1735_v26 = vpop.xlane.xlu0 %1734  ;;  %v5923_v58 = vsel %vm944_vm1, %v1806_v25, 2147483647  ;;  %2174 = vmin.xlane.f32.xlu0 %v5916_v1  ;;  %v2942_v13 = vsub.f32 %v2523_v54, %v3811_v50 }
 0x358   : > { %2682 = vst.msk [vmem:[%s5895_s21] sm:$0xff] %vm389_vm0, %v2523_v54  ;;  %6716 = vst [vmem:[#allocation48_spill] sm:$0xff] %v5923_v58  ;;  %vm1773_vm14 = vcmp.eq.f32.partialorder %v5436_v22, %v1735_v26  ;;  %v3709_v18 = vpop.f32.mrf.mxu1  ;;  %v2246_v30 = vshra.s32 %v5923_v58, 16  ;;  %v1744_v12 = vpop.xlane.xlu1 %1743  ;;  %2219 = vmin.xlane.f32.xlu1 %v5928_v6  ;;  %v3812_v22 = vld [vmem:[%s4018_s13 + $0x18] sm:$0xff]  ;;  %v6719_v54 = vld [vmem:[#allocation38_spill] sm:$0xff] }
 0x359   : > { %6717 = vst [vmem:[#allocation49_spill] sm:$0xff] %v5928_v6  ;;  %v1805_v29 = vsel %vm1773_vm14, %v6607_v51, 64  ;;  %2685 = vst.msk [vmem:[%s5895_s21 + $0x18] sm:$0xff] %vm389_vm0, %v3709_v18  ;;  %v2974_v11 = vmul.f32 %v2942_v13, %v2942_v13  ;;  %vm1776_vm15 = vcmp.eq.f32.partialorder %v5458_v0, %v1744_v12  ;;  %v2945_v26 = vsub.f32 %v3709_v18, %v3812_v22 }
 0x35a   : > { %v5935_v25 = vsel %vm944_vm1, %v1805_v29, 2147483647  ;;  %v2533_v46 = vpop.f32.mrf.mxu1  ;;  %v3007_v50 = vmul.f32 %v6719_v54, %v2975_v14  ;;  %v1808_v1 = vsel %vm1776_vm15, %v6607_v51, 64  ;;  %v6720_v29 = vld [vmem:[#allocation40_spill] sm:$0xff]  ;;  %v5949_v12 = vcvt.s32.f32 %v2201_v4  ;;  %v3813_v14 = vld [vmem:[%s4018_s13 + $0x10] sm:$0xff] }
 0x35b   : > { %6718 = vst [vmem:[#allocation50_spill] sm:$0xff] %v5935_v25  ;;  %v2231_v58 = vshra.s32 %v5935_v25, 16  ;;  %v1741_v8 = vpop.xlane.xlu0 %1740  ;;  %2684 = vst.msk [vmem:[%s5895_s21 + $0x10] sm:$0xff] %vm389_vm0, %v2533_v46  ;;  %v3006_v13 = vmul.f32 %v6720_v29, %v2974_v11  ;;  %v5947_v6 = vsel %vm944_vm1, %v1808_v1, 2147483647  ;;  %v2977_v0 = vmul.f32 %v2945_v26, %v2945_v26 }
 0x35c   : > { %6721 = vst [vmem:[#allocation38_spill] sm:$0xff] %v5947_v6  ;;  %6722 = vst [vmem:[#allocation40_spill] sm:$0xff] %v5949_v12  ;;  %v2276_v18 = vshra.s32 %v5947_v6, 16  ;;  %vm1775_vm2 = vcmp.eq.f32.partialorder %v5474_v63, %v1741_v8  ;;  %v2944_v22 = vsub.f32 %v2533_v46, %v3813_v14  ;;  %v3712_v54 = vpop.f32.mrf.mxu1  ;;  %2204 = vmin.xlane.f32.xlu0 %v5949_v12  ;;  %v5956_v11 = vcvt.s32.f32 %v2246_v30  ;;  %v3814_v63 = vld [vmem:[%s4018_s13 + $0x28] sm:$0xff] }
 0x35d   : > { %v1807_v25 = vsel %vm1775_vm2, %v6607_v51, 64  ;;  %2687 = vst.msk [vmem:[%s5895_s21 + $0x28] sm:$0xff] %vm389_vm0, %v3712_v54  ;;  %v3038_v1 = vsel %vm389_vm0, %v3006_v13, 0.0  ;;  %v2947_v8 = vsub.f32 %v3712_v54, %v3814_v63  ;;  %v3039_v29 = vsel %vm389_vm0, %v3007_v50, 0.0  ;;  %v3815_v54 = vld [vmem:[%s4018_s13 + $0x20] sm:$0xff] }
 0x35e   : > { %v5962_v4 = vsel %vm944_vm1, %v1807_v25, 2147483647  ;;  %v2976_v26 = vmul.f32 %v2944_v22, %v2944_v22  ;;  %v2543_v46 = vpop.f32.mrf.mxu1  ;;  %v3009_v51 = vmul.f32 %v4835_v53, %v2977_v0  ;;  %2249 = vmin.xlane.f32.xlu1 %v5956_v11  ;;  %v5969_v14 = vcvt.s32.f32 %v2231_v58  ;;  %v6724_v25 = vld [vmem:[#allocation39_spill] sm:$0xff] }
 0x35f   : > { %6723 = vst [vmem:[#allocation51_spill] sm:$0xff] %v5962_v4  ;;  %v2261_v30 = vshra.s32 %v5962_v4, 16  ;;  %2686 = vst.msk [vmem:[%s5895_s21 + $0x20] sm:$0xff] %vm389_vm0, %v2543_v46  ;;  %v2979_v22 = vmul.f32 %v2947_v8, %v2947_v8  ;;  %v2946_v63 = vsub.f32 %v2543_v46, %v3815_v54  ;;  %v5975_v6 = vcvt.s32.f32 %v2276_v18  ;;  %v3816_v53 = vld [vmem:[%s4018_s13 + $0x38] sm:$0xff]  ;;  %v3817_v18 = vld [vmem:[%s4018_s13 + $0x30] sm:$0xff] }
 0x360   : > { %v3008_v13 = vmul.f32 %v6724_v25, %v2976_v26  ;;  %v3715_v50 = vpop.f32.mrf.mxu1  ;;  %v3040_v12 = vadd.f32 %v3039_v29, %v3038_v1  ;;  %2234 = vmin.xlane.f32.xlu0 %v5969_v14  ;;  %v3043_v46 = vsel %vm389_vm0, %v3009_v51, 0.0 }
 0x361   : > { %2689 = vst.msk [vmem:[%s5895_s21 + $0x38] sm:$0xff] %vm389_vm0, %v3715_v50  ;;  %v2949_v58 = vsub.f32 %v3715_v50, %v3816_v53  ;;  %v5981_v0 = vcvt.s32.f32 %v2261_v30  ;;  %v2978_v26 = vmul.f32 %v2946_v63, %v2946_v63  ;;  %v3011_v29 = vmul.f32 %v4863_v5, %v2979_v22  ;;  %v6726_v5 = vld [vmem:[#allocation42_spill] sm:$0xff] }
 0x362   : > { %v3041_v4 = vsel %vm389_vm0, %v3008_v13, 0.0  ;;  %v2553_v8 = vpop.f32.mrf.mxu1  ;;  %2279 = vmin.xlane.f32.xlu1 %v5975_v6 }
 0x363   : > { %6725 = vst [vmem:[#allocation39_spill] sm:$0xff] %v5981_v0  ;;  %v3042_v25 = vadd.f32 %v3041_v4, %v3040_v12  ;;  %2688 = vst.msk [vmem:[%s5895_s21 + $0x30] sm:$0xff] %vm389_vm0, %v2553_v8  ;;  %v2948_v1 = vsub.f32 %v2553_v8, %v3817_v18  ;;  %v3010_v30 = vmul.f32 %v4860_v59, %v2978_v26  ;;  %v3818_v4 = vld [vmem:[%s4018_s13 + $0x48] sm:$0xff]  ;;  %v3047_v59 = vsel %vm389_vm0, %v3011_v29, 0.0  ;;  %v3819_v18 = vld [vmem:[%s4018_s13 + $0x40] sm:$0xff] }
 0x364   : > { %v2981_v54 = vmul.f32 %v2949_v58, %v2949_v58  ;;  %v3718_v13 = vpop.f32.mrf.mxu1  ;;  %2264 = vmin.xlane.f32.xlu0 %v5981_v0  ;;  %v6727_v58 = vld [vmem:[#allocation41_spill] sm:$0xff]  ;;  %v3821_v29 = vld [vmem:[%s4018_s13 + $0x50] sm:$0xff] }
 0x365   : > { %v3044_v63 = vadd.f32 %v3043_v46, %v3042_v25  ;;  %v2980_v12 = vmul.f32 %v2948_v1, %v2948_v1  ;;  %2691 = vst.msk [vmem:[%s5895_s21 + $0x48] sm:$0xff] %vm389_vm0, %v3718_v13  ;;  %v2951_v50 = vsub.f32 %v3718_v13, %v3818_v4  ;;  %v3045_v53 = vsel %vm389_vm0, %v3010_v30, 0.0  ;;  %v3820_v30 = vld [vmem:[%s4018_s13 + $0x58] sm:$0xff] }
 0x366   : > { %v2563_v51 = vpop.f32.mrf.mxu1  ;;  %v3013_v26 = vmul.f32 %v6727_v58, %v2981_v54 }
 0x367   : > { %v3046_v8 = vadd.f32 %v3045_v53, %v3044_v63  ;;  %v3012_v22 = vmul.f32 %v6726_v5, %v2980_v12  ;;  %2690 = vst.msk [vmem:[%s5895_s21 + $0x40] sm:$0xff] %vm389_vm0, %v2563_v51  ;;  %v2983_v25 = vmul.f32 %v2951_v50, %v2951_v50  ;;  %v2950_v1 = vsub.f32 %v2563_v51, %v3819_v18 }
 0x368   : > { %v3721_v46 = vpop.f32.mrf.mxu1  ;;  %v3051_v50 = vsel %vm389_vm0, %v3013_v26, 0.0 }
 0x369   : > { %v3048_v0 = vadd.f32 %v3047_v59, %v3046_v8  ;;  %v3049_v13 = vsel %vm389_vm0, %v3012_v22, 0.0  ;;  %2693 = vst.msk [vmem:[%s5895_s21 + $0x58] sm:$0xff] %vm389_vm0, %v3721_v46  ;;  %v2953_v63 = vsub.f32 %v3721_v46, %v3820_v30  ;;  %v2982_v12 = vmul.f32 %v2950_v1, %v2950_v1  ;;  %v6728_v8 = vld [vmem:[#allocation44_spill] sm:$0xff] }
 0x36a   : > { %v2573_v4 = vpop.f32.mrf.mxu1  ;;  %v3015_v51 = vmul.f32 %v4952_v33, %v2983_v25 }
 0x36b   : > { %v3050_v53 = vadd.f32 %v3049_v13, %v3048_v0  ;;  %2692 = vst.msk [vmem:[%s5895_s21 + $0x50] sm:$0xff] %vm389_vm0, %v2573_v4  ;;  %v2952_v54 = vsub.f32 %v2573_v4, %v3821_v29  ;;  %v3014_v5 = vmul.f32 %v6728_v8, %v2982_v12  ;;  %v2985_v22 = vmul.f32 %v2953_v63, %v2953_v63  ;;  %v3822_v0 = vld [vmem:[%s4018_s13 + $0x68] sm:$0xff]  ;;  %v3823_v12 = vld [vmem:[%s4018_s13 + $0x60] sm:$0xff] }
 0x36c   : > { %v3724_v59 = vpop.f32.mrf.mxu1  ;;  %v3055_v33 = vsel %vm389_vm0, %v3015_v51, 0.0  ;;  %v3825_v51 = vld [vmem:[%s4018_s13 + $0x70] sm:$0xff] }
 0x36d   : > { %v3052_v58 = vadd.f32 %v3051_v50, %v3050_v53  ;;  %v2984_v18 = vmul.f32 %v2952_v54, %v2952_v54  ;;  %2695 = vst.msk [vmem:[%s5895_s21 + $0x68] sm:$0xff] %vm389_vm0, %v3724_v59  ;;  %v2955_v1 = vsub.f32 %v3724_v59, %v3822_v0  ;;  %v3053_v46 = vsel %vm389_vm0, %v3014_v5, 0.0  ;;  %v3824_v50 = vld [vmem:[%s4018_s13 + $0x78] sm:$0xff] }
 0x36e   : > { %v2583_v13 = vpop.f32.mrf.mxu1  ;;  %v3017_v25 = vmul.f32 %v5488_v31, %v2985_v22 }
 0x36f   : > { %v3054_v30 = vadd.f32 %v3053_v46, %v3052_v58  ;;  %v3016_v26 = vmul.f32 %v5087_v20, %v2984_v18  ;;  %2694 = vst.msk [vmem:[%s5895_s21 + $0x60] sm:$0xff] %vm389_vm0, %v2583_v13  ;;  %v2987_v63 = vmul.f32 %v2955_v1, %v2955_v1  ;;  %v2954_v4 = vsub.f32 %v2583_v13, %v3823_v12 }
 0x370   : > { %v3727_v53 = vpop.f32.mrf.mxu1  ;;  %v3059_v22 = vsel %vm389_vm0, %v3017_v25, 0.0  ;;  %v6729_v25 = vld [vmem:[#allocation18_spill] sm:$0xff] }
 0x371   : > { %v3056_v29 = vadd.f32 %v3055_v33, %v3054_v30  ;;  %v3057_v54 = vsel %vm389_vm0, %v3016_v26, 0.0  ;;  %2697 = vst.msk [vmem:[%s5895_s21 + $0x78] sm:$0xff] %vm389_vm0, %v3727_v53  ;;  %v2957_v20 = vsub.f32 %v3727_v53, %v3824_v50  ;;  %v2986_v8 = vmul.f32 %v2954_v4, %v2954_v4  ;;  %v3826_v30 = vld [vmem:[%s4018_s13 + $0x88] sm:$0xff] }
 0x372   : > { %v2593_v5 = vpop.f32.mrf.mxu1  ;;  %v3019_v58 = vmul.f32 %v5509_v23, %v2987_v63 }
 0x373   : > { %v3058_v59 = vadd.f32 %v3057_v54, %v3056_v29  ;;  %2696 = vst.msk [vmem:[%s5895_s21 + $0x70] sm:$0xff] %vm389_vm0, %v2593_v5  ;;  %v2956_v31 = vsub.f32 %v2593_v5, %v3825_v51  ;;  %v3018_v18 = vmul.f32 %v5502_v35, %v2986_v8  ;;  %v2989_v0 = vmul.f32 %v2957_v20, %v2957_v20  ;;  %v3827_v29 = vld [vmem:[%s4018_s13 + $0x80] sm:$0xff]  ;;  %v3828_v5 = vld [vmem:[%s4018_s13 + $0x98] sm:$0xff] }
 0x374   : > { %v3730_v1 = vpop.f32.mrf.mxu1  ;;  %v3063_v35 = vsel %vm389_vm0, %v3019_v58, 0.0  ;;  %v3829_v58 = vld [vmem:[%s4018_s13 + $0x90] sm:$0xff] }
 0x375   : > { %v3060_v46 = vadd.f32 %v3059_v22, %v3058_v59  ;;  %v2988_v13 = vmul.f32 %v2956_v31, %v2956_v31  ;;  %2699 = vst.msk [vmem:[%s5895_s21 + $0x88] sm:$0xff] %vm389_vm0, %v3730_v1  ;;  %v2959_v26 = vsub.f32 %v3730_v1, %v3826_v30  ;;  %v3061_v33 = vsel %vm389_vm0, %v3018_v18, 0.0 }
 0x376   : > { %v2603_v12 = vpop.f32.mrf.mxu1  ;;  %v3021_v23 = vmul.f32 %v5532_v7, %v2989_v0 }
 0x377   : > { %v3062_v4 = vadd.f32 %v3061_v33, %v3060_v46  ;;  %v3020_v53 = vmul.f32 %v6729_v25, %v2988_v13  ;;  %2698 = vst.msk [vmem:[%s5895_s21 + $0x80] sm:$0xff] %vm389_vm0, %v2603_v12  ;;  %v2991_v63 = vmul.f32 %v2959_v26, %v2959_v26  ;;  %v2958_v54 = vsub.f32 %v2603_v12, %v3827_v29  ;;  %v3830_v33 = vld [vmem:[%s4018_s13 + $0xa8] sm:$0xff] }
 0x378   : > { %v3733_v50 = vpop.f32.mrf.mxu1  ;;  %v3067_v18 = vsel %vm389_vm0, %v3021_v23, 0.0 }
 0x379   : > { %v3064_v20 = vadd.f32 %v3063_v35, %v3062_v4  ;;  %v3065_v8 = vsel %vm389_vm0, %v3020_v53, 0.0  ;;  %2701 = vst.msk [vmem:[%s5895_s21 + $0x98] sm:$0xff] %vm389_vm0, %v3733_v50  ;;  %v2961_v59 = vsub.f32 %v3733_v50, %v3828_v5  ;;  %v2990_v51 = vmul.f32 %v2958_v54, %v2958_v54 }
 0x37a   : > { %v2613_v31 = vpop.f32.mrf.mxu1  ;;  %v3023_v0 = vmul.f32 %v5549_v16, %v2991_v63  ;;  %v3831_v63 = vld [vmem:[%s4018_s13 + $0xa0] sm:$0xff] }
 0x37b   : > { %v3066_v22 = vadd.f32 %v3065_v8, %v3064_v20  ;;  %2700 = vst.msk [vmem:[%s5895_s21 + $0x90] sm:$0xff] %vm389_vm0, %v2613_v31  ;;  %v2960_v7 = vsub.f32 %v2613_v31, %v3829_v58  ;;  %v3022_v1 = vmul.f32 %v5535_v49, %v2990_v51  ;;  %v2993_v46 = vmul.f32 %v2961_v59, %v2961_v59  ;;  %v3832_v8 = vld [vmem:[%s4018_s13 + $0xb8] sm:$0xff]  ;;  %v3833_v31 = vld [vmem:[%s4018_s13 + $0xb0] sm:$0xff] }
 0x37c   : > { %v3736_v13 = vpop.f32.mrf.mxu1  ;;  %v3071_v49 = vsel %vm389_vm0, %v3023_v0, 0.0 }
 0x37d   : > { %v3068_v30 = vadd.f32 %v3067_v18, %v3066_v22  ;;  %v2992_v26 = vmul.f32 %v2960_v7, %v2960_v7  ;;  %2703 = vst.msk [vmem:[%s5895_s21 + $0xa8] sm:$0xff] %vm389_vm0, %v3736_v13  ;;  %v2963_v12 = vsub.f32 %v3736_v13, %v3830_v33  ;;  %v3069_v4 = vsel %vm389_vm0, %v3022_v1, 0.0  ;;  %v3834_v13 = vld [vmem:[%s4018_s13 + $0xc8] sm:$0xff] }
 0x37e   : > { %v2623_v25 = vpop.f32.mrf.mxu1  ;;  %v3025_v16 = vmul.f32 %v5564_v44, %v2993_v46 }
 0x37f   : > { %v3070_v53 = vadd.f32 %v3069_v4, %v3068_v30  ;;  %v3024_v35 = vmul.f32 %v5552_v10, %v2992_v26  ;;  %2702 = vst.msk [vmem:[%s5895_s21 + $0xa0] sm:$0xff] %vm389_vm0, %v2623_v25  ;;  %v2995_v23 = vmul.f32 %v2963_v12, %v2963_v12  ;;  %v2962_v29 = vsub.f32 %v2623_v25, %v3831_v63  ;;  %v3836_v63 = vld [vmem:[%s4018_s13 + $0xd8] sm:$0xff] }
 0x380   : > { %v3075_v22 = vsel %vm389_vm0, %v3025_v16, 0.0 }
 0x381   : > { %v3739_v54 = vpop.f32.mrf.mxu1  ;;  %v3072_v50 = vadd.f32 %v3071_v49, %v3070_v53  ;;  %v3073_v20 = vsel %vm389_vm0, %v3024_v35, 0.0  ;;  %v2994_v5 = vmul.f32 %v2962_v29, %v2962_v29  ;;  %v3027_v58 = vmul.f32 %v5573_v24, %v2995_v23  ;;  %v3835_v53 = vld [vmem:[%s4018_s13 + $0xc0] sm:$0xff] }
 0x382   : > { %2705 = vst.msk [vmem:[%s5895_s21 + $0xb8] sm:$0xff] %vm389_vm0, %v3739_v54  ;;  %v2965_v10 = vsub.f32 %v3739_v54, %v3832_v8 }
 0x383   : > { %v2633_v59 = vpop.f32.mrf.mxu1  ;;  %v3074_v51 = vadd.f32 %v3073_v20, %v3072_v50  ;;  %v3026_v7 = vmul.f32 %v5567_v45, %v2994_v5  ;;  %v3079_v45 = vsel %vm389_vm0, %v3027_v58, 0.0  ;;  %v3837_v20 = vld [vmem:[%s4018_s13 + $0xd0] sm:$0xff] }
 0x384   : > { %2704 = vst.msk [vmem:[%s5895_s21 + $0xb0] sm:$0xff] %vm389_vm0, %v2633_v59  ;;  %v2964_v44 = vsub.f32 %v2633_v59, %v3833_v31  ;;  %v2997_v18 = vmul.f32 %v2965_v10, %v2965_v10 }
 0x385   : > { %v3742_v0 = vpop.f32.mrf.mxu1  ;;  %v3076_v1 = vadd.f32 %v3075_v22, %v3074_v51  ;;  %v3077_v26 = vsel %vm389_vm0, %v3026_v7, 0.0  ;;  %v3838_v22 = vld [vmem:[%s4018_s13 + $0xe8] sm:$0xff] }
 0x386   : > { %v2996_v46 = vmul.f32 %v2964_v44, %v2964_v44  ;;  %2707 = vst.msk [vmem:[%s5895_s21 + $0xc8] sm:$0xff] %vm389_vm0, %v3742_v0  ;;  %v2967_v30 = vsub.f32 %v3742_v0, %v3834_v13  ;;  %v3029_v24 = vmul.f32 %v5589_v52, %v2997_v18  ;;  %v3839_v13 = vld [vmem:[%s4018_s13 + $0xe0] sm:$0xff] }
 0x387   : > { %v2643_v33 = vpop.f32.mrf.mxu1  ;;  %v3078_v12 = vadd.f32 %v3077_v26, %v3076_v1 }
 0x388   : > { %v3028_v4 = vmul.f32 %v5582_v34, %v2996_v46  ;;  %2706 = vst.msk [vmem:[%s5895_s21 + $0xc0] sm:$0xff] %vm389_vm0, %v2643_v33  ;;  %v2999_v25 = vmul.f32 %v2967_v30, %v2967_v30  ;;  %v2966_v35 = vsub.f32 %v2643_v33, %v3835_v53  ;;  %v3083_v8 = vsel %vm389_vm0, %v3029_v24, 0.0  ;;  %v3841_v53 = vld [vmem:[%s4018_s13 + $0xf0] sm:$0xff] }
 0x389   : > { %v3745_v49 = vpop.f32.mrf.mxu1  ;;  %v3080_v16 = vadd.f32 %v3079_v45, %v3078_v12 }
 0x38a   : > { %v3081_v23 = vsel %vm389_vm0, %v3028_v4, 0.0  ;;  %2709 = vst.msk [vmem:[%s5895_s21 + $0xd8] sm:$0xff] %vm389_vm0, %v3745_v49  ;;  %v2969_v34 = vsub.f32 %v3745_v49, %v3836_v63  ;;  %v2998_v29 = vmul.f32 %v2966_v35, %v2966_v35  ;;  %v3031_v10 = vmul.f32 %v5611_v47, %v2999_v25  ;;  %v3840_v4 = vld [vmem:[%s4018_s13 + $0xf8] sm:$0xff]  ;;  %s3553_s13 = sshll.u32 %s3972_s9, 4 }
 0x38b   : > { %v2653_v54 = vpop.f32.mrf.mxu1  ;;  %v3082_v50 = vadd.f32 %v3081_v23, %v3080_v16  ;;  %s3260_s24 = scalar_lea.hbm %s6429_s8, %s3553_s13 }
 0x38c   : > { %2708 = vst.msk [vmem:[%s5895_s21 + $0xd0] sm:$0xff] %vm389_vm0, %v2653_v54  ;;  %v2968_v52 = vsub.f32 %v2653_v54, %v3837_v20  ;;  %v3030_v5 = vmul.f32 %v5598_v40, %v2998_v29  ;;  %v3001_v59 = vmul.f32 %v2969_v34, %v2969_v34  ;;  %v3087_v40 = vsel %vm389_vm0, %v3031_v10, 0.0 }
 0x38d   : > { %v3748_v51 = vpop.f32.mrf.mxu1  ;;  %v3084_v31 = vadd.f32 %v3083_v8, %v3082_v50 }
 0x38e   : > { %v3000_v44 = vmul.f32 %v2968_v52, %v2968_v52  ;;  %2711 = vst.msk [vmem:[%s5895_s21 + $0xe8] sm:$0xff] %vm389_vm0, %v3748_v51  ;;  %v2971_v58 = vsub.f32 %v3748_v51, %v3838_v22  ;;  %v3085_v7 = vsel %vm389_vm0, %v3030_v5, 0.0  ;;  %v3033_v47 = vmul.f32 %v5626_v42, %v3001_v59 }
 0x38f   : > { %v2663_v18 = vpop.f32.mrf.mxu1  ;;  %v3086_v0 = vadd.f32 %v3085_v7, %v3084_v31  ;;  %v1810_v51 = vand.u32 65535, %v5673_v43  ;;  %v1855_v31 = vand.u32 65535, %v5681_v21 }
 0x390   : > { %v3032_v1 = vmul.f32 %v5614_v48, %v3000_v44  ;;  %2710 = vst.msk [vmem:[%s5895_s21 + $0xe0] sm:$0xff] %vm389_vm0, %v2663_v18  ;;  %v3003_v46 = vmul.f32 %v2971_v58, %v2971_v58  ;;  %v2970_v30 = vsub.f32 %v2663_v18, %v3839_v13  ;;  %v3091_v42 = vsel %vm389_vm0, %v3033_v47, 0.0 }
 0x391   : > { %v3751_v26 = vpop.f32.mrf.mxu1  ;;  %v3088_v33 = vadd.f32 %v3087_v40, %v3086_v0  ;;  %v1812_v7 = vcvt.s32.f32 %v1810_v51  ;;  %v1857_v21 = vcvt.s32.f32 %v1855_v31  ;;  %v1885_v18 = vand.u32 65535, %v5699_v56 }
 0x392   : > { %v3089_v12 = vsel %vm389_vm0, %v3032_v1, 0.0  ;;  %2713 = vst.msk [vmem:[%s5895_s21 + $0xf8] sm:$0xff] %vm389_vm0, %v3751_v26  ;;  %v2973_v45 = vsub.f32 %v3751_v26, %v3840_v4  ;;  %v3002_v48 = vmul.f32 %v2970_v30, %v2970_v30  ;;  %v3035_v49 = vmul.f32 %v5639_v37, %v3003_v46 }
 0x393   : > { %v2673_v24 = vpop.f32.mrf.mxu1  ;;  %v3090_v25 = vadd.f32 %v3089_v12, %v3088_v33  ;;  %v1887_v47 = vcvt.s32.f32 %v1885_v18  ;;  %v1915_v56 = vand.u32 65535, %v5717_v61  ;;  %v1900_v46 = vand.u32 65535, %v5726_v28  ;;  %v6731_v61 = vld [vmem:[#allocation19_spill] sm:$0xff] }
 0x394   : > { %2712 = vst.msk [vmem:[%s5895_s21 + $0xf0] sm:$0xff] %vm389_vm0, %v2673_v24  ;;  %v2972_v35 = vsub.f32 %v2673_v24, %v3841_v53  ;;  %v3034_v16 = vmul.f32 %v5629_v57, %v3002_v48  ;;  %v3005_v23 = vmul.f32 %v2973_v45, %v2973_v45  ;;  %v3095_v20 = vsel %vm389_vm0, %v3035_v49, 0.0  ;;  %v6733_v24 = vld [vmem:[#allocation21_spill] sm:$0xff]  ;;  %v6735_v49 = vld [vmem:[#allocation23_spill] sm:$0xff]  ;;  %s3848_s21 = scalar_lea.vmem %s3847_s20, 32 }
 0x395   : > { %v3092_v63 = vadd.f32 %v3091_v42, %v3090_v25  ;;  %v1825_v57 = vand.u32 65535, %v5667_v27  ;;  %v1917_v12 = vcvt.s32.f32 %v1915_v56  ;;  %v1902_v48 = vcvt.s32.f32 %v1900_v46  ;;  %v6743_v18 = vld [vmem:[#allocation31_spill] sm:$0xff]  ;;  %p3850_p1 = scmp.lt.s32.totalorder %s3848_s21, %s3842_s12 }
 0x396   : > { %v3004_v34 = vmul.f32 %v2972_v35, %v2972_v35  ;;  %v3093_v29 = vsel %vm389_vm0, %v3034_v16, 0.0  ;;  %v3037_v52 = vmul.f32 %v5651_v62, %v3005_v23  ;;  %v1840_v62 = vand.u32 65535, %v5690_v60  ;;  %v6736_v16 = vld [vmem:[#allocation26_spill] sm:$0xff]  ;;  %v6745_v56 = vld [vmem:[#allocation35_spill] sm:$0xff] }
 0x397   : > { %v3094_v54 = vadd.f32 %v3093_v29, %v3092_v63  ;;  %v1960_v23 = vand.u32 65535, %v6736_v16  ;;  %p3851_p2 = por %p3850_p1, %p3849_p0 }
 0x398   : > { %v3036_v50 = vmul.f32 %v5642_v32, %v3004_v34  ;;  %v3099_v37 = vsel %vm389_vm0, %v3037_v52, 0.0  ;;  %v1827_v32 = vcvt.s32.f32 %v1825_v57  ;;  %v1842_v0 = vcvt.s32.f32 %v1840_v62  ;;  %v6742_v62 = vld [vmem:[#allocation32_spill] sm:$0xff] }
 0x399   : > { %v3096_v10 = vadd.f32 %v3095_v20, %v3094_v54  ;;  %v6737_v54 = vld [vmem:[#allocation25_spill] sm:$0xff]  ;;  %v1962_v31 = vcvt.s32.f32 %v1960_v23  ;;  %p3852_p3 = pnand %p3851_p2, %p3845_p13 }
 0x39a   : > { %v3097_v8 = vsel %vm389_vm0, %v3036_v50, 0.0  ;;  %v6738_v50 = vld [vmem:[#allocation28_spill] sm:$0xff]  ;;  %v6750_v23 = vld [vmem:[#allocation45_spill] sm:$0xff] }
 0x39b   : > { %v3098_v5 = vadd.f32 %v3097_v8, %v3096_v10  ;;  %v2005_v20 = vand.u32 65535, %v6738_v50 }
 0x39d   : > { %v3100_v59 = vadd.f32 %v3099_v37, %v3098_v5  ;;  %v6739_v5 = vld [vmem:[#allocation27_spill] sm:$0xff]  ;;  %v6740_v37 = vld [vmem:[#allocation30_spill] sm:$0xff] }
 0x39f   : > { %3101 = vadd.xlane.f32.xlu0 %v3100_v59  ;;  %v1990_v59 = vand.u32 65535, %v6740_v37 }
 0x3ac   : > { %v6121_v44 = vpop.xlane.xlu1 %1829 }
 0x3ad   : > { %vm1831_vm1 = vcmp.eq.f32.partialorder %v5678_v38, %v6121_v44 }
 0x3ae   : > { %v6126_v22 = vpop.xlane.xlu0 %1814  ;;  %v1832_v58 = vsel %vm1831_vm1, %v1827_v32, inf  ;;  %v6741_v32 = vld [vmem:[#allocation29_spill] sm:$0xff] }
 0x3af   : > { %vm1816_vm0 = vcmp.eq.f32.partialorder %v5687_v3, %v6126_v22  ;;  %1833 = vmin.xlane.f32.xlu0 %v1832_v58  ;;  %v1870_v3 = vand.u32 65535, %v5709_v9  ;;  %v6730_v9 = vld [vmem:[#allocation20_spill] sm:$0xff]  ;;  %v2035_v58 = vand.u32 65535, %v6742_v62 }
 0x3b0   : > { %v6130_v27 = vpop.xlane.xlu1 %1859  ;;  %v1817_v43 = vsel %vm1816_vm0, %v1812_v7, inf  ;;  %v1945_v30 = vand.u32 65535, %v6730_v9 }
 0x3b1   : > { %vm1861_vm3 = vcmp.eq.f32.partialorder %v5695_v17, %v6130_v27  ;;  %1818 = vmin.xlane.f32.xlu1 %v1817_v43  ;;  %v2037_v9 = vcvt.s32.f32 %v2035_v58  ;;  %v6755_v58 = vld [vmem:[#allocation6_spill] sm:$0xff] }
 0x3b2   : > { %v6135_v38 = vpop.xlane.xlu0 %1844  ;;  %v1862_v60 = vsel %vm1861_vm3, %v1857_v21, inf  ;;  %v1947_v42 = vcvt.s32.f32 %v1945_v30  ;;  %v2007_v21 = vcvt.s32.f32 %v2005_v20  ;;  %v6746_v30 = vld [vmem:[#allocation34_spill] sm:$0xff]  ;;  %v6752_v20 = vld [vmem:[#allocation47_spill] sm:$0xff] }
 0x3b3   : > { %vm1846_vm4 = vcmp.eq.f32.partialorder %v5702_v55, %v6135_v38  ;;  %1863 = vmin.xlane.f32.xlu0 %v1862_v60  ;;  %v1872_v55 = vcvt.s32.f32 %v1870_v3  ;;  %v6744_v60 = vld [vmem:[#allocation33_spill] sm:$0xff] }
 0x3b4   : > { %v1847_v1 = vsel %vm1846_vm4, %v1842_v0, inf  ;;  %v6140_v40 = vpop.xlane.xlu1 %1889  ;;  %v2020_v0 = vand.u32 65535, %v6744_v60 }
 0x3b5   : > { %1848 = vmin.xlane.f32.xlu1 %v1847_v1  ;;  %vm1891_vm5 = vcmp.eq.f32.partialorder %v5712_v39, %v6140_v40  ;;  %v6732_v39 = vld [vmem:[#allocation22_spill] sm:$0xff] }
 0x3b6   : > { %v1892_v17 = vsel %vm1891_vm5, %v1887_v47, inf  ;;  %v6146_v13 = vpop.xlane.xlu0 %1874  ;;  %v1930_v4 = vand.u32 65535, %v6732_v39  ;;  %v1992_v47 = vcvt.s32.f32 %v1990_v59  ;;  %v6754_v59 = vld [vmem:[#allocation7_spill] sm:$0xff] }
 0x3b7   : > { %1893 = vmin.xlane.f32.xlu0 %v1892_v17  ;;  %vm1876_vm6 = vcmp.eq.f32.partialorder %v5723_v36, %v6146_v13  ;;  %v6734_v36 = vld [vmem:[#allocation24_spill] sm:$0xff]  ;;  %v2065_v17 = vand.u32 65535, %v6745_v56 }
 0x3b8   : > { %v6151_v26 = vpop.xlane.xlu1 %1919  ;;  %v1877_v33 = vsel %vm1876_vm6, %v1872_v55, inf  ;;  %v1975_v25 = vand.u32 65535, %v6734_v36  ;;  %v1932_v29 = vcvt.s32.f32 %v1930_v4  ;;  %v2022_v4 = vcvt.s32.f32 %v2020_v0 }
 0x3b9   : > { %vm1921_vm7 = vcmp.eq.f32.partialorder %v6731_v61, %v6151_v26  ;;  %1878 = vmin.xlane.f32.xlu1 %v1877_v33  ;;  %v6747_v33 = vld [vmem:[#allocation36_spill] sm:$0xff]  ;;  %v2067_v36 = vcvt.s32.f32 %v2065_v17 }
 0x3ba   : > { %v6156_v28 = vpop.xlane.xlu0 %1904  ;;  %v1922_v45 = vsel %vm1921_vm7, %v1917_v12, inf  ;;  %v1977_v10 = vcvt.s32.f32 %v1975_v25  ;;  %v2050_v12 = vand.u32 65535, %v6747_v33  ;;  %v6749_v25 = vld [vmem:[#allocation46_spill] sm:$0xff] }
 0x3bb   : > { %vm1906_vm8 = vcmp.eq.f32.partialorder %v6733_v24, %v6156_v28  ;;  %1923 = vmin.xlane.f32.xlu0 %v1922_v45 }
 0x3bc   : > { %v6161_v53 = vpop.xlane.xlu1 %1949  ;;  %v1907_v35 = vsel %vm1906_vm8, %v1902_v48, inf  ;;  %v2052_v16 = vcvt.s32.f32 %v2050_v12 }
 0x3bd   : > { %vm1951_vm9 = vcmp.eq.f32.partialorder %v6735_v49, %v6161_v53  ;;  %1908 = vmin.xlane.f32.xlu1 %v1907_v35  ;;  %v2080_v35 = vand.u32 65535, %v6749_v25  ;;  %v6762_v25 = vld [vmem:[#allocation15_spill] sm:$0xff] }
 0x3be   : > { %v1952_v34 = vsel %vm1951_vm9, %v1947_v42, inf }
 0x3bf   : > { %v6166_v63 = vpop.xlane.xlu0 %1934  ;;  %1953 = vmin.xlane.f32.xlu0 %v1952_v34  ;;  %v2082_v37 = vcvt.s32.f32 %v2080_v35  ;;  %v2215_v35 = vand.u32 65535, %v6762_v25  ;;  %v6772_v25 = vld [vmem:[#allocation39_spill] sm:$0xff] }
 0x3c0   : > { %vm1936_vm11 = vcmp.eq.f32.partialorder %v6737_v54, %v6166_v63 }
 0x3c1   : > { %v6171_v52 = vpop.xlane.xlu1 %1979  ;;  %v1937_v8 = vsel %vm1936_vm11, %v1932_v29, inf }
 0x3c2   : > { %vm1981_vm12 = vcmp.eq.f32.partialorder %v6739_v5, %v6171_v52  ;;  %1938 = vmin.xlane.f32.xlu1 %v1937_v8 }
 0x3c3   : > { %v6176_v57 = vpop.xlane.xlu0 %1964  ;;  %v1982_v51 = vsel %vm1981_vm12, %v1977_v10, inf }
 0x3c4   : > { %vm1966_vm13 = vcmp.eq.f32.partialorder %v6741_v32, %v6176_v57  ;;  %1983 = vmin.xlane.f32.xlu0 %v1982_v51  ;;  %v2155_v51 = vand.u32 65535, %v6754_v59 }
 0x3c5   : > { %v6181_v7 = vpop.xlane.xlu1 %2009  ;;  %v1967_v43 = vsel %vm1966_vm13, %v1962_v31, inf }
 0x3c6   : > { %vm2011_vm14 = vcmp.eq.f32.partialorder %v6743_v18, %v6181_v7  ;;  %1968 = vmin.xlane.f32.xlu1 %v1967_v43  ;;  %v6756_v43 = vld [vmem:[#allocation9_spill] sm:$0xff] }
 0x3c7   : > { %v6186_v3 = vpop.xlane.xlu0 %1994  ;;  %v2012_v1 = vsel %vm2011_vm14, %v2007_v21, inf  ;;  %v2140_v21 = vand.u32 65535, %v6756_v43 }
 0x3c8   : > { %vm1996_vm15 = vcmp.eq.f32.partialorder %v5795_v2, %v6186_v3  ;;  %2013 = vmin.xlane.f32.xlu0 %v2012_v1  ;;  %v6748_v2 = vld [vmem:[#allocation43_spill] sm:$0xff]  ;;  %v6757_v1 = vld [vmem:[#allocation8_spill] sm:$0xff] }
 0x3c9   : > { %v6191_v46 = vpop.xlane.xlu1 %2039  ;;  %v1997_v55 = vsel %vm1996_vm15, %v1992_v47, inf  ;;  %v2095_v45 = vand.u32 65535, %v6748_v2  ;;  %v2142_v12 = vcvt.s32.f32 %v2140_v21  ;;  %v6761_v2 = vld [vmem:[#allocation12_spill] sm:$0xff] }
 0x3ca   : > { %vm2041_vm2 = vcmp.eq.f32.partialorder %v6746_v30, %v6191_v46  ;;  %1998 = vmin.xlane.f32.xlu1 %v1997_v55  ;;  %v2157_v55 = vcvt.s32.f32 %v2155_v51  ;;  %v6769_v21 = vld [vmem:[#allocation40_spill] sm:$0xff] }
 0x3cb   : > { %v6196_v61 = vpop.xlane.xlu0 %2024  ;;  %v2042_v39 = vsel %vm2041_vm2, %v2037_v9, inf  ;;  %v2097_v50 = vcvt.s32.f32 %v2095_v45  ;;  %v6759_v9 = vld [vmem:[#allocation10_spill] sm:$0xff] }
 0x3cc   : > { %vm2026_vm1 = vcmp.eq.f32.partialorder %v5813_v15, %v6196_v61  ;;  %2043 = vmin.xlane.f32.xlu0 %v2042_v39  ;;  %v6751_v15 = vld [vmem:[#allocation37_spill] sm:$0xff] }
 0x3cd   : > { %v6201_v48 = vpop.xlane.xlu1 %2069  ;;  %v2027_v24 = vsel %vm2026_vm1, %v2022_v4, inf  ;;  %v2125_v34 = vand.u32 65535, %v6751_v15  ;;  %v6760_v39 = vld [vmem:[#allocation13_spill] sm:$0xff] }
 0x3ce   : > { %vm2071_vm0 = vcmp.eq.f32.partialorder %v5822_v19, %v6201_v48  ;;  %2028 = vmin.xlane.f32.xlu1 %v2027_v24  ;;  %v6753_v19 = vld [vmem:[#allocation5_spill] sm:$0xff]  ;;  %v2170_v4 = vand.u32 65535, %v6760_v39 }
 0x3cf   : > { %v6206_v42 = vpop.xlane.xlu0 %2054  ;;  %v2072_v49 = vsel %vm2071_vm0, %v2067_v36, inf  ;;  %v2110_v8 = vand.u32 65535, %v6753_v19  ;;  %v2127_v62 = vcvt.s32.f32 %v2125_v34  ;;  %v6764_v34 = vld [vmem:[#allocation17_spill] sm:$0xff] }
 0x3d0   : > { %vm2056_vm3 = vcmp.eq.f32.partialorder %v6750_v23, %v6206_v42  ;;  %2073 = vmin.xlane.f32.xlu0 %v2072_v49  ;;  %v6763_v49 = vld [vmem:[#allocation14_spill] sm:$0xff]  ;;  %v2172_v15 = vcvt.s32.f32 %v2170_v4 }
 0x3d1   : > { %v6211_v29 = vpop.xlane.xlu1 %2099  ;;  %v2057_v54 = vsel %vm2056_vm3, %v2052_v16, inf  ;;  %v2112_v0 = vcvt.s32.f32 %v2110_v8  ;;  %v2217_v8 = vcvt.s32.f32 %v2215_v35 }
 0x3d2   : > { %vm2101_vm4 = vcmp.eq.f32.partialorder %v6752_v20, %v6211_v29  ;;  %2058 = vmin.xlane.f32.xlu1 %v2057_v54  ;;  %v6765_v54 = vld [vmem:[#allocation16_spill] sm:$0xff] }
 0x3d3   : > { %v6216_v10 = vpop.xlane.xlu0 %2084  ;;  %v2102_v5 = vsel %vm2101_vm4, %v2097_v50, inf  ;;  %v2200_v50 = vand.u32 65535, %v6765_v54 }
 0x3d4   : > { %vm2086_vm5 = vcmp.eq.f32.partialorder %v5849_v41, %v6216_v10  ;;  %2103 = vmin.xlane.f32.xlu0 %v2102_v5  ;;  %v6758_v41 = vld [vmem:[#allocation11_spill] sm:$0xff]  ;;  %v6766_v5 = vld [vmem:[#allocation49_spill] sm:$0xff] }
 0x3d5   : > { %v6221_v31 = vpop.xlane.xlu1 %2129  ;;  %v2087_v32 = vsel %vm2086_vm5, %v2082_v37, inf  ;;  %v2185_v47 = vand.u32 65535, %v6758_v41  ;;  %v6767_v37 = vld [vmem:[#allocation48_spill] sm:$0xff]  ;;  %v2202_v43 = vcvt.s32.f32 %v2200_v50 }
 0x3d6   : > { %vm2131_vm6 = vcmp.eq.f32.partialorder %v6755_v58, %v6221_v31  ;;  %2088 = vmin.xlane.f32.xlu1 %v2087_v32  ;;  %v2245_v59 = vand.u32 65535, %v6767_v37  ;;  %v6768_v32 = vld [vmem:[#allocation50_spill] sm:$0xff] }
 0x3d7   : > { %v2132_v60 = vsel %vm2131_vm6, %v2127_v62, inf  ;;  %v2187_v36 = vcvt.s32.f32 %v2185_v47  ;;  %v2230_v62 = vand.u32 65535, %v6768_v32 }
 0x3d8   : > { %v6226_v18 = vpop.xlane.xlu0 %2114  ;;  %2133 = vmin.xlane.f32.xlu0 %v2132_v60  ;;  %v6770_v60 = vld [vmem:[#allocation38_spill] sm:$0xff]  ;;  %v2247_v47 = vcvt.s32.f32 %v2245_v59 }
 0x3d9   : > { %vm2116_vm7 = vcmp.eq.f32.partialorder %v6757_v1, %v6226_v18  ;;  %v6231_v56 = vpop.xlane.xlu1 %2159 }
 0x3da   : > { %v2117_v17 = vsel %vm2116_vm7, %v2112_v0, inf  ;;  %vm2161_vm8 = vcmp.eq.f32.partialorder %v6759_v9, %v6231_v56  ;;  %v2275_v0 = vand.u32 65535, %v6770_v60 }
 0x3db   : > { %2118 = vmin.xlane.f32.xlu1 %v2117_v17  ;;  %v2162_v33 = vsel %vm2161_vm8, %v2157_v55, inf  ;;  %v6771_v17 = vld [vmem:[#allocation51_spill] sm:$0xff] }
 0x3dc   : > { %v6235_v30 = vpop.xlane.xlu0 %2144  ;;  %2163 = vmin.xlane.f32.xlu0 %v2162_v33  ;;  %v2260_v55 = vand.u32 65535, %v6771_v17 }
 0x3dd   : > { %vm2146_vm9 = vcmp.eq.f32.partialorder %v6761_v2, %v6235_v30  ;;  %v6240_v45 = vpop.xlane.xlu1 %2189  ;;  %v2277_v2 = vcvt.s32.f32 %v2275_v0 }
 0x3de   : > { %v2147_v24 = vsel %vm2146_vm9, %v2142_v12, inf  ;;  %vm2191_vm11 = vcmp.eq.f32.partialorder %v6763_v49, %v6240_v45  ;;  %v2232_v12 = vcvt.s32.f32 %v2230_v62 }
 0x3df   : > { %2148 = vmin.xlane.f32.xlu1 %v2147_v24  ;;  %v2192_v16 = vsel %vm2191_vm11, %v2187_v36, inf  ;;  %v2262_v36 = vcvt.s32.f32 %v2260_v55 }
 0x3e0   : > { %v6245_v23 = vpop.xlane.xlu0 %2174  ;;  %2193 = vmin.xlane.f32.xlu0 %v2192_v16 }
 0x3e1   : > { %vm2176_vm12 = vcmp.eq.f32.partialorder %v6764_v34, %v6245_v23  ;;  %v6250_v20 = vpop.xlane.xlu1 %2219 }
 0x3e2   : > { %v2177_v19 = vsel %vm2176_vm12, %v2172_v15, inf  ;;  %vm2221_vm13 = vcmp.eq.f32.partialorder %v6766_v5, %v6250_v20 }
 0x3e3   : > { %2178 = vmin.xlane.f32.xlu1 %v2177_v19  ;;  %v2222_v51 = vsel %vm2221_vm13, %v2217_v8, inf }
 0x3e4   : > { %2223 = vmin.xlane.f32.xlu0 %v2222_v51 }
 0x3e5   : > { %v6256_v58 = vpop.xlane.xlu0 %2204 }
 0x3e6   : > { %vm2206_vm14 = vcmp.eq.f32.partialorder %v6769_v21, %v6256_v58 }
 0x3e7   : > { %v6261_v1 = vpop.xlane.xlu1 %2249  ;;  %v2207_v41 = vsel %vm2206_vm14, %v2202_v43, inf }
 0x3e8   : > { %vm2251_vm15 = vcmp.eq.f32.partialorder %v5956_v11, %v6261_v1  ;;  %2208 = vmin.xlane.f32.xlu1 %v2207_v41 }
 0x3e9   : > { %v6266_v9 = vpop.xlane.xlu0 %2234  ;;  %v2252_v33 = vsel %vm2251_vm15, %v2247_v47, inf }
 0x3ea   : > { %vm2236_vm2 = vcmp.eq.f32.partialorder %v5969_v14, %v6266_v9  ;;  %2253 = vmin.xlane.f32.xlu0 %v2252_v33 }
 0x3eb   : > { %v6270_v39 = vpop.xlane.xlu1 %2279  ;;  %v2237_v4 = vsel %vm2236_vm2, %v2232_v12, inf }
 0x3ec   : > { %vm2281_vm1 = vcmp.eq.f32.partialorder %v5975_v6, %v6270_v39  ;;  %2238 = vmin.xlane.f32.xlu1 %v2237_v4 }
 0x3ed   : > { %v6274_v11 = vpop.xlane.xlu0 %2264  ;;  %v2282_v24 = vsel %vm2281_vm1, %v2277_v2, inf }
 0x3ee   : > { %vm2266_vm0 = vcmp.eq.f32.partialorder %v6772_v25, %v6274_v11  ;;  %2283 = vmin.xlane.f32.xlu0 %v2282_v24 }
 0x3ef   : > { %v2267_v14 = vsel %vm2266_vm0, %v2262_v36, inf }
 0x3f0   : > { %2268 = vmin.xlane.f32.xlu1 %v2267_v14 }
 0x3f1   : > { %3855 = shalt.err (!%p3852_p3)
}
 0x3f2   : > { %s3856_s22 = scalar_lea.hbm %s3260_s24, 16  ;;  %s3860_s13 = scalar_lea.hbm %s6429_s8, 32 }
 0x3f3   : > { %p3857_p4 = scmp.ne.s32.totalorder %s3260_s24, %s3856_s22  ;;  %p3861_p9 = scmp.lt.s32.totalorder %s3260_s24, %s6429_s8 }
 0x3f4   : > { %p3862_p10 = scmp.lt.s32.totalorder %s3860_s13, %s3856_s22 }
 0x3f5   : > { %p3858_p7 = pnand %p3857_p4, %p3989_p5 }
 0x3f6   : > { %p3863_p11 = por %p3862_p10, %p3861_p9 }
 0x3f7   : > { %p3859_p8 = pneg %p3858_p7 }
 0x3f9   : > { %p3864_p12 = pnand %p3863_p11, %p3859_p8 }
 0x3fb   : > { %3867 = shalt.err (!%p3864_p12)
}
 0x3fc   : > { %3770 = dma.vmem_to_hbm [thread:$0]  (%p3989_p5), %s3263_s25, 16, %s3260_s24, %s3235_s10   ;;  %v1836_v50 = vcvt.f32.s32 %v6121_v44  ;;  %v1821_v19 = vcvt.f32.s32 %v6126_v22  ;;  %v1866_v37 = vcvt.f32.s32 %v6130_v27  ;;  %v1851_v44 = vcvt.f32.s32 %v6135_v38 }
 0x3fd   : > { %s6304_s24 = scalar_lea.vmem %s6427_s6, %s4012_s26  ;;  %v1896_v0 = vcvt.f32.s32 %v6140_v40  ;;  %v1881_v38 = vcvt.f32.s32 %v6146_v13  ;;  %v1926_v24 = vcvt.f32.s32 %v6151_v26  ;;  %v1911_v14 = vcvt.f32.s32 %v6156_v28  ;;  %p350_p5 = scmp.lt.s32.totalorder %s3972_s9, 1 }
 0x3fe   : > { %v1837_v5 = vshll.u32 %v1836_v50, 16  ;;  %v1822_v32 = vshll.u32 %v1821_v19, 16  ;;  %v1867_v21 = vshll.u32 %v1866_v37, 16  ;;  %v1852_v47 = vshll.u32 %v1851_v44, 16 }
 0x3ff   : > { %v1897_v4 = vshll.u32 %v1896_v0, 16  ;;  %v1882_v25 = vshll.u32 %v1881_v38, 16  ;;  %v2001_v0 = vcvt.f32.s32 %v6186_v3  ;;  %s6780_s9 = smov (!%p350_p5, %s3972_s9), 1  ;;  %vm3111_vm3 = vcmask 0  }
 0x400   : > { %s352_s10 = scalar_lea.vmem %s6428_s7, %s6780_s9 }
 0x428   : > { %v3102_v6 = vpop.xlane.xlu0 %3101 }
 0x429   : > { %v3103_v35 = vrot.slane %v3102_v6, 4 }
 0x42b   : > { %v3104_v49 = vadd.f32 %v3103_v35, %v3102_v6  ;;  %v1927_v35 = vshll.u32 %v1926_v24, 16 }
 0x42d   : > { %v3105_v16 = vrot.slane %v3104_v49, 2 }
 0x42f   : > { %v3106_v15 = vadd.f32 %v3105_v16, %v3104_v49  ;;  %v1956_v49 = vcvt.f32.s32 %v6161_v53 }
 0x431   : > { %v3107_v34 = vrot.slane %v3106_v15, 1 }
 0x433   : > { %v3108_v54 = vadd.f32 %v3107_v34, %v3106_v15  ;;  %v1912_v34 = vshll.u32 %v1911_v14, 16 }
 0x435   : > { %3768 = vpush %v3108_v54  ;;  %v1941_v54 = vcvt.f32.s32 %v6166_v63 }
 0x438   : > { %v1834_v8 = vpop.xlane.xlu0 %1833 }
 0x439   : > { %v1835_v59 = vcvt.f32.s32 %v1834_v8  ;;  %v1957_v8 = vshll.u32 %v1956_v49, 16 }
 0x43a   : > { %v1819_v51 = vpop.xlane.xlu1 %1818 }
 0x43b   : > { %v1838_v62 = vadd.s32 %v1837_v5, %v1835_v59  ;;  %v1820_v43 = vcvt.f32.s32 %v1819_v51  ;;  %v1986_v5 = vcvt.f32.s32 %v6171_v52  ;;  %v1942_v51 = vshll.u32 %v1941_v54, 16 }
 0x43c   : > { %v1864_v22 = vpop.xlane.xlu0 %1863 }
 0x43d   : > { %2748 = vst.msk [vmem:[%s6304_s24 + $0x8] sm:$0xff] %vm2714_vm10, %v1838_v62  ;;  %v1823_v27 = vadd.s32 %v1822_v32, %v1820_v43  ;;  %v1865_v60 = vcvt.f32.s32 %v1864_v22  ;;  %v1971_v32 = vcvt.f32.s32 %v6176_v57  ;;  %v1987_v43 = vshll.u32 %v1986_v5, 16 }
 0x43e   : > { %v1849_v41 = vpop.xlane.xlu1 %1848  ;;  %v2016_v22 = vcvt.f32.s32 %v6181_v7 }
 0x43f   : > { %2747 = vst.msk [vmem:[%s6304_s24] sm:$0xff] %vm2714_vm10, %v1823_v27  ;;  %v1868_v17 = vadd.s32 %v1867_v21, %v1865_v60  ;;  %v1850_v55 = vcvt.f32.s32 %v1849_v41  ;;  %v1972_v60 = vshll.u32 %v1971_v32, 16 }
 0x440   : > { %v1894_v12 = vpop.xlane.xlu0 %1893 }
 0x441   : > { %2750 = vst.msk [vmem:[%s6304_s24 + $0x18] sm:$0xff] %vm2714_vm10, %v1868_v17  ;;  %v1853_v33 = vadd.s32 %v1852_v47, %v1850_v55  ;;  %v1895_v2 = vcvt.f32.s32 %v1894_v12  ;;  %v2017_v17 = vshll.u32 %v2016_v22, 16  ;;  %v2046_v55 = vcvt.f32.s32 %v6191_v46 }
 0x442   : > { %v1879_v36 = vpop.xlane.xlu1 %1878  ;;  %v2002_v12 = vshll.u32 %v2001_v0, 16  ;;  %v2196_v0 = vcvt.f32.s32 %v6240_v45 }
 0x443   : > { %2749 = vst.msk [vmem:[%s6304_s24 + $0x10] sm:$0xff] %vm2714_vm10, %v1853_v33  ;;  %v1898_v40 = vadd.s32 %v1897_v4, %v1895_v2  ;;  %v1880_v6 = vcvt.f32.s32 %v1879_v36  ;;  %v2031_v4 = vcvt.f32.s32 %v6196_v61  ;;  %v2076_v36 = vcvt.f32.s32 %v6201_v48 }
 0x444   : > { %v1924_v13 = vpop.xlane.xlu0 %1923 }
 0x445   : > { %2752 = vst.msk [vmem:[%s6304_s24 + $0x28] sm:$0xff] %vm2714_vm10, %v1898_v40  ;;  %v1883_v16 = vadd.s32 %v1882_v25, %v1880_v6  ;;  %v1925_v15 = vcvt.f32.s32 %v1924_v13  ;;  %v2047_v40 = vshll.u32 %v2046_v55, 16  ;;  %v2032_v6 = vshll.u32 %v2031_v4, 16 }
 0x446   : > { %v1909_v26 = vpop.xlane.xlu1 %1908  ;;  %v2061_v13 = vcvt.f32.s32 %v6206_v42 }
 0x447   : > { %2751 = vst.msk [vmem:[%s6304_s24 + $0x20] sm:$0xff] %vm2714_vm10, %v1883_v16  ;;  %v1928_v50 = vadd.s32 %v1927_v35, %v1925_v15  ;;  %v1910_v19 = vcvt.f32.s32 %v1909_v26  ;;  %v2077_v16 = vshll.u32 %v2076_v36, 16  ;;  %v2106_v15 = vcvt.f32.s32 %v6211_v29 }
 0x448   : > { %v1954_v28 = vpop.xlane.xlu0 %1953  ;;  %v2062_v54 = vshll.u32 %v2061_v13, 16  ;;  %v2136_v29 = vcvt.f32.s32 %v6221_v31  ;;  %v2256_v13 = vcvt.f32.s32 %v6261_v1 }
 0x449   : > { %2754 = vst.msk [vmem:[%s6304_s24 + $0x38] sm:$0xff] %vm2714_vm10, %v1928_v50  ;;  %v1913_v37 = vadd.s32 %v1912_v34, %v1910_v19  ;;  %v1955_v53 = vcvt.f32.s32 %v1954_v28  ;;  %v2091_v50 = vcvt.f32.s32 %v6216_v10  ;;  %v2121_v10 = vcvt.f32.s32 %v6226_v18 }
 0x44b   : > { %v1939_v59 = vpop.xlane.xlu1 %1938  ;;  %2753 = vst.msk [vmem:[%s6304_s24 + $0x30] sm:$0xff] %vm2714_vm10, %v1913_v37  ;;  %v1958_v63 = vadd.s32 %v1957_v8, %v1955_v53  ;;  %v2107_v8 = vshll.u32 %v2106_v15, 16 }
 0x44c   : > { %v1940_v44 = vcvt.f32.s32 %v1939_v59  ;;  %v2092_v59 = vshll.u32 %v2091_v50, 16  ;;  %v2271_v50 = vcvt.f32.s32 %v6274_v11 }
 0x44d   : > { %v1984_v62 = vpop.xlane.xlu0 %1983  ;;  %2756 = vst.msk [vmem:[%s6304_s24 + $0x48] sm:$0xff] %vm2714_vm10, %v1958_v63 }
 0x44e   : > { %v1943_v52 = vadd.s32 %v1942_v51, %v1940_v44  ;;  %v1985_v21 = vcvt.f32.s32 %v1984_v62  ;;  %v2137_v44 = vshll.u32 %v2136_v29, 16  ;;  %v2166_v62 = vcvt.f32.s32 %v6231_v56 }
 0x44f   : > { %v1969_v27 = vpop.xlane.xlu1 %1968 }
 0x450   : > { %2755 = vst.msk [vmem:[%s6304_s24 + $0x40] sm:$0xff] %vm2714_vm10, %v1943_v52  ;;  %v1988_v57 = vadd.s32 %v1987_v43, %v1985_v21  ;;  %v1970_v41 = vcvt.f32.s32 %v1969_v27  ;;  %v2122_v52 = vshll.u32 %v2121_v10, 16  ;;  %v2151_v21 = vcvt.f32.s32 %v6235_v30 }
 0x451   : > { %v2014_v47 = vpop.xlane.xlu0 %2013  ;;  %v2167_v56 = vshll.u32 %v2166_v62, 16 }
 0x452   : > { %2758 = vst.msk [vmem:[%s6304_s24 + $0x58] sm:$0xff] %vm2714_vm10, %v1988_v57  ;;  %v1973_v7 = vadd.s32 %v1972_v60, %v1970_v41  ;;  %v2015_v38 = vcvt.f32.s32 %v2014_v47 }
 0x453   : > { %v1999_v33 = vpop.xlane.xlu1 %1998 }
 0x454   : > { %2757 = vst.msk [vmem:[%s6304_s24 + $0x50] sm:$0xff] %vm2714_vm10, %v1973_v7  ;;  %v2018_v3 = vadd.s32 %v2017_v17, %v2015_v38  ;;  %v2000_v2 = vcvt.f32.s32 %v1999_v33  ;;  %v2152_v17 = vshll.u32 %v2151_v21, 16  ;;  %v2181_v38 = vcvt.f32.s32 %v6245_v23 }
 0x455   : > { %v2044_v24 = vpop.xlane.xlu0 %2043 }
 0x456   : > { %2760 = vst.msk [vmem:[%s6304_s24 + $0x68] sm:$0xff] %vm2714_vm10, %v2018_v3  ;;  %v2003_v46 = vadd.s32 %v2002_v12, %v2000_v2  ;;  %v2045_v25 = vcvt.f32.s32 %v2044_v24  ;;  %v2197_v12 = vshll.u32 %v2196_v0, 16  ;;  %v2226_v3 = vcvt.f32.s32 %v6250_v20 }
 0x457   : > { %v2029_v14 = vpop.xlane.xlu1 %2028 }
 0x458   : > { %2759 = vst.msk [vmem:[%s6304_s24 + $0x60] sm:$0xff] %vm2714_vm10, %v2003_v46  ;;  %v2048_v61 = vadd.s32 %v2047_v40, %v2045_v25  ;;  %v2030_v35 = vcvt.f32.s32 %v2029_v14  ;;  %v2182_v40 = vshll.u32 %v2181_v38, 16  ;;  %v2227_v23 = vshll.u32 %v2226_v3, 16 }
 0x459   : > { %v2074_v49 = vpop.xlane.xlu0 %2073  ;;  %v2211_v25 = vcvt.f32.s32 %v6256_v58  ;;  %v2286_v58 = vcvt.f32.s32 %v6270_v39 }
 0x45a   : > { %2762 = vst.msk [vmem:[%s6304_s24 + $0x78] sm:$0xff] %vm2714_vm10, %v2048_v61  ;;  %v2033_v48 = vadd.s32 %v2032_v6, %v2030_v35  ;;  %v2075_v26 = vcvt.f32.s32 %v2074_v49  ;;  %v2241_v49 = vcvt.f32.s32 %v6266_v9 }
 0x45b   : > { %v2059_v34 = vpop.xlane.xlu1 %2058  ;;  %v2212_v35 = vshll.u32 %v2211_v25, 16 }
 0x45c   : > { %2761 = vst.msk [vmem:[%s6304_s24 + $0x70] sm:$0xff] %vm2714_vm10, %v2033_v48  ;;  %v2078_v42 = vadd.s32 %v2077_v16, %v2075_v26  ;;  %v2060_v19 = vcvt.f32.s32 %v2059_v34  ;;  %v2257_v48 = vshll.u32 %v2256_v13, 16 }
 0x45d   : > { %v2104_v28 = vpop.xlane.xlu0 %2103 }
 0x45e   : > { %2764 = vst.msk [vmem:[%s6304_s24 + $0x88] sm:$0xff] %vm2714_vm10, %v2078_v42  ;;  %v2063_v5 = vadd.s32 %v2062_v54, %v2060_v19  ;;  %v2105_v37 = vcvt.f32.s32 %v2104_v28  ;;  %v2242_v54 = vshll.u32 %v2241_v49, 16  ;;  %v2287_v28 = vshll.u32 %v2286_v58, 16 }
 0x45f   : > { %v2089_v53 = vpop.xlane.xlu1 %2088 }
 0x460   : > { %2763 = vst.msk [vmem:[%s6304_s24 + $0x80] sm:$0xff] %vm2714_vm10, %v2063_v5  ;;  %v2108_v51 = vadd.s32 %v2107_v8, %v2105_v37  ;;  %v2090_v32 = vcvt.f32.s32 %v2089_v53  ;;  %v2272_v5 = vshll.u32 %v2271_v50, 16 }
 0x461   : > { %v2134_v63 = vpop.xlane.xlu0 %2133 }
 0x462   : > { %2766 = vst.msk [vmem:[%s6304_s24 + $0x98] sm:$0xff] %vm2714_vm10, %v2108_v51  ;;  %v2093_v31 = vadd.s32 %v2092_v59, %v2090_v32  ;;  %v2135_v43 = vcvt.f32.s32 %v2134_v63 }
 0x464   : > { %v2119_v22 = vpop.xlane.xlu1 %2118  ;;  %2765 = vst.msk [vmem:[%s6304_s24 + $0x90] sm:$0xff] %vm2714_vm10, %v2093_v31  ;;  %v2138_v18 = vadd.s32 %v2137_v44, %v2135_v43 }
 0x465   : > { %v2120_v27 = vcvt.f32.s32 %v2119_v22  ;;  %v2164_v60 = vpop.xlane.xlu0 %2163 }
 0x466   : > { %2768 = vst.msk [vmem:[%s6304_s24 + $0xa8] sm:$0xff] %vm2714_vm10, %v2138_v18  ;;  %v2165_v41 = vcvt.f32.s32 %v2164_v60  ;;  %s3769_s12 = spop %3768 }
 0x467   : > { %v2123_v57 = vadd.s32 %v2122_v52, %v2120_v27  ;;  %v3110_v30 = vstv %s3769_s12 }
 0x468   : > { %v2149_v47 = vpop.xlane.xlu1 %2148  ;;  %v2168_v55 = vadd.s32 %v2167_v56, %v2165_v41  ;;  %3112 = vst.msk [vmem:[%s352_s10] sm:$0x1] %vm3111_vm3, %v3110_v30 }
 0x469   : > { %2767 = vst.msk [vmem:[%s6304_s24 + $0xa0] sm:$0xff] %vm2714_vm10, %v2123_v57  ;;  %v2150_v7 = vcvt.f32.s32 %v2149_v47  ;;  %v2194_v33 = vpop.xlane.xlu0 %2193 }
 0x46a   : > { %2770 = vst.msk [vmem:[%s6304_s24 + $0xb8] sm:$0xff] %vm2714_vm10, %v2168_v55  ;;  %v2195_v4 = vcvt.f32.s32 %v2194_v33 }
 0x46b   : > { %v2153_v45 = vadd.s32 %v2152_v17, %v2150_v7 }
 0x46c   : > { %v2198_v2 = vadd.s32 %v2197_v12, %v2195_v4  ;;  %v2179_v24 = vpop.xlane.xlu1 %2178 }
 0x46d   : > { %2769 = vst.msk [vmem:[%s6304_s24 + $0xb0] sm:$0xff] %vm2714_vm10, %v2153_v45  ;;  %v2180_v36 = vcvt.f32.s32 %v2179_v24  ;;  %v2224_v46 = vpop.xlane.xlu0 %2223 }
 0x46e   : > { %2772 = vst.msk [vmem:[%s6304_s24 + $0xc8] sm:$0xff] %vm2714_vm10, %v2198_v2  ;;  %v2225_v6 = vcvt.f32.s32 %v2224_v46 }
 0x46f   : > { %v2183_v14 = vadd.s32 %v2182_v40, %v2180_v36 }
 0x470   : > { %v2228_v20 = vadd.s32 %v2227_v23, %v2225_v6 }
 0x471   : > { %2771 = vst.msk [vmem:[%s6304_s24 + $0xc0] sm:$0xff] %vm2714_vm10, %v2183_v14  ;;  %v2209_v61 = vpop.xlane.xlu1 %2208 }
 0x472   : > { %2774 = vst.msk [vmem:[%s6304_s24 + $0xd8] sm:$0xff] %vm2714_vm10, %v2228_v20  ;;  %v2210_v16 = vcvt.f32.s32 %v2209_v61 }
 0x473   : > { %v2254_v15 = vpop.xlane.xlu0 %2253 }
 0x474   : > { %v2213_v26 = vadd.s32 %v2212_v35, %v2210_v16  ;;  %v2255_v34 = vcvt.f32.s32 %v2254_v15 }
 0x475   : > { %v2239_v1 = vpop.xlane.xlu1 %2238 }
 0x476   : > { %2773 = vst.msk [vmem:[%s6304_s24 + $0xd0] sm:$0xff] %vm2714_vm10, %v2213_v26  ;;  %v2258_v9 = vadd.s32 %v2257_v48, %v2255_v34  ;;  %v2240_v42 = vcvt.f32.s32 %v2239_v1 }
 0x477   : > { %v2284_v19 = vpop.xlane.xlu0 %2283 }
 0x478   : > { %2776 = vst.msk [vmem:[%s6304_s24 + $0xe8] sm:$0xff] %vm2714_vm10, %v2258_v9  ;;  %v2243_v8 = vadd.s32 %v2242_v54, %v2240_v42  ;;  %v2285_v29 = vcvt.f32.s32 %v2284_v19 }
 0x479   : > { %v2269_v39 = vpop.xlane.xlu1 %2268 }
 0x47a   : > { %2775 = vst.msk [vmem:[%s6304_s24 + $0xe0] sm:$0xff] %vm2714_vm10, %v2243_v8  ;;  %v2288_v37 = vadd.s32 %v2287_v28, %v2285_v29  ;;  %v2270_v53 = vcvt.f32.s32 %v2269_v39 }
 0x47c   : > { %2778 = vst.msk [vmem:[%s6304_s24 + $0xf8] sm:$0xff] %vm2714_vm10, %v2288_v37  ;;  %v2273_v11 = vadd.s32 %v2272_v5, %v2270_v53 }
 0x47e   : > { %2777 = vst.msk [vmem:[%s6304_s24 + $0xf0] sm:$0xff] %vm2714_vm10, %v2273_v11 }
 0x47f PF: > { %p3776_p13 = scmp.ge.s32.totalorder %s3902_s30, 2  ;;  %s3304_s9 = sand.u32 1, %s3890_s27  }
 0x480   : > { %s3305_s19 = scalar_lea.sflag [#allocation3], %s3304_s9 }
 0x481   : > { %p3773_p0 = pnand %p3776_p13, %p3993_p6 }
 0x483   : > { %p3774_p1 = pneg %p3773_p0 }
 0x485   : > { %3885 = dma.done.wait (%p3774_p1), %s3305_s19, 16  }
 0x486   : > { %3887 = vsyncadd (%p3774_p1), %s3305_s19, 4294967280  ;;  %p19_p2 = scmp.ge.s32.totalorder %s3976_s11, 4   ;;  %s6773_s27 = smov %s3894_s28 }
 0x487   : > { %s6774_s28 = smov %s3898_s29  ;;  %s6775_s29 = smov %s3987_s14 }
 0x488   : > { %s6776_s30 = smov %s3976_s11  ;;  %21 = sbr.rel (!%p19_p2) target bundleno = 5 (0x5), region = 119 }
 0x48d   :  { %3309 = vsyncpa [#allocation3], 1 }
 0x48e   :  { %3311 = vsyncpa [#allocation3 + $0x1], 1 }

</bundles_post_ra>
